<compile_context>
chip_gen: v7x
topology: tpu7x:2x2x1
jax: 0.10.0
libtpu: 0.0.40
codegen_flags: <defaults>
</compile_context>

<pallas_src>
import jax
import jax.numpy as jnp
from jax.experimental import pallas as pl
from jax.experimental.pallas import tpu as pltpu

SCALE = 2

K1 = 5            # conv1 kernel size
K2 = 5            # conv2 kernel size
K3 = 3            # conv3 kernel size
C1 = 64           # conv1 output channels
C2 = 32           # conv2 output channels
C3 = SCALE ** 2   # conv3 output channels


def _make_fused_kernel(N, H1, W1, H2, W2, H3, W3):
    """Builds the fused conv1(+ReLU) -> conv2(+ReLU) -> conv3 kernel."""

    def kernel(p1_ref, w1_ref, b1_ref, w2_ref, b2_ref, w3_ref, b3_ref, o_ref):
        # ---- conv1: patches were built in the wrapper -> one MXU matmul.
        a1 = jnp.dot(p1_ref[...], w1_ref[...],
                     preferred_element_type=jnp.float32)         # (N*H1*W1, C1)
        a1 = jnp.maximum(a1 + b1_ref[...], 0.0)
        a1 = a1.reshape(N, H1, W1, C1)                           # tap slicing view

        # ---- conv2: per-tap MXU-accumulated matmuls (no patch-matrix concat).
        acc2 = jnp.zeros((N * H2 * W2, C2), jnp.float32)
        t = 0
        for i in range(K2):
            for j in range(K2):
                lhs = a1[:, i:i + H2, j:j + W2, :].reshape(N * H2 * W2, C1)
                rhs = w2_ref[t * C1:(t + 1) * C1, :]             # (C1, C2)
                acc2 = acc2 + jnp.dot(lhs, rhs,
                                      preferred_element_type=jnp.float32)
                t += 1
        a2 = jnp.maximum(acc2 + b2_ref[...], 0.0)                # (N*H2*W2, C2)
        a2 = a2.reshape(N, H2, W2, C2)

        # ---- conv3: per-tap MXU-accumulated matmuls, no activation.
        acc3 = jnp.zeros((N * H3 * W3, C3), jnp.float32)
        t = 0
        for i in range(K3):
            for j in range(K3):
                lhs = a2[:, i:i + H3, j:j + W3, :].reshape(N * H3 * W3, C2)
                rhs = w3_ref[t * C2:(t + 1) * C2, :]             # (C2, C3)
                acc3 = acc3 + jnp.dot(lhs, rhs,
                                      preferred_element_type=jnp.float32)
                t += 1

        # Store channel-minor (no in-kernel minor-dim relayout at this size);
        # the tiny (N*6*6*4 element) NHWC->NCHW shuffle happens outside.
        o_ref[...] = (acc3 + b3_ref[...]).astype(o_ref.dtype)    # (N*H3*W3, C3)

    return kernel


def cnn_net_pallas(p1, w1f, b1, w2f, b2, w3f, b3, *,
                   N, H1, W1, H2, W2, H3, W3):
    """Single fused pallas_call over the whole batch (no grid)."""
    flops = (2 * N * H1 * W1 * (K1 * K1) * C1
             + 2 * N * H2 * W2 * (K2 * K2 * C1) * C2
             + 2 * N * H3 * W3 * (K3 * K3 * C2) * C3)
    bytes_accessed = sum(int(a.size) * a.dtype.itemsize
                         for a in (p1, w1f, b1, w2f, b2, w3f, b3))
    bytes_accessed += N * H3 * W3 * C3 * 4

    vmem = pl.BlockSpec(memory_space=pltpu.MemorySpace.VMEM)
    return pl.pallas_call(
        _make_fused_kernel(N, H1, W1, H2, W2, H3, W3),
        out_shape=jax.ShapeDtypeStruct((N * H3 * W3, C3), jnp.float32),
        in_specs=[vmem] * 7,
        out_specs=vmem,
        cost_estimate=pl.CostEstimate(flops=flops, transcendentals=0,
                                      bytes_accessed=bytes_accessed),
    )(p1, w1f, b1, w2f, b2, w3f, b3)


def init_params(key):
    """Deterministic init matching nn.init.normal_(std=0.001), bias=0."""
    k1, k2, k3 = jax.random.split(key, 3)
    # PyTorch conv weights are OIHW; we build them directly in HWIO.
    w1 = 0.001 * jax.random.normal(k1, (K1, K1, 1, C1), jnp.float32)
    b1 = jnp.zeros((1, C1), jnp.float32)
    w2 = 0.001 * jax.random.normal(k2, (K2, K2, C1, C2), jnp.float32)
    b2 = jnp.zeros((1, C2), jnp.float32)
    w3 = 0.001 * jax.random.normal(k3, (K3, K3, C2, C3), jnp.float32)
    b3 = jnp.zeros((1, C3), jnp.float32)
    return (w1, b1), (w2, b2), (w3, b3)


@jax.jit
def cnn_net_forward(x_nchw, params):
    """Forward pass matching CnnNet.forward (NCHW in / NCHW out like PyTorch)."""
    (w1, b1), (w2, b2), (w3, b3) = params
    N, C, H, W = x_nchw.shape
    assert C == 1, "conv1 expects a single input channel"
    H1, W1 = H - (K1 - 1), W - (K1 - 1)
    H2, W2 = H1 - (K2 - 1), W1 - (K2 - 1)
    H3, W3 = H2 - (K3 - 1), W2 - (K3 - 1)

    # conv1 im2col in the wrapper (Cin=1 is lane-degenerate in-kernel; XLA
    # builds the tiny (N*H1*W1, 25) patch matrix here for free).
    x2d = x_nchw[:, 0, :, :]                                     # (N, H, W)
    taps = [x2d[:, i:i + H1, j:j + W1]                           # (kh, kw) order
            for i in range(K1) for j in range(K1)]
    p1 = jnp.stack(taps, axis=-1).reshape(N * H1 * W1, K1 * K1)

    # Pre-flatten HWIO weights to (KH*KW*Cin, Cout); row order (kh, kw, cin)
    # matches both the conv1 patch matrix and the in-kernel per-tap slices.
    w1f = w1.reshape(-1, C1)
    w2f = w2.reshape(-1, C2)
    w3f = w3.reshape(-1, C3)

    y2d = cnn_net_pallas(p1, w1f, b1, w2f, b2, w3f, b3,
                         N=N, H1=H1, W1=W1, H2=H2, W2=W2, H3=H3, W3=W3)
    # Tiny output (N*4*6*6 elements); NHWC -> NCHW handled by XLA outside.
    return y2d.reshape(N, H3, W3, C3).transpose(0, 3, 1, 2)


def _reference_forward(x_nchw, params):
    """Plain-JAX reference (lax.conv) for correctness check."""
    (w1, b1), (w2, b2), (w3, b3) = params

    def conv(x, w, b, relu):
        y = jax.lax.conv_general_dilated(
            x, w, window_strides=(1, 1), padding="VALID",
            dimension_numbers=("NCHW", "HWIO", "NCHW"))
        y = y + b.reshape(1, -1, 1, 1)
        return jnp.maximum(y, 0.0) if relu else y

    x = conv(x_nchw, w1, b1, True)
    x = conv(x, w2, b2, True)
    return conv(x, w3, b3, False)


if __name__ == "__main__":
    key = jax.random.PRNGKey(0)
    k_params, k_x = jax.random.split(key)

    params = init_params(k_params)
    # Small input consistent with the module: N=2, Cin=1 (conv1 expects one
    # input channel), 16x16 spatial -> output (2, 4, 6, 6).
    x = jax.random.normal(k_x, (2, 1, 16, 16), jnp.float32)

    out = jax.block_until_ready(cnn_net_forward(x, params))

    ref = _reference_forward(x, params)
    assert out.shape == (2, SCALE ** 2, 6, 6), out.shape
    assert jnp.allclose(out, ref, atol=1e-5, rtol=1e-4), "mismatch vs reference"

    print("KERNEL_OK")
</pallas_src>

<mosaic_0001>
module attributes {stable_mosaic.version = 11 : i64} {
  func.func @kernel(%arg0: memref<288x25xf32, #tpu.memory_space<vmem>>, %arg1: memref<25x64xf32, #tpu.memory_space<vmem>>, %arg2: memref<1x64xf32, #tpu.memory_space<vmem>>, %arg3: memref<1600x32xf32, #tpu.memory_space<vmem>>, %arg4: memref<1x32xf32, #tpu.memory_space<vmem>>, %arg5: memref<288x4xf32, #tpu.memory_space<vmem>>, %arg6: memref<1x4xf32, #tpu.memory_space<vmem>>, %arg7: memref<72x4xf32, #tpu.memory_space<vmem>>) attributes {dimension_semantics = [], scalar_prefetch = 0 : i64, scratch_operands = 0 : i64, tpu.core_type = #tpu.core_type<tc>} {
    %c0 = arith.constant 0 : index
    %c0_0 = arith.constant 0 : index
    %0 = vector.load %arg0[%c0, %c0_0] : memref<288x25xf32, #tpu.memory_space<vmem>>, vector<288x25xf32>
    %c0_1 = arith.constant 0 : index
    %c0_2 = arith.constant 0 : index
    %1 = vector.load %arg1[%c0_1, %c0_2] : memref<25x64xf32, #tpu.memory_space<vmem>>, vector<25x64xf32>
    %cst = arith.constant dense<0.000000e+00> : vector<288x64xf32>
    %2 = tpu.matmul %0, %1, %cst {dimension_numbers = #tpu.dot_dimension_numbers<[1], [0], [0], [1], [0, 0, 1, 1], [], []>} : vector<288x25xf32>, vector<25x64xf32>, vector<288x64xf32> -> vector<288x64xf32>
    %c0_3 = arith.constant 0 : index
    %c0_4 = arith.constant 0 : index
    %3 = vector.load %arg2[%c0_3, %c0_4] : memref<1x64xf32, #tpu.memory_space<vmem>>, vector<1x64xf32>
    %4 = vector.broadcast %3 : vector<1x64xf32> to vector<288x64xf32>
    %5 = arith.addf %2, %4 : vector<288x64xf32>
    %cst_5 = arith.constant 0.000000e+00 : f32
    %6 = vector.broadcast %cst_5 : f32 to vector<288x64xf32>
    %7 = arith.maximumf %5, %6 : vector<288x64xf32>
    %8 = vector.shape_cast %7 : vector<288x64xf32> to vector<2x12x12x64xf32>
    %cst_6 = arith.constant 0.000000e+00 : f32
    %9 = vector.broadcast %cst_6 : f32 to vector<128x32xf32>
    %10 = vector.extract_strided_slice %8 {offsets = [0, 0, 0, 0], sizes = [2, 8, 8, 64], strides = [1, 1, 1, 1]} : vector<2x12x12x64xf32> to vector<2x8x8x64xf32>
    %11 = vector.shape_cast %10 : vector<2x8x8x64xf32> to vector<128x64xf32>
    %c0_7 = arith.constant 0 : index
    %c0_8 = arith.constant 0 : index
    %12 = vector.load %arg3[%c0_7, %c0_8] : memref<1600x32xf32, #tpu.memory_space<vmem>>, vector<64x32xf32>
    %cst_9 = arith.constant dense<0.000000e+00> : vector<128x32xf32>
    %13 = tpu.matmul %11, %12, %cst_9 {dimension_numbers = #tpu.dot_dimension_numbers<[1], [0], [0], [1], [0, 0, 1, 1], [], []>} : vector<128x64xf32>, vector<64x32xf32>, vector<128x32xf32> -> vector<128x32xf32>
    %14 = arith.addf %9, %13 : vector<128x32xf32>
    %15 = vector.extract_strided_slice %8 {offsets = [0, 0, 1, 0], sizes = [2, 8, 8, 64], strides = [1, 1, 1, 1]} : vector<2x12x12x64xf32> to vector<2x8x8x64xf32>
    %16 = vector.shape_cast %15 : vector<2x8x8x64xf32> to vector<128x64xf32>
    %c64 = arith.constant 64 : index
    %c0_10 = arith.constant 0 : index
    %17 = vector.load %arg3[%c64, %c0_10] : memref<1600x32xf32, #tpu.memory_space<vmem>>, vector<64x32xf32>
    %cst_11 = arith.constant dense<0.000000e+00> : vector<128x32xf32>
    %18 = tpu.matmul %16, %17, %cst_11 {dimension_numbers = #tpu.dot_dimension_numbers<[1], [0], [0], [1], [0, 0, 1, 1], [], []>} : vector<128x64xf32>, vector<64x32xf32>, vector<128x32xf32> -> vector<128x32xf32>
    %19 = arith.addf %14, %18 : vector<128x32xf32>
    %20 = vector.extract_strided_slice %8 {offsets = [0, 0, 2, 0], sizes = [2, 8, 8, 64], strides = [1, 1, 1, 1]} : vector<2x12x12x64xf32> to vector<2x8x8x64xf32>
    %21 = vector.shape_cast %20 : vector<2x8x8x64xf32> to vector<128x64xf32>
    %c128 = arith.constant 128 : index
    %c0_12 = arith.constant 0 : index
    %22 = vector.load %arg3[%c128, %c0_12] : memref<1600x32xf32, #tpu.memory_space<vmem>>, vector<64x32xf32>
    %cst_13 = arith.constant dense<0.000000e+00> : vector<128x32xf32>
    %23 = tpu.matmul %21, %22, %cst_13 {dimension_numbers = #tpu.dot_dimension_numbers<[1], [0], [0], [1], [0, 0, 1, 1], [], []>} : vector<128x64xf32>, vector<64x32xf32>, vector<128x32xf32> -> vector<128x32xf32>
    %24 = arith.addf %19, %23 : vector<128x32xf32>
    %25 = vector.extract_strided_slice %8 {offsets = [0, 0, 3, 0], sizes = [2, 8, 8, 64], strides = [1, 1, 1, 1]} : vector<2x12x12x64xf32> to vector<2x8x8x64xf32>
    %26 = vector.shape_cast %25 : vector<2x8x8x64xf32> to vector<128x64xf32>
    %c192 = arith.constant 192 : index
    %c0_14 = arith.constant 0 : index
    %27 = vector.load %arg3[%c192, %c0_14] : memref<1600x32xf32, #tpu.memory_space<vmem>>, vector<64x32xf32>
    %cst_15 = arith.constant dense<0.000000e+00> : vector<128x32xf32>
    %28 = tpu.matmul %26, %27, %cst_15 {dimension_numbers = #tpu.dot_dimension_numbers<[1], [0], [0], [1], [0, 0, 1, 1], [], []>} : vector<128x64xf32>, vector<64x32xf32>, vector<128x32xf32> -> vector<128x32xf32>
    %29 = arith.addf %24, %28 : vector<128x32xf32>
    %30 = vector.extract_strided_slice %8 {offsets = [0, 0, 4, 0], sizes = [2, 8, 8, 64], strides = [1, 1, 1, 1]} : vector<2x12x12x64xf32> to vector<2x8x8x64xf32>
    %31 = vector.shape_cast %30 : vector<2x8x8x64xf32> to vector<128x64xf32>
    %c256 = arith.constant 256 : index
    %c0_16 = arith.constant 0 : index
    %32 = vector.load %arg3[%c256, %c0_16] : memref<1600x32xf32, #tpu.memory_space<vmem>>, vector<64x32xf32>
    %cst_17 = arith.constant dense<0.000000e+00> : vector<128x32xf32>
    %33 = tpu.matmul %31, %32, %cst_17 {dimension_numbers = #tpu.dot_dimension_numbers<[1], [0], [0], [1], [0, 0, 1, 1], [], []>} : vector<128x64xf32>, vector<64x32xf32>, vector<128x32xf32> -> vector<128x32xf32>
    %34 = arith.addf %29, %33 : vector<128x32xf32>
    %35 = vector.extract_strided_slice %8 {offsets = [0, 1, 0, 0], sizes = [2, 8, 8, 64], strides = [1, 1, 1, 1]} : vector<2x12x12x64xf32> to vector<2x8x8x64xf32>
    %36 = vector.shape_cast %35 : vector<2x8x8x64xf32> to vector<128x64xf32>
    %c320 = arith.constant 320 : index
    %c0_18 = arith.constant 0 : index
    %37 = vector.load %arg3[%c320, %c0_18] : memref<1600x32xf32, #tpu.memory_space<vmem>>, vector<64x32xf32>
    %cst_19 = arith.constant dense<0.000000e+00> : vector<128x32xf32>
    %38 = tpu.matmul %36, %37, %cst_19 {dimension_numbers = #tpu.dot_dimension_numbers<[1], [0], [0], [1], [0, 0, 1, 1], [], []>} : vector<128x64xf32>, vector<64x32xf32>, vector<128x32xf32> -> vector<128x32xf32>
    %39 = arith.addf %34, %38 : vector<128x32xf32>
    %40 = vector.extract_strided_slice %8 {offsets = [0, 1, 1, 0], sizes = [2, 8, 8, 64], strides = [1, 1, 1, 1]} : vector<2x12x12x64xf32> to vector<2x8x8x64xf32>
    %41 = vector.shape_cast %40 : vector<2x8x8x64xf32> to vector<128x64xf32>
    %c384 = arith.constant 384 : index
    %c0_20 = arith.constant 0 : index
    %42 = vector.load %arg3[%c384, %c0_20] : memref<1600x32xf32, #tpu.memory_space<vmem>>, vector<64x32xf32>
    %cst_21 = arith.constant dense<0.000000e+00> : vector<128x32xf32>
    %43 = tpu.matmul %41, %42, %cst_21 {dimension_numbers = #tpu.dot_dimension_numbers<[1], [0], [0], [1], [0, 0, 1, 1], [], []>} : vector<128x64xf32>, vector<64x32xf32>, vector<128x32xf32> -> vector<128x32xf32>
    %44 = arith.addf %39, %43 : vector<128x32xf32>
    %45 = vector.extract_strided_slice %8 {offsets = [0, 1, 2, 0], sizes = [2, 8, 8, 64], strides = [1, 1, 1, 1]} : vector<2x12x12x64xf32> to vector<2x8x8x64xf32>
    %46 = vector.shape_cast %45 : vector<2x8x8x64xf32> to vector<128x64xf32>
    %c448 = arith.constant 448 : index
    %c0_22 = arith.constant 0 : index
    %47 = vector.load %arg3[%c448, %c0_22] : memref<1600x32xf32, #tpu.memory_space<vmem>>, vector<64x32xf32>
    %cst_23 = arith.constant dense<0.000000e+00> : vector<128x32xf32>
    %48 = tpu.matmul %46, %47, %cst_23 {dimension_numbers = #tpu.dot_dimension_numbers<[1], [0], [0], [1], [0, 0, 1, 1], [], []>} : vector<128x64xf32>, vector<64x32xf32>, vector<128x32xf32> -> vector<128x32xf32>
    %49 = arith.addf %44, %48 : vector<128x32xf32>
    %50 = vector.extract_strided_slice %8 {offsets = [0, 1, 3, 0], sizes = [2, 8, 8, 64], strides = [1, 1, 1, 1]} : vector<2x12x12x64xf32> to vector<2x8x8x64xf32>
    %51 = vector.shape_cast %50 : vector<2x8x8x64xf32> to vector<128x64xf32>
    %c512 = arith.constant 512 : index
    %c0_24 = arith.constant 0 : index
    %52 = vector.load %arg3[%c512, %c0_24] : memref<1600x32xf32, #tpu.memory_space<vmem>>, vector<64x32xf32>
    %cst_25 = arith.constant dense<0.000000e+00> : vector<128x32xf32>
    %53 = tpu.matmul %51, %52, %cst_25 {dimension_numbers = #tpu.dot_dimension_numbers<[1], [0], [0], [1], [0, 0, 1, 1], [], []>} : vector<128x64xf32>, vector<64x32xf32>, vector<128x32xf32> -> vector<128x32xf32>
    %54 = arith.addf %49, %53 : vector<128x32xf32>
    %55 = vector.extract_strided_slice %8 {offsets = [0, 1, 4, 0], sizes = [2, 8, 8, 64], strides = [1, 1, 1, 1]} : vector<2x12x12x64xf32> to vector<2x8x8x64xf32>
    %56 = vector.shape_cast %55 : vector<2x8x8x64xf32> to vector<128x64xf32>
    %c576 = arith.constant 576 : index
    %c0_26 = arith.constant 0 : index
    %57 = vector.load %arg3[%c576, %c0_26] : memref<1600x32xf32, #tpu.memory_space<vmem>>, vector<64x32xf32>
    %cst_27 = arith.constant dense<0.000000e+00> : vector<128x32xf32>
    %58 = tpu.matmul %56, %57, %cst_27 {dimension_numbers = #tpu.dot_dimension_numbers<[1], [0], [0], [1], [0, 0, 1, 1], [], []>} : vector<128x64xf32>, vector<64x32xf32>, vector<128x32xf32> -> vector<128x32xf32>
    %59 = arith.addf %54, %58 : vector<128x32xf32>
    %60 = vector.extract_strided_slice %8 {offsets = [0, 2, 0, 0], sizes = [2, 8, 8, 64], strides = [1, 1, 1, 1]} : vector<2x12x12x64xf32> to vector<2x8x8x64xf32>
    %61 = vector.shape_cast %60 : vector<2x8x8x64xf32> to vector<128x64xf32>
    %c640 = arith.constant 640 : index
    %c0_28 = arith.constant 0 : index
    %62 = vector.load %arg3[%c640, %c0_28] : memref<1600x32xf32, #tpu.memory_space<vmem>>, vector<64x32xf32>
    %cst_29 = arith.constant dense<0.000000e+00> : vector<128x32xf32>
    %63 = tpu.matmul %61, %62, %cst_29 {dimension_numbers = #tpu.dot_dimension_numbers<[1], [0], [0], [1], [0, 0, 1, 1], [], []>} : vector<128x64xf32>, vector<64x32xf32>, vector<128x32xf32> -> vector<128x32xf32>
    %64 = arith.addf %59, %63 : vector<128x32xf32>
    %65 = vector.extract_strided_slice %8 {offsets = [0, 2, 1, 0], sizes = [2, 8, 8, 64], strides = [1, 1, 1, 1]} : vector<2x12x12x64xf32> to vector<2x8x8x64xf32>
    %66 = vector.shape_cast %65 : vector<2x8x8x64xf32> to vector<128x64xf32>
    %c704 = arith.constant 704 : index
    %c0_30 = arith.constant 0 : index
    %67 = vector.load %arg3[%c704, %c0_30] : memref<1600x32xf32, #tpu.memory_space<vmem>>, vector<64x32xf32>
    %cst_31 = arith.constant dense<0.000000e+00> : vector<128x32xf32>
    %68 = tpu.matmul %66, %67, %cst_31 {dimension_numbers = #tpu.dot_dimension_numbers<[1], [0], [0], [1], [0, 0, 1, 1], [], []>} : vector<128x64xf32>, vector<64x32xf32>, vector<128x32xf32> -> vector<128x32xf32>
    %69 = arith.addf %64, %68 : vector<128x32xf32>
    %70 = vector.extract_strided_slice %8 {offsets = [0, 2, 2, 0], sizes = [2, 8, 8, 64], strides = [1, 1, 1, 1]} : vector<2x12x12x64xf32> to vector<2x8x8x64xf32>
    %71 = vector.shape_cast %70 : vector<2x8x8x64xf32> to vector<128x64xf32>
    %c768 = arith.constant 768 : index
    %c0_32 = arith.constant 0 : index
    %72 = vector.load %arg3[%c768, %c0_32] : memref<1600x32xf32, #tpu.memory_space<vmem>>, vector<64x32xf32>
    %cst_33 = arith.constant dense<0.000000e+00> : vector<128x32xf32>
    %73 = tpu.matmul %71, %72, %cst_33 {dimension_numbers = #tpu.dot_dimension_numbers<[1], [0], [0], [1], [0, 0, 1, 1], [], []>} : vector<128x64xf32>, vector<64x32xf32>, vector<128x32xf32> -> vector<128x32xf32>
    %74 = arith.addf %69, %73 : vector<128x32xf32>
    %75 = vector.extract_strided_slice %8 {offsets = [0, 2, 3, 0], sizes = [2, 8, 8, 64], strides = [1, 1, 1, 1]} : vector<2x12x12x64xf32> to vector<2x8x8x64xf32>
    %76 = vector.shape_cast %75 : vector<2x8x8x64xf32> to vector<128x64xf32>
    %c832 = arith.constant 832 : index
    %c0_34 = arith.constant 0 : index
    %77 = vector.load %arg3[%c832, %c0_34] : memref<1600x32xf32, #tpu.memory_space<vmem>>, vector<64x32xf32>
    %cst_35 = arith.constant dense<0.000000e+00> : vector<128x32xf32>
    %78 = tpu.matmul %76, %77, %cst_35 {dimension_numbers = #tpu.dot_dimension_numbers<[1], [0], [0], [1], [0, 0, 1, 1], [], []>} : vector<128x64xf32>, vector<64x32xf32>, vector<128x32xf32> -> vector<128x32xf32>
    %79 = arith.addf %74, %78 : vector<128x32xf32>
    %80 = vector.extract_strided_slice %8 {offsets = [0, 2, 4, 0], sizes = [2, 8, 8, 64], strides = [1, 1, 1, 1]} : vector<2x12x12x64xf32> to vector<2x8x8x64xf32>
    %81 = vector.shape_cast %80 : vector<2x8x8x64xf32> to vector<128x64xf32>
    %c896 = arith.constant 896 : index
    %c0_36 = arith.constant 0 : index
    %82 = vector.load %arg3[%c896, %c0_36] : memref<1600x32xf32, #tpu.memory_space<vmem>>, vector<64x32xf32>
    %cst_37 = arith.constant dense<0.000000e+00> : vector<128x32xf32>
    %83 = tpu.matmul %81, %82, %cst_37 {dimension_numbers = #tpu.dot_dimension_numbers<[1], [0], [0], [1], [0, 0, 1, 1], [], []>} : vector<128x64xf32>, vector<64x32xf32>, vector<128x32xf32> -> vector<128x32xf32>
    %84 = arith.addf %79, %83 : vector<128x32xf32>
    %85 = vector.extract_strided_slice %8 {offsets = [0, 3, 0, 0], sizes = [2, 8, 8, 64], strides = [1, 1, 1, 1]} : vector<2x12x12x64xf32> to vector<2x8x8x64xf32>
    %86 = vector.shape_cast %85 : vector<2x8x8x64xf32> to vector<128x64xf32>
    %c960 = arith.constant 960 : index
    %c0_38 = arith.constant 0 : index
    %87 = vector.load %arg3[%c960, %c0_38] : memref<1600x32xf32, #tpu.memory_space<vmem>>, vector<64x32xf32>
    %cst_39 = arith.constant dense<0.000000e+00> : vector<128x32xf32>
    %88 = tpu.matmul %86, %87, %cst_39 {dimension_numbers = #tpu.dot_dimension_numbers<[1], [0], [0], [1], [0, 0, 1, 1], [], []>} : vector<128x64xf32>, vector<64x32xf32>, vector<128x32xf32> -> vector<128x32xf32>
    %89 = arith.addf %84, %88 : vector<128x32xf32>
    %90 = vector.extract_strided_slice %8 {offsets = [0, 3, 1, 0], sizes = [2, 8, 8, 64], strides = [1, 1, 1, 1]} : vector<2x12x12x64xf32> to vector<2x8x8x64xf32>
    %91 = vector.shape_cast %90 : vector<2x8x8x64xf32> to vector<128x64xf32>
    %c1024 = arith.constant 1024 : index
    %c0_40 = arith.constant 0 : index
    %92 = vector.load %arg3[%c1024, %c0_40] : memref<1600x32xf32, #tpu.memory_space<vmem>>, vector<64x32xf32>
    %cst_41 = arith.constant dense<0.000000e+00> : vector<128x32xf32>
    %93 = tpu.matmul %91, %92, %cst_41 {dimension_numbers = #tpu.dot_dimension_numbers<[1], [0], [0], [1], [0, 0, 1, 1], [], []>} : vector<128x64xf32>, vector<64x32xf32>, vector<128x32xf32> -> vector<128x32xf32>
    %94 = arith.addf %89, %93 : vector<128x32xf32>
    %95 = vector.extract_strided_slice %8 {offsets = [0, 3, 2, 0], sizes = [2, 8, 8, 64], strides = [1, 1, 1, 1]} : vector<2x12x12x64xf32> to vector<2x8x8x64xf32>
    %96 = vector.shape_cast %95 : vector<2x8x8x64xf32> to vector<128x64xf32>
    %c1088 = arith.constant 1088 : index
    %c0_42 = arith.constant 0 : index
    %97 = vector.load %arg3[%c1088, %c0_42] : memref<1600x32xf32, #tpu.memory_space<vmem>>, vector<64x32xf32>
    %cst_43 = arith.constant dense<0.000000e+00> : vector<128x32xf32>
    %98 = tpu.matmul %96, %97, %cst_43 {dimension_numbers = #tpu.dot_dimension_numbers<[1], [0], [0], [1], [0, 0, 1, 1], [], []>} : vector<128x64xf32>, vector<64x32xf32>, vector<128x32xf32> -> vector<128x32xf32>
    %99 = arith.addf %94, %98 : vector<128x32xf32>
    %100 = vector.extract_strided_slice %8 {offsets = [0, 3, 3, 0], sizes = [2, 8, 8, 64], strides = [1, 1, 1, 1]} : vector<2x12x12x64xf32> to vector<2x8x8x64xf32>
    %101 = vector.shape_cast %100 : vector<2x8x8x64xf32> to vector<128x64xf32>
    %c1152 = arith.constant 1152 : index
    %c0_44 = arith.constant 0 : index
    %102 = vector.load %arg3[%c1152, %c0_44] : memref<1600x32xf32, #tpu.memory_space<vmem>>, vector<64x32xf32>
    %cst_45 = arith.constant dense<0.000000e+00> : vector<128x32xf32>
    %103 = tpu.matmul %101, %102, %cst_45 {dimension_numbers = #tpu.dot_dimension_numbers<[1], [0], [0], [1], [0, 0, 1, 1], [], []>} : vector<128x64xf32>, vector<64x32xf32>, vector<128x32xf32> -> vector<128x32xf32>
    %104 = arith.addf %99, %103 : vector<128x32xf32>
    %105 = vector.extract_strided_slice %8 {offsets = [0, 3, 4, 0], sizes = [2, 8, 8, 64], strides = [1, 1, 1, 1]} : vector<2x12x12x64xf32> to vector<2x8x8x64xf32>
    %106 = vector.shape_cast %105 : vector<2x8x8x64xf32> to vector<128x64xf32>
    %c1216 = arith.constant 1216 : index
    %c0_46 = arith.constant 0 : index
    %107 = vector.load %arg3[%c1216, %c0_46] : memref<1600x32xf32, #tpu.memory_space<vmem>>, vector<64x32xf32>
    %cst_47 = arith.constant dense<0.000000e+00> : vector<128x32xf32>
    %108 = tpu.matmul %106, %107, %cst_47 {dimension_numbers = #tpu.dot_dimension_numbers<[1], [0], [0], [1], [0, 0, 1, 1], [], []>} : vector<128x64xf32>, vector<64x32xf32>, vector<128x32xf32> -> vector<128x32xf32>
    %109 = arith.addf %104, %108 : vector<128x32xf32>
    %110 = vector.extract_strided_slice %8 {offsets = [0, 4, 0, 0], sizes = [2, 8, 8, 64], strides = [1, 1, 1, 1]} : vector<2x12x12x64xf32> to vector<2x8x8x64xf32>
    %111 = vector.shape_cast %110 : vector<2x8x8x64xf32> to vector<128x64xf32>
    %c1280 = arith.constant 1280 : index
    %c0_48 = arith.constant 0 : index
    %112 = vector.load %arg3[%c1280, %c0_48] : memref<1600x32xf32, #tpu.memory_space<vmem>>, vector<64x32xf32>
    %cst_49 = arith.constant dense<0.000000e+00> : vector<128x32xf32>
    %113 = tpu.matmul %111, %112, %cst_49 {dimension_numbers = #tpu.dot_dimension_numbers<[1], [0], [0], [1], [0, 0, 1, 1], [], []>} : vector<128x64xf32>, vector<64x32xf32>, vector<128x32xf32> -> vector<128x32xf32>
    %114 = arith.addf %109, %113 : vector<128x32xf32>
    %115 = vector.extract_strided_slice %8 {offsets = [0, 4, 1, 0], sizes = [2, 8, 8, 64], strides = [1, 1, 1, 1]} : vector<2x12x12x64xf32> to vector<2x8x8x64xf32>
    %116 = vector.shape_cast %115 : vector<2x8x8x64xf32> to vector<128x64xf32>
    %c1344 = arith.constant 1344 : index
    %c0_50 = arith.constant 0 : index
    %117 = vector.load %arg3[%c1344, %c0_50] : memref<1600x32xf32, #tpu.memory_space<vmem>>, vector<64x32xf32>
    %cst_51 = arith.constant dense<0.000000e+00> : vector<128x32xf32>
    %118 = tpu.matmul %116, %117, %cst_51 {dimension_numbers = #tpu.dot_dimension_numbers<[1], [0], [0], [1], [0, 0, 1, 1], [], []>} : vector<128x64xf32>, vector<64x32xf32>, vector<128x32xf32> -> vector<128x32xf32>
    %119 = arith.addf %114, %118 : vector<128x32xf32>
    %120 = vector.extract_strided_slice %8 {offsets = [0, 4, 2, 0], sizes = [2, 8, 8, 64], strides = [1, 1, 1, 1]} : vector<2x12x12x64xf32> to vector<2x8x8x64xf32>
    %121 = vector.shape_cast %120 : vector<2x8x8x64xf32> to vector<128x64xf32>
    %c1408 = arith.constant 1408 : index
    %c0_52 = arith.constant 0 : index
    %122 = vector.load %arg3[%c1408, %c0_52] : memref<1600x32xf32, #tpu.memory_space<vmem>>, vector<64x32xf32>
    %cst_53 = arith.constant dense<0.000000e+00> : vector<128x32xf32>
    %123 = tpu.matmul %121, %122, %cst_53 {dimension_numbers = #tpu.dot_dimension_numbers<[1], [0], [0], [1], [0, 0, 1, 1], [], []>} : vector<128x64xf32>, vector<64x32xf32>, vector<128x32xf32> -> vector<128x32xf32>
    %124 = arith.addf %119, %123 : vector<128x32xf32>
    %125 = vector.extract_strided_slice %8 {offsets = [0, 4, 3, 0], sizes = [2, 8, 8, 64], strides = [1, 1, 1, 1]} : vector<2x12x12x64xf32> to vector<2x8x8x64xf32>
    %126 = vector.shape_cast %125 : vector<2x8x8x64xf32> to vector<128x64xf32>
    %c1472 = arith.constant 1472 : index
    %c0_54 = arith.constant 0 : index
    %127 = vector.load %arg3[%c1472, %c0_54] : memref<1600x32xf32, #tpu.memory_space<vmem>>, vector<64x32xf32>
    %cst_55 = arith.constant dense<0.000000e+00> : vector<128x32xf32>
    %128 = tpu.matmul %126, %127, %cst_55 {dimension_numbers = #tpu.dot_dimension_numbers<[1], [0], [0], [1], [0, 0, 1, 1], [], []>} : vector<128x64xf32>, vector<64x32xf32>, vector<128x32xf32> -> vector<128x32xf32>
    %129 = arith.addf %124, %128 : vector<128x32xf32>
    %130 = vector.extract_strided_slice %8 {offsets = [0, 4, 4, 0], sizes = [2, 8, 8, 64], strides = [1, 1, 1, 1]} : vector<2x12x12x64xf32> to vector<2x8x8x64xf32>
    %131 = vector.shape_cast %130 : vector<2x8x8x64xf32> to vector<128x64xf32>
    %c1536 = arith.constant 1536 : index
    %c0_56 = arith.constant 0 : index
    %132 = vector.load %arg3[%c1536, %c0_56] : memref<1600x32xf32, #tpu.memory_space<vmem>>, vector<64x32xf32>
    %cst_57 = arith.constant dense<0.000000e+00> : vector<128x32xf32>
    %133 = tpu.matmul %131, %132, %cst_57 {dimension_numbers = #tpu.dot_dimension_numbers<[1], [0], [0], [1], [0, 0, 1, 1], [], []>} : vector<128x64xf32>, vector<64x32xf32>, vector<128x32xf32> -> vector<128x32xf32>
    %134 = arith.addf %129, %133 : vector<128x32xf32>
    %c0_58 = arith.constant 0 : index
    %c0_59 = arith.constant 0 : index
    %135 = vector.load %arg4[%c0_58, %c0_59] : memref<1x32xf32, #tpu.memory_space<vmem>>, vector<1x32xf32>
    %136 = vector.broadcast %135 : vector<1x32xf32> to vector<128x32xf32>
    %137 = arith.addf %134, %136 : vector<128x32xf32>
    %cst_60 = arith.constant 0.000000e+00 : f32
    %138 = vector.broadcast %cst_60 : f32 to vector<128x32xf32>
    %139 = arith.maximumf %137, %138 : vector<128x32xf32>
    %140 = vector.shape_cast %139 : vector<128x32xf32> to vector<2x8x8x32xf32>
    %cst_61 = arith.constant 0.000000e+00 : f32
    %141 = vector.broadcast %cst_61 : f32 to vector<72x4xf32>
    %142 = vector.extract_strided_slice %140 {offsets = [0, 0, 0, 0], sizes = [2, 6, 6, 32], strides = [1, 1, 1, 1]} : vector<2x8x8x32xf32> to vector<2x6x6x32xf32>
    %143 = vector.shape_cast %142 : vector<2x6x6x32xf32> to vector<72x32xf32>
    %c0_62 = arith.constant 0 : index
    %c0_63 = arith.constant 0 : index
    %144 = vector.load %arg5[%c0_62, %c0_63] : memref<288x4xf32, #tpu.memory_space<vmem>>, vector<32x4xf32>
    %cst_64 = arith.constant dense<0.000000e+00> : vector<72x4xf32>
    %145 = tpu.matmul %143, %144, %cst_64 {dimension_numbers = #tpu.dot_dimension_numbers<[1], [0], [0], [1], [0, 0, 1, 1], [], []>} : vector<72x32xf32>, vector<32x4xf32>, vector<72x4xf32> -> vector<72x4xf32>
    %146 = arith.addf %141, %145 : vector<72x4xf32>
    %147 = vector.extract_strided_slice %140 {offsets = [0, 0, 1, 0], sizes = [2, 6, 6, 32], strides = [1, 1, 1, 1]} : vector<2x8x8x32xf32> to vector<2x6x6x32xf32>
    %148 = vector.shape_cast %147 : vector<2x6x6x32xf32> to vector<72x32xf32>
    %c32 = arith.constant 32 : index
    %c0_65 = arith.constant 0 : index
    %149 = vector.load %arg5[%c32, %c0_65] : memref<288x4xf32, #tpu.memory_space<vmem>>, vector<32x4xf32>
    %cst_66 = arith.constant dense<0.000000e+00> : vector<72x4xf32>
    %150 = tpu.matmul %148, %149, %cst_66 {dimension_numbers = #tpu.dot_dimension_numbers<[1], [0], [0], [1], [0, 0, 1, 1], [], []>} : vector<72x32xf32>, vector<32x4xf32>, vector<72x4xf32> -> vector<72x4xf32>
    %151 = arith.addf %146, %150 : vector<72x4xf32>
    %152 = vector.extract_strided_slice %140 {offsets = [0, 0, 2, 0], sizes = [2, 6, 6, 32], strides = [1, 1, 1, 1]} : vector<2x8x8x32xf32> to vector<2x6x6x32xf32>
    %153 = vector.shape_cast %152 : vector<2x6x6x32xf32> to vector<72x32xf32>
    %c64_67 = arith.constant 64 : index
    %c0_68 = arith.constant 0 : index
    %154 = vector.load %arg5[%c64_67, %c0_68] : memref<288x4xf32, #tpu.memory_space<vmem>>, vector<32x4xf32>
    %cst_69 = arith.constant dense<0.000000e+00> : vector<72x4xf32>
    %155 = tpu.matmul %153, %154, %cst_69 {dimension_numbers = #tpu.dot_dimension_numbers<[1], [0], [0], [1], [0, 0, 1, 1], [], []>} : vector<72x32xf32>, vector<32x4xf32>, vector<72x4xf32> -> vector<72x4xf32>
    %156 = arith.addf %151, %155 : vector<72x4xf32>
    %157 = vector.extract_strided_slice %140 {offsets = [0, 1, 0, 0], sizes = [2, 6, 6, 32], strides = [1, 1, 1, 1]} : vector<2x8x8x32xf32> to vector<2x6x6x32xf32>
    %158 = vector.shape_cast %157 : vector<2x6x6x32xf32> to vector<72x32xf32>
    %c96 = arith.constant 96 : index
    %c0_70 = arith.constant 0 : index
    %159 = vector.load %arg5[%c96, %c0_70] : memref<288x4xf32, #tpu.memory_space<vmem>>, vector<32x4xf32>
    %cst_71 = arith.constant dense<0.000000e+00> : vector<72x4xf32>
    %160 = tpu.matmul %158, %159, %cst_71 {dimension_numbers = #tpu.dot_dimension_numbers<[1], [0], [0], [1], [0, 0, 1, 1], [], []>} : vector<72x32xf32>, vector<32x4xf32>, vector<72x4xf32> -> vector<72x4xf32>
    %161 = arith.addf %156, %160 : vector<72x4xf32>
    %162 = vector.extract_strided_slice %140 {offsets = [0, 1, 1, 0], sizes = [2, 6, 6, 32], strides = [1, 1, 1, 1]} : vector<2x8x8x32xf32> to vector<2x6x6x32xf32>
    %163 = vector.shape_cast %162 : vector<2x6x6x32xf32> to vector<72x32xf32>
    %c128_72 = arith.constant 128 : index
    %c0_73 = arith.constant 0 : index
    %164 = vector.load %arg5[%c128_72, %c0_73] : memref<288x4xf32, #tpu.memory_space<vmem>>, vector<32x4xf32>
    %cst_74 = arith.constant dense<0.000000e+00> : vector<72x4xf32>
    %165 = tpu.matmul %163, %164, %cst_74 {dimension_numbers = #tpu.dot_dimension_numbers<[1], [0], [0], [1], [0, 0, 1, 1], [], []>} : vector<72x32xf32>, vector<32x4xf32>, vector<72x4xf32> -> vector<72x4xf32>
    %166 = arith.addf %161, %165 : vector<72x4xf32>
    %167 = vector.extract_strided_slice %140 {offsets = [0, 1, 2, 0], sizes = [2, 6, 6, 32], strides = [1, 1, 1, 1]} : vector<2x8x8x32xf32> to vector<2x6x6x32xf32>
    %168 = vector.shape_cast %167 : vector<2x6x6x32xf32> to vector<72x32xf32>
    %c160 = arith.constant 160 : index
    %c0_75 = arith.constant 0 : index
    %169 = vector.load %arg5[%c160, %c0_75] : memref<288x4xf32, #tpu.memory_space<vmem>>, vector<32x4xf32>
    %cst_76 = arith.constant dense<0.000000e+00> : vector<72x4xf32>
    %170 = tpu.matmul %168, %169, %cst_76 {dimension_numbers = #tpu.dot_dimension_numbers<[1], [0], [0], [1], [0, 0, 1, 1], [], []>} : vector<72x32xf32>, vector<32x4xf32>, vector<72x4xf32> -> vector<72x4xf32>
    %171 = arith.addf %166, %170 : vector<72x4xf32>
    %172 = vector.extract_strided_slice %140 {offsets = [0, 2, 0, 0], sizes = [2, 6, 6, 32], strides = [1, 1, 1, 1]} : vector<2x8x8x32xf32> to vector<2x6x6x32xf32>
    %173 = vector.shape_cast %172 : vector<2x6x6x32xf32> to vector<72x32xf32>
    %c192_77 = arith.constant 192 : index
    %c0_78 = arith.constant 0 : index
    %174 = vector.load %arg5[%c192_77, %c0_78] : memref<288x4xf32, #tpu.memory_space<vmem>>, vector<32x4xf32>
    %cst_79 = arith.constant dense<0.000000e+00> : vector<72x4xf32>
    %175 = tpu.matmul %173, %174, %cst_79 {dimension_numbers = #tpu.dot_dimension_numbers<[1], [0], [0], [1], [0, 0, 1, 1], [], []>} : vector<72x32xf32>, vector<32x4xf32>, vector<72x4xf32> -> vector<72x4xf32>
    %176 = arith.addf %171, %175 : vector<72x4xf32>
    %177 = vector.extract_strided_slice %140 {offsets = [0, 2, 1, 0], sizes = [2, 6, 6, 32], strides = [1, 1, 1, 1]} : vector<2x8x8x32xf32> to vector<2x6x6x32xf32>
    %178 = vector.shape_cast %177 : vector<2x6x6x32xf32> to vector<72x32xf32>
    %c224 = arith.constant 224 : index
    %c0_80 = arith.constant 0 : index
    %179 = vector.load %arg5[%c224, %c0_80] : memref<288x4xf32, #tpu.memory_space<vmem>>, vector<32x4xf32>
    %cst_81 = arith.constant dense<0.000000e+00> : vector<72x4xf32>
    %180 = tpu.matmul %178, %179, %cst_81 {dimension_numbers = #tpu.dot_dimension_numbers<[1], [0], [0], [1], [0, 0, 1, 1], [], []>} : vector<72x32xf32>, vector<32x4xf32>, vector<72x4xf32> -> vector<72x4xf32>
    %181 = arith.addf %176, %180 : vector<72x4xf32>
    %182 = vector.extract_strided_slice %140 {offsets = [0, 2, 2, 0], sizes = [2, 6, 6, 32], strides = [1, 1, 1, 1]} : vector<2x8x8x32xf32> to vector<2x6x6x32xf32>
    %183 = vector.shape_cast %182 : vector<2x6x6x32xf32> to vector<72x32xf32>
    %c256_82 = arith.constant 256 : index
    %c0_83 = arith.constant 0 : index
    %184 = vector.load %arg5[%c256_82, %c0_83] : memref<288x4xf32, #tpu.memory_space<vmem>>, vector<32x4xf32>
    %cst_84 = arith.constant dense<0.000000e+00> : vector<72x4xf32>
    %185 = tpu.matmul %183, %184, %cst_84 {dimension_numbers = #tpu.dot_dimension_numbers<[1], [0], [0], [1], [0, 0, 1, 1], [], []>} : vector<72x32xf32>, vector<32x4xf32>, vector<72x4xf32> -> vector<72x4xf32>
    %186 = arith.addf %181, %185 : vector<72x4xf32>
    %c0_85 = arith.constant 0 : index
    %c0_86 = arith.constant 0 : index
    %187 = vector.load %arg6[%c0_85, %c0_86] : memref<1x4xf32, #tpu.memory_space<vmem>>, vector<1x4xf32>
    %188 = vector.broadcast %187 : vector<1x4xf32> to vector<72x4xf32>
    %189 = arith.addf %186, %188 : vector<72x4xf32>
    %c0_87 = arith.constant 0 : index
    %c0_88 = arith.constant 0 : index
    %190 = vector.load %arg7[%c0_87, %c0_88] : memref<72x4xf32, #tpu.memory_space<vmem>>, vector<72x4xf32>
    tpu.vector_store %arg7[%c0_87, %c0_88], %189 {strides = array<i32>} : memref<72x4xf32, #tpu.memory_space<vmem>>, vector<72x4xf32>,
    return
  }
}

</mosaic_0001>

<bundles_post_ra>
// kernel: cnn_net_forward.1
= control target key start
LH: loop header
LB: loop body
LE: loop exit
PB: predicated region body
PF: predicated region fallthrough
CT: control target
= control target key end

     0   :  { %vm182_vm0 = vcmask 1040384   ;;  %vm5864_vm1 = vcmask 1042434   ;;  %vm73_vm2 = vcmask 203776   ;;  %vm11991_vm3 = vmmov 1   ;;  %s16697_s1 = inlined_call_operand.vmem [shape: f32[25,64], index: 1, kind: input, shape index: {}]   ;;  %s16698_s0 = inlined_call_operand.vmem [shape: f32[288,25], index: 0, kind: input, shape index: {}]   ;;  %s16699_s3 = inlined_call_operand.vmem [shape: f32[1600,32], index: 3, kind: input, shape index: {}]   ;;  %s16700_s2 = inlined_call_operand.vmem [shape: f32[1,64], index: 2, kind: input, shape index: {}]   ;;  %s16701_s5 = inlined_call_operand.vmem [shape: f32[288,4], index: 5, kind: input, shape index: {}]   ;;  %s16702_s4 = inlined_call_operand.vmem [shape: f32[1,32], index: 4, kind: input, shape index: {}]   ;;  %s16703_s6 = inlined_call_operand.vmem [shape: f32[1,4], index: 6, kind: input, shape index: {}]   ;;  %s16704_s7 = inlined_call_operand.vmem [shape: f32[72,4], index: 7, kind: output, shape index: {}]  }
   0x1   :  { %v62_v0 = vld [vmem:[%s16697_s1] sm:$0xff]  ;;  %v63_v1 = vld [vmem:[%s16697_s1 + $0x8] sm:$0xff]  ;;  %v64_v2 = vld [vmem:[%s16697_s1 + $0x10] sm:$0xff]  ;;  %vm1389_vm5 = vcmask 1044484   ;;  %v17054_v7 = vmov 0  ;;  %vm1057_vm8 = vcmask 1041408  }
   0x2   :  { %v11129_v3 = vpack.c.bf16 %v63_v1, %v62_v0  ;;  %v65_v4 = vld [vmem:[%s16697_s1 + $0x18] sm:$0x1]  ;;  %v26_v5 = vld [vmem:[%s16698_s0] sm:$0xff]  ;;  %vm11134_vm4 = vmpackc.low %vm182_vm0, %vm11991_vm3  ;;  %vm547_vm9 = vcmask 1042432   ;;  %vm548_vm10 = vcmask 1046532   ;;  %vm1058_vm11 = vcmask 1045508  }
   0x3   :  { %v11133_v6 = vpack.c.bf16 %v65_v4, %v64_v2  ;;  %9760 = vmatprep.mubr.msk.f32.mxu0 %vm73_vm2, %v26_v5  ;;  %vm5865_vm6 = vmor %vm182_vm0, %vm5864_vm1  ;;  %v27_v8 = vld [vmem:[%s16698_s0 + $0x8] sm:$0xff]  ;;  %v28_v9 = vld [vmem:[%s16698_s0 + $0x10] sm:$0xff]  ;;  %vm686_vm12 = vcmask 523264   ;;  %vm5867_vm1 = vcmask 1046534   ;;  %vm6146_vm3 = vcmask 261120  }
   0x4   :  { %11130 = vmatprep.subr.bf16.mxu0 %v11129_v3  ;;  %vm12055_vm7 = vmor %vm5865_vm6, %vm1389_vm5  ;;  %v29_v10 = vld [vmem:[%s16698_s0 + $0x18] sm:$0xff]  ;;  %v30_v11 = vld [vmem:[%s16698_s0 + $0x20] sm:$0xff] }
   0x5   :  { %11132 = vmatpush3.bf16.msra.mxu0 %v11129_v3  ;;  %v17055_v7 = vsel %vm12055_vm7, 4294967295, %v17054_v7  ;;  %v31_v12 = vld [vmem:[%s16698_s0 + $0x28] sm:$0xff]  ;;  %v32_v13 = vld [vmem:[%s16698_s0 + $0x30] sm:$0xff]  ;;  %v33_v14 = vld [vmem:[%s16698_s0 + $0x38] sm:$0xff] }
   0x6   :  { %17056 = vst [vmem:[#allocation2_spill] sm:$0xff] %v17055_v7  ;;  %11135 = vmatprep.subr.msk.bf16.mxu0 %vm11134_vm4, %v11133_v6  ;;  %v34_v15 = vld [vmem:[%s16698_s0 + $0x40] sm:$0xff]  ;;  %v35_v16 = vld [vmem:[%s16698_s0 + $0x48] sm:$0xff]  ;;  %v36_v17 = vld [vmem:[%s16698_s0 + $0x50] sm:$0xff] }
   0x7   :  { %v37_v18 = vld [vmem:[%s16698_s0 + $0x58] sm:$0xff]  ;;  %v38_v19 = vld [vmem:[%s16698_s0 + $0x60] sm:$0xff]  ;;  %v39_v20 = vld [vmem:[%s16698_s0 + $0x68] sm:$0xff] }
   0x8   :  { %v40_v21 = vld [vmem:[%s16698_s0 + $0x70] sm:$0xff]  ;;  %v41_v22 = vld [vmem:[%s16698_s0 + $0x78] sm:$0xff]  ;;  %v42_v23 = vld [vmem:[%s16698_s0 + $0x80] sm:$0xff] }
   0x9   :  { %11138 = vmatpush3.bf16.msk.msra.mxu0 %vm11134_vm4, %v11133_v6  ;;  %v43_v24 = vld [vmem:[%s16698_s0 + $0x88] sm:$0xff]  ;;  %v44_v25 = vld [vmem:[%s16698_s0 + $0x90] sm:$0xff]  ;;  %v45_v26 = vld [vmem:[%s16698_s0 + $0x98] sm:$0xff]  ;;  %vm8358_vm4 = vcmask 31744  }
   0xa   :  { %v46_v27 = vld [vmem:[%s16698_s0 + $0xa0] sm:$0xff]  ;;  %v47_v28 = vld [vmem:[%s16698_s0 + $0xa8] sm:$0xff]  ;;  %v48_v29 = vld [vmem:[%s16698_s0 + $0xb0] sm:$0xff] }
   0xb   :  { %v49_v30 = vld [vmem:[%s16698_s0 + $0xb8] sm:$0xff]  ;;  %v50_v31 = vld [vmem:[%s16698_s0 + $0xc0] sm:$0xff]  ;;  %v51_v32 = vld [vmem:[%s16698_s0 + $0xc8] sm:$0xff] }
   0xc   :  { %9761 = vmatmul.mubr.msk.f32.vlgmr.msra.gmra.mrb[0].mxu0 %vm73_vm2, %v27_v8  ;;  %v52_v33 = vld [vmem:[%s16698_s0 + $0xd0] sm:$0xff]  ;;  %v53_v34 = vld [vmem:[%s16698_s0 + $0xd8] sm:$0xff]  ;;  %v54_v35 = vld [vmem:[%s16698_s0 + $0xe0] sm:$0xff] }
   0xd   :  { %9763 = vmatprep.mubr.msk.f32.mxu0 %vm73_vm2, %v28_v9  ;;  %v55_v36 = vld [vmem:[%s16698_s0 + $0xe8] sm:$0xff]  ;;  %v56_v37 = vld [vmem:[%s16698_s0 + $0xf0] sm:$0xff]  ;;  %v57_v38 = vld [vmem:[%s16698_s0 + $0xf8] sm:$0xff] }
   0xe   :  { %v58_v39 = vld [vmem:[%s16698_s0 + $0x100] sm:$0xff]  ;;  %v59_v40 = vld [vmem:[%s16698_s0 + $0x108] sm:$0xff]  ;;  %v60_v41 = vld [vmem:[%s16698_s0 + $0x110] sm:$0xff] }
   0xf   :  { %v61_v42 = vld [vmem:[%s16698_s0 + $0x118] sm:$0xff]  ;;  %v662_v43 = vld [vmem:[%s16699_s3 + $0x40] sm:$0xff]  ;;  %v663_v44 = vld [vmem:[%s16699_s3 + $0x48] sm:$0xff] }
  0x10   :  { %9764 = vmatmul.mubr.msk.f32.gmra.mrb[2].mxu0 %vm73_vm2, %v29_v10  ;;  %v11139_v45 = vpack.c.bf16 %v663_v44, %v662_v43  ;;  %v664_v46 = vld [vmem:[%s16699_s3 + $0x50] sm:$0xff]  ;;  %v665_v47 = vld [vmem:[%s16699_s3 + $0x58] sm:$0xff]  ;;  %v666_v49 = vld [vmem:[%s16699_s3 + $0x60] sm:$0xff] }
  0x11   :  { %9766 = vmatprep.mubr.msk.f32.mxu0 %vm73_vm2, %v30_v11  ;;  %v11143_v48 = vpack.c.bf16 %v665_v47, %v664_v46  ;;  %v667_v50 = vld [vmem:[%s16699_s3 + $0x68] sm:$0xff]  ;;  %v668_v52 = vld [vmem:[%s16699_s3 + $0x70] sm:$0xff]  ;;  %v669_v53 = vld [vmem:[%s16699_s3 + $0x78] sm:$0xff] }
  0x12   :  { %11140 = vmatprep.subr.bf16.mxu0 %v11139_v45  ;;  %v11147_v51 = vpack.c.bf16 %v667_v50, %v666_v49  ;;  %v11151_v54 = vpack.c.bf16 %v669_v53, %v668_v52  ;;  %v2126_v55 = vld [vmem:[%s16699_s3 + $0x180] sm:$0xff]  ;;  %v2127_v56 = vld [vmem:[%s16699_s3 + $0x188] sm:$0xff]  ;;  %v2128_v58 = vld [vmem:[%s16699_s3 + $0x190] sm:$0xff] }
  0x13   :  { %11142 = vmatpush3.bf16.msra.mxu0 %v11139_v45  ;;  %v12229_v57 = vpack.c.bf16 %v2127_v56, %v2126_v55  ;;  %v2129_v59 = vld [vmem:[%s16699_s3 + $0x198] sm:$0xff]  ;;  %v2130_v61 = vld [vmem:[%s16699_s3 + $0x1a0] sm:$0xff]  ;;  %v2131_v62 = vld [vmem:[%s16699_s3 + $0x1a8] sm:$0xff]  ;;  %v17072_v55 = vmov 0 }
  0x14   :  { %9767 = vmatmul.mubr.msk.f32.gmra.mrb[4].mxu0 %vm73_vm2, %v31_v12  ;;  %11144 = vmatprep.subr.bf16.mxu0 %v11143_v48  ;;  %v12239_v60 = vpack.c.bf16 %v2129_v59, %v2128_v58  ;;  %v12249_v63 = vpack.c.bf16 %v2131_v62, %v2130_v61  ;;  %v2132_v0 = vld [vmem:[%s16699_s3 + $0x1b0] sm:$0xff]  ;;  %v2133_v1 = vld [vmem:[%s16699_s3 + $0x1b8] sm:$0xff]  ;;  %v539_v3 = vld [vmem:[%s16699_s3] sm:$0xff] }
  0x15   :  { %9769 = vmatprep.mubr.msk.f32.mxu0 %vm73_vm2, %v32_v13  ;;  %17057 = vst [vmem:[#allocation3_spill] sm:$0xff] %v12229_v57  ;;  %11593 = vmatprep.subr.bf16.mxu1 %v12229_v57  ;;  %v12259_v2 = vpack.c.bf16 %v2133_v1, %v2132_v0  ;;  %v540_v4 = vld [vmem:[%s16699_s3 + $0x8] sm:$0xff]  ;;  %v2315_v6 = vld [vmem:[%s16699_s3 + $0x1c0] sm:$0xff]  ;;  %vm12322_vm13 = vmor %vm547_vm9, %vm548_vm10 }
  0x16   :  { %11597 = vmatpush3.bf16.msra.mxu1 %v12229_v57  ;;  %17058 = vst [vmem:[#allocation4_spill] sm:$0xff] %v12239_v60  ;;  %17059 = vst [vmem:[#allocation5_spill] sm:$0xff] %v12249_v63  ;;  %v12269_v5 = vpack.c.bf16 %v540_v4, %v539_v3  ;;  %v2316_v8 = vld [vmem:[%s16699_s3 + $0x1c8] sm:$0xff]  ;;  %v12284_v10 = vld [vmem:[%s16700_s2] ss:$0 sm:$0xff] }
  0x17   :  { %11146 = vmatpush3.bf16.msra.mxu0 %v11143_v48  ;;  %11594 = vmatprep.subr.bf16.mxu1 %v12239_v60  ;;  %17060 = vst [vmem:[#allocation6_spill] sm:$0xff] %v12259_v2  ;;  %v12278_v9 = vpack.c.bf16 %v2316_v8, %v2315_v6  ;;  %vm12328_vm14 = vmor %vm182_vm0, %vm1389_vm5  ;;  %v541_v53 = vld [vmem:[%s16699_s3 + $0x10] sm:$0xff]  ;;  %v2507_v7 = vld [vmem:[%s16699_s3 + $0x218] sm:$0xff]  ;;  %vm11993_vm0 = vmmov 0  }
  0x18   :  { %9770 = vmatmul.mubr.msk.f32.gmra.mrb[6].mxu0 %vm73_vm2, %v33_v14  ;;  %11148 = vmatprep.subr.bf16.mxu0 %v11147_v51  ;;  %vm12356_vm15 = vmor %vm1057_vm8, %vm1058_vm11  ;;  %v1176_v57 = vld [vmem:[%s16699_s3 + $0xa0] sm:$0xff] }
  0x19   :  { %9772 = vmatprep.mubr.msk.f32.mxu0 %vm73_vm2, %v34_v15  ;;  %v17073_v55 = vsel %vm12356_vm15, 4294967295, %v17072_v55 }
  0x1a   :  { %11598 = vmatpush3.bf16.msra.mxu1 %v12239_v60  ;;  %17074 = vst [vmem:[#allocation14_spill] sm:$0xff] %v17073_v55  ;;  %v1175_v60 = vld [vmem:[%s16699_s3 + $0x98] sm:$0xff] }
  0x1b   :  { %11150 = vmatpush3.bf16.msra.mxu0 %v11147_v51  ;;  %11595 = vmatprep.subr.bf16.mxu1 %v12249_v63 }
  0x1c   :  { %9773 = vmatmul.mubr.msk.f32.gmra.mrb[8].mxu0 %vm73_vm2, %v35_v16  ;;  %11152 = vmatprep.subr.bf16.mxu0 %v11151_v54 }
  0x1d   :  { %9775 = vmatprep.mubr.msk.f32.mxu0 %vm73_vm2, %v36_v17 }
  0x1e   :  { %11599 = vmatpush3.bf16.msra.mxu1 %v12249_v63 }
  0x1f   :  { %11154 = vmatpush3.bf16.msra.mxu0 %v11151_v54  ;;  %11596 = vmatprep.subr.bf16.mxu1 %v12259_v2  ;;  %v542_v54 = vld [vmem:[%s16699_s3 + $0x18] sm:$0xff] }
  0x20   :  { %9776 = vmatmul.mubr.msk.f32.gmra.mrb[10].mxu0 %vm73_vm2, %v37_v18  ;;  %11156 = vmatprep.subr.bf16.mxu0 %v12269_v5 }
  0x21   :  { %9778 = vmatprep.mubr.msk.f32.mxu0 %vm73_vm2, %v38_v19 }
  0x22   :  { %11600 = vmatpush3.bf16.msra.mxu1 %v12259_v2 }
  0x23   :  { %11252 = vmatprep.subr.bf16.mxu1 %v12278_v9 }
  0x24   :  { %9779 = vmatmul.mubr.msk.f32.gmra.mrb[12].mxu0 %vm73_vm2, %v39_v20 }
  0x25   :  { %9781 = vmatprep.mubr.msk.f32.mxu0 %vm73_vm2, %v40_v21 }
  0x28   :  { %9782 = vmatmul.mubr.msk.f32.gmra.mrb[14].mxu0 %vm73_vm2, %v41_v22 }
  0x29   :  { %9784 = vmatprep.mubr.msk.f32.mxu0 %vm73_vm2, %v42_v23 }
  0x2c   :  { %9785 = vmatmul.mubr.msk.f32.gmra.mrb[16].mxu0 %vm73_vm2, %v43_v24 }
  0x2d   :  { %9787 = vmatprep.mubr.msk.f32.mxu0 %vm73_vm2, %v44_v25 }
  0x30   :  { %9788 = vmatmul.mubr.msk.f32.gmra.mrb[18].mxu0 %vm73_vm2, %v45_v26 }
  0x31   :  { %9790 = vmatprep.mubr.msk.f32.mxu0 %vm73_vm2, %v46_v27 }
  0x34   :  { %9791 = vmatmul.mubr.msk.f32.gmra.mrb[20].mxu0 %vm73_vm2, %v47_v28 }
  0x35   :  { %9793 = vmatprep.mubr.msk.f32.mxu0 %vm73_vm2, %v48_v29 }
  0x38   :  { %9794 = vmatmul.mubr.msk.f32.gmra.mrb[22].mxu0 %vm73_vm2, %v49_v30 }
  0x39   :  { %9796 = vmatprep.mubr.msk.f32.mxu0 %vm73_vm2, %v50_v31 }
  0x3c   :  { %9797 = vmatmul.mubr.msk.f32.gmra.mrb[24].mxu0 %vm73_vm2, %v51_v32 }
  0x3d   :  { %9799 = vmatprep.mubr.msk.f32.mxu0 %vm73_vm2, %v52_v33 }
  0x40   :  { %9800 = vmatmul.mubr.msk.f32.gmra.mrb[26].mxu0 %vm73_vm2, %v53_v34 }
  0x41   :  { %9802 = vmatprep.mubr.msk.f32.mxu0 %vm73_vm2, %v54_v35 }
  0x44   :  { %9803 = vmatmul.mubr.msk.f32.gmra.mrb[28].mxu0 %vm73_vm2, %v55_v36  ;;  %v17065_v36 = vmov 0 }
  0x45   :  { %9805 = vmatprep.mubr.msk.f32.mxu0 %vm73_vm2, %v56_v37  ;;  %v17066_v36 = vsel %vm12322_vm13, 4294967295, %v17065_v36 }
  0x46   :  { %17067 = vst [vmem:[#allocation11_spill] sm:$0xff] %v17066_v36 }
  0x48   :  { %9806 = vmatmul.mubr.msk.f32.gmra.mrb[30].mxu0 %vm73_vm2, %v57_v38  ;;  %v17068_v38 = vmov 0 }
  0x49   :  { %9808 = vmatprep.mubr.msk.f32.mxu0 %vm73_vm2, %v58_v39  ;;  %v17069_v38 = vsel %vm12328_vm14, 4294967295, %v17068_v38 }
  0x4a   :  { %17070 = vst [vmem:[#allocation12_spill] sm:$0xff] %v17069_v38  ;;  %v1505_v38 = vld [vmem:[%s16699_s3 + $0xd0] sm:$0xff] }
  0x4c   :  { %9809 = vmatmul.mubr.msk.f32.gmra.mrb[32].mxu0 %vm73_vm2, %v59_v40 }
  0x4d   :  { %9811 = vmatprep.mubr.msk.f32.mxu0 %vm73_vm2, %v60_v41 }
  0x50   :  { %9812 = vmatmul.mubr.msk.f32.gmra.mrb[34].mxu0 %vm73_vm2, %v61_v42  ;;  %vm14962_vm2 = vmor %vm12055_vm7, %vm5867_vm1 }
  0xdf   :  { %v9762_v11 = vpop.f32.mrb[0].mxu0 }
  0xe0   :  { %v258_v12 = vadd.f32 %v9762_v11, %v12284_v10  ;;  %v252_v13 = vpop.f32.mrb[1].mxu0 }
  0xe1   :  { %v253_v14 = vadd.f32 %v12284_v10, %v252_v13 }
  0xe2   :  { %v12290_v17 = vmax.f32 %v258_v12, 0.0  ;;  %v11159_v12 = vpack.c.bf16 %v542_v54, %v541_v53 }
  0xe3   :  { %v12288_v15 = vmax.f32 %v253_v14, 0.0  ;;  %v9765_v16 = vpop.f32.mrb[2].mxu0 }
  0xe4   :  { %17061 = vst [vmem:[#allocation7_spill] sm:$0xff] %v12290_v17  ;;  %v268_v18 = vadd.f32 %v9765_v16, %v12284_v10  ;;  %v262_v19 = vpop.f32.mrb[3].mxu0  ;;  %v12305_v26 = vcombine.high %v12290_v17, %v12290_v17  ;;  %v555_v32 = vrot.slane %v12290_v17, 5 }
  0xe5   :  { %v12295_v20 = vcombine.high %v12288_v15, %v12288_v15  ;;  %v263_v21 = vadd.f32 %v12284_v10, %v262_v19  ;;  %v8410_v42 = vrot.slane %v12288_v15, 9  ;;  %v544_v19 = vld [vmem:[%s16699_s3 + $0x28] sm:$0xff] }
  0xe6   :  { %v12298_v22 = vmax.f32 %v268_v18, 0.0  ;;  %v8411_v44 = vrot.slane %v12305_v26, 9  ;;  %v543_v18 = vld [vmem:[%s16699_s3 + $0x20] sm:$0xff] }
  0xe7   :  { %17062 = vst [vmem:[#allocation8_spill] sm:$0xff] %v12295_v20  ;;  %v12300_v23 = vmax.f32 %v263_v21, 0.0  ;;  %v9768_v24 = vpop.f32.mrb[4].mxu0  ;;  %v552_v25 = vrot.slane %v12295_v20, 5 }
  0xe8   :  { %v12309_v27 = vcombine.high %v12298_v22, %v12298_v22  ;;  %v272_v28 = vpop.f32.mrb[5].mxu0  ;;  %v8492_v34 = vrot.slane %v12298_v22, 11  ;;  %v278_v46 = vadd.f32 %v9768_v24, %v12284_v10 }
  0xe9   :  { %17063 = vst [vmem:[#allocation9_spill] sm:$0xff] %v12300_v23  ;;  %v12313_v29 = vcombine.high %v12300_v23, %v12300_v23  ;;  %v559_v30 = vrot.slane %v12300_v23, 5  ;;  %v273_v31 = vadd.f32 %v12284_v10, %v272_v28  ;;  %v554_v37 = vrot.slane %v552_v25, 4 }
  0xea   :  { %v16705_v33 = vrot.slane %v12309_v27, 6  ;;  %v1407_v35 = vrot.slane %v12309_v27, 7  ;;  %v553_v52 = vsel %vm12322_vm13, %v8410_v42, %v552_v25  ;;  %v12379_v6 = vmax.f32 %v278_v46, 0.0 }
  0xeb   :  { %17064 = vst [vmem:[#allocation10_spill] sm:$0xff] %v12313_v29  ;;  %v561_v39 = vrot.slane %v559_v30, 4  ;;  %v12332_v40 = vmax.f32 %v273_v31, 0.0  ;;  %v9771_v41 = vpop.f32.mrb[6].mxu0  ;;  %v562_v43 = vrot.slane %v12313_v29, 5  ;;  %v556_v59 = vsel %vm12322_vm13, %v554_v37, %v555_v32  ;;  %v545_v31 = vld [vmem:[%s16699_s3 + $0x30] sm:$0xff] }
  0xec   :  { %v12339_v45 = vsel %vm12328_vm14, %v8492_v34, %v1407_v35  ;;  %v1078_v47 = vrot.slane %v16705_v33, 4  ;;  %v282_v48 = vpop.f32.mrb[7].mxu0  ;;  %v1409_v50 = vrot.slane %v1407_v35, 4  ;;  %v560_v61 = vsel %vm12322_vm13, %v8411_v44, %v559_v30  ;;  %v546_v32 = vld [vmem:[%s16699_s3 + $0x38] sm:$0xff]  ;;  %v2506_v33 = vld [vmem:[%s16699_s3 + $0x210] sm:$0xff] }
  0xed   :  { %17071 = vst [vmem:[#allocation13_spill] sm:$0xff] %v12339_v45  ;;  %v1079_v49 = vrot.slane %v12332_v40, 6  ;;  %v1410_v51 = vrot.slane %v12332_v40, 7  ;;  %v12362_v56 = vcombine.low %v12309_v27, %v12332_v40  ;;  %v283_v58 = vadd.f32 %v12284_v10, %v282_v48 }
  0xee   :  { %v670_v1 = vcombine.low %v553_v52, %v556_v59  ;;  %v563_v4 = vsel %vm12322_vm13, %v561_v39, %v562_v43  ;;  %v12385_v13 = vcombine.high %v12332_v40, %v12332_v40  ;;  %v566_v16 = vrot.slane %v12309_v27, 5 }
  0xef   :  { %17075 = vst [vmem:[#allocation15_spill] sm:$0xff] %v12362_v56  ;;  %v12371_v62 = vsel %vm12356_vm15, %v1078_v47, %v1079_v49  ;;  %v12375_v0 = vsel %vm12328_vm14, %v1409_v50, %v1410_v51  ;;  %v9774_v3 = vpop.f32.mrb[8].mxu0  ;;  %v12381_v11 = vcombine.low %v560_v61, %v563_v4  ;;  %v288_v21 = vadd.f32 %v9771_v41, %v12284_v10  ;;  %v1172_v4 = vld [vmem:[%s16699_s3 + $0x80] sm:$0xff]  ;;  %v2511_v56 = vld [vmem:[%s16699_s3 + $0x238] sm:$0xff] }
  0xf0   :  { %17076 = vst [vmem:[#allocation16_spill] sm:$0xff] %v12375_v0  ;;  %v292_v8 = vpop.f32.mrb[9].mxu0  ;;  %9830 = vmatprep.mubr.msk.f32.mxu0 %vm686_vm12, %v670_v1  ;;  %v12397_v24 = vmax.f32 %v283_v58, 0.0  ;;  %v298_v25 = vadd.f32 %v9774_v3, %v12284_v10  ;;  %v569_v28 = vrot.slane %v12332_v40, 5  ;;  %v12412_v34 = vcombine.high %v12379_v6, %v12379_v6 }
  0xf1   :  { %17077 = vst [vmem:[#allocation17_spill] sm:$0xff] %v12381_v11  ;;  %v293_v14 = vadd.f32 %v12284_v10, %v292_v8  ;;  %9831 = vmatmul.mubr.msk.f32.vlgmr.msra.gmra.mrb[36].mxu0 %vm686_vm12, %v12381_v11  ;;  %v568_v37 = vrot.slane %v566_v16, 4  ;;  %v11163_v40 = vpack.c.bf16 %v544_v19, %v543_v18  ;;  %v8413_v42 = vrot.slane %v12385_v13, 9  ;;  %v1173_v8 = vld [vmem:[%s16699_s3 + $0x88] sm:$0xff] }
  0xf2   :  { %11158 = vmatpush3.bf16.msra.mxu0 %v12269_v5  ;;  %v8412_v5 = vrot.slane %v12298_v22, 9  ;;  %v573_v43 = vrot.slane %v12379_v6, 5  ;;  %v12420_v44 = vmax.f32 %v288_v21, 0.0  ;;  %v12424_v46 = vcombine.high %v12397_v24, %v12397_v24 }
  0xf3   :  { %v9777_v30 = vpop.f32.mrb[10].mxu0  ;;  %v12414_v35 = vmax.f32 %v293_v14, 0.0  ;;  %11160 = vmatprep.subr.bf16.mxu0 %v11159_v12  ;;  %v11167_v48 = vpack.c.bf16 %v546_v32, %v545_v31  ;;  %v12427_v49 = vmax.f32 %v298_v25, 0.0  ;;  %v570_v52 = vsel %vm12322_vm13, %v568_v37, %v569_v28 }
  0xf4   :  { %v302_v39 = vpop.f32.mrb[11].mxu0  ;;  %17079 = vst [vmem:[#allocation19_spill] sm:$0xff] %v12424_v46  ;;  %v308_v47 = vadd.f32 %v9777_v30, %v12284_v10  ;;  %v567_v51 = vsel %vm12322_vm13, %v8412_v5, %v566_v16  ;;  %v574_v58 = vsel %vm12322_vm13, %v8413_v42, %v573_v43  ;;  %v575_v59 = vrot.slane %v573_v43, 4 }
  0xf5   :  { %17078 = vst [vmem:[#allocation18_spill] sm:$0xff] %v12414_v35  ;;  %v303_v41 = vadd.f32 %v12284_v10, %v302_v39  ;;  %v12431_v50 = vcombine.high %v12414_v35, %v12414_v35  ;;  %v12439_v54 = vcombine.low %v567_v51, %v570_v52  ;;  %v576_v61 = vrot.slane %v12412_v34, 5 }
  0xf6   :  { %11162 = vmatpush3.bf16.msra.mxu0 %v11159_v12  ;;  %v12456_v12 = vcombine.high %v12420_v44, %v12420_v44  ;;  %v12460_v14 = vmax.f32 %v308_v47, 0.0  ;;  %v12466_v18 = vcombine.high %v12427_v49, %v12427_v49  ;;  %v580_v21 = vrot.slane %v12424_v46, 5 }
  0xf7   :  { %v12437_v53 = vpop.f32.mrb[12].mxu0  ;;  %17080 = vst [vmem:[#allocation20_spill] sm:$0xff] %v12439_v54  ;;  %11164 = vmatprep.subr.bf16.mxu0 %v11163_v40  ;;  %v12446_v3 = vmax.f32 %v303_v41, 0.0  ;;  %9833 = vmatprep.mubr.msk.f32.mxu0 %vm686_vm12, %v12439_v54  ;;  %v577_v16 = vsel %vm12322_vm13, %v575_v59, %v576_v61  ;;  %v587_v28 = vrot.slane %v12414_v35, 5  ;;  %v590_v31 = vrot.slane %v12431_v50, 5  ;;  %v2317_v61 = vld [vmem:[%s16699_s3 + $0x1d0] sm:$0xff] }
  0xf8   :  { %v12444_v1 = vpop.f32.mrb[13].mxu0  ;;  %17082 = vst [vmem:[#allocation22_spill] sm:$0xff] %v12460_v14  ;;  %17083 = vst [vmem:[#allocation23_spill] sm:$0xff] %v12466_v18  ;;  %v12468_v19 = vcombine.low %v574_v58, %v577_v16  ;;  %v12477_v32 = vpack.c.bf16 %v1173_v8, %v1172_v4  ;;  %v583_v37 = vrot.slane %v12420_v44, 5  ;;  %v8414_v39 = vrot.slane %v12397_v24, 9  ;;  %v2509_v54 = vld [vmem:[%s16699_s3 + $0x228] sm:$0xff] }
  0xf9   :  { %17081 = vst [vmem:[#allocation21_spill] sm:$0xff] %v12446_v3  ;;  %v12483_v5 = vcombine.high %v12446_v3, %v12446_v3  ;;  %v582_v41 = vrot.slane %v580_v21, 4  ;;  %v8415_v42 = vrot.slane %v12456_v12, 9  ;;  %v589_v43 = vrot.slane %v587_v28, 4 }
  0xfa   :  { %17084 = vst [vmem:[#allocation24_spill] sm:$0xff] %v12468_v19  ;;  %11166 = vmatpush3.bf16.msra.mxu0 %v11163_v40  ;;  %v12489_v40 = vcombine.high %v12460_v14, %v12460_v14  ;;  %v597_v47 = vrot.slane %v12446_v3, 5  ;;  %v581_v51 = vsel %vm12322_vm13, %v8414_v39, %v580_v21  ;;  %v594_v58 = vrot.slane %v12466_v18, 5  ;;  %v2319_v39 = vld [vmem:[%s16699_s3 + $0x1e0] sm:$0xff] }
  0xfb   :  { %v12471_v25 = vpop.f32.mrb[14].mxu0  ;;  %11168 = vmatprep.subr.bf16.mxu0 %v11167_v48  ;;  %17087 = vst [vmem:[#allocation27_spill] sm:$0xff] %v12483_v5  ;;  %9834 = vmatmul.mubr.msk.f32.gmra.mrb[38].mxu0 %vm686_vm12, %v12468_v19  ;;  %v584_v52 = vsel %vm12322_vm13, %v582_v41, %v583_v37  ;;  %v588_v8 = vsel %vm12322_vm13, %v8415_v42, %v587_v28  ;;  %v2318_v37 = vld [vmem:[%s16699_s3 + $0x1d8] sm:$0xff]  ;;  %v8416_v28 = vrot.slane %v12427_v49, 9  ;;  %v8417_v42 = vrot.slane %v12483_v5, 9 }
  0xfc   :  { %17085 = vst [vmem:[#allocation25_spill] sm:$0xff] %v12471_v25  ;;  %v12474_v30 = vpop.f32.mrb[15].mxu0  ;;  %17088 = vst [vmem:[#allocation28_spill] sm:$0xff] %v12489_v40  ;;  %v12503_v4 = vcombine.low %v581_v51, %v584_v52  ;;  %v591_v16 = vsel %vm12322_vm13, %v589_v43, %v590_v31  ;;  %v596_v31 = vrot.slane %v594_v58, 4  ;;  %v2321_v43 = vld [vmem:[%s16699_s3 + $0x1f0] sm:$0xff]  ;;  %v2322_v51 = vld [vmem:[%s16699_s3 + $0x1f8] sm:$0xff] }
  0xfd   :  { %17086 = vst [vmem:[#allocation26_spill] sm:$0xff] %v12474_v30  ;;  %v12522_v41 = vcombine.low %v588_v8, %v591_v16  ;;  %v2504_v52 = vld [vmem:[%s16699_s3 + $0x200] sm:$0xff]  ;;  %v601_v8 = vrot.slane %v12460_v14, 5  ;;  %v2505_v16 = vld [vmem:[%s16699_s3 + $0x208] sm:$0xff]  ;;  %v595_v25 = vsel %vm12322_vm13, %v8416_v28, %v594_v58  ;;  %v604_v2 = vrot.slane %v12489_v40, 5 }
  0xfe   :  { %11170 = vmatpush3.bf16.msra.mxu0 %v11167_v48  ;;  %17090 = vst [vmem:[#allocation30_spill] sm:$0xff] %v12503_v4  ;;  %v2320_v48 = vld [vmem:[%s16699_s3 + $0x1e8] sm:$0xff]  ;;  %9836 = vmatprep.mubr.msk.f32.mxu0 %vm686_vm12, %v12503_v4  ;;  %v598_v11 = vsel %vm12322_vm13, %v596_v31, %v597_v47  ;;  %v1174_v4 = vld [vmem:[%s16699_s3 + $0x90] sm:$0xff]  ;;  %v8460_v58 = vrot.slane %v12298_v22, 10  ;;  %v12565_v31 = vpack.c.bf16 %v2318_v37, %v2317_v61  ;;  %v2679_v30 = vld [vmem:[%s16699_s3 + $0x240] sm:$0xff]  ;;  %v1111_v36 = vrot.slane %v12460_v14, 6 }
  0xff   :  { %v12498_v59 = vpop.f32.mrb[16].mxu0  ;;  %11172 = vmatprep.subr.bf16.mxu0 %v12477_v32  ;;  %17092 = vst [vmem:[#allocation32_spill] sm:$0xff] %v12522_v41  ;;  %9837 = vmatmul.mubr.msk.f32.gmra.mrb[40].mxu0 %vm686_vm12, %v12522_v41  ;;  %v2508_v41 = vld [vmem:[%s16699_s3 + $0x220] sm:$0xff]  ;;  %v12563_v28 = vcombine.low %v595_v25, %v598_v11  ;;  %v12567_v19 = vpack.c.bf16 %v2320_v48, %v2319_v39  ;;  %v603_v25 = vrot.slane %v601_v8, 4  ;;  %v1178_v39 = vld [vmem:[%s16699_s3 + $0xb0] sm:$0xff]  ;;  %v1179_v48 = vld [vmem:[%s16699_s3 + $0xb8] sm:$0xff] }
 0x100   :  { %17089 = vst [vmem:[#allocation29_spill] sm:$0xff] %v12498_v59  ;;  %v12509_v21 = vpop.f32.mrb[17].mxu0  ;;  %v602_v11 = vsel %vm12322_vm13, %v8417_v42, %v601_v8  ;;  %v2510_v59 = vld [vmem:[%s16699_s3 + $0x230] sm:$0xff]  ;;  %v12593_v42 = vpack.c.bf16 %v2322_v51, %v2321_v43  ;;  %v12597_v8 = vpack.c.bf16 %v2507_v7, %v2506_v33  ;;  %v17094_v43 = vrot.slane %v12309_v27, 6 }
 0x101   :  { %17091 = vst [vmem:[#allocation31_spill] sm:$0xff] %v12509_v21  ;;  %17093 = vst [vmem:[#allocation33_spill] sm:$0xff] %v12563_v28  ;;  %v1177_v21 = vld [vmem:[%s16699_s3 + $0xa8] sm:$0xff]  ;;  %9839 = vmatprep.mubr.msk.f32.mxu0 %vm686_vm12, %v12563_v28  ;;  %v12618_v51 = vpack.c.bf16 %v2509_v54, %v2508_v41  ;;  %v12665_v45 = vpack.c.bf16 %v2511_v56, %v2510_v59 }
 0x102   :  { %v2680_v28 = vld [vmem:[%s16699_s3 + $0x248] sm:$0xff]  ;;  %v1077_v7 = vsel %vm12356_vm15, %v8460_v58, %v17094_v43  ;;  %v1503_v58 = vld [vmem:[%s16699_s3 + $0xc0] sm:$0xff]  ;;  %v12635_v41 = vpack.c.bf16 %v1177_v21, %v1176_v57  ;;  %v12653_v21 = vpack.c.bf16 %v1179_v48, %v1178_v39 }
 0x103   :  { %v9789_v63 = vpop.f32.mrb[18].mxu0  ;;  %17096 = vst [vmem:[#allocation35_spill] sm:$0xff] %v12618_v51  ;;  %v12633_v54 = vcombine.low %v1077_v7, %v12371_v62  ;;  %v2683_v7 = vld [vmem:[%s16699_s3 + $0x260] sm:$0xff]  ;;  %17104 = vst [vmem:[#allocation43_spill] sm:$0xff] %v12665_v45  ;;  %v12667_v0 = vpack.c.bf16 %v2680_v28, %v2679_v30 }
 0x104   :  { %v342_v47 = vpop.f32.mrb[19].mxu0  ;;  %v348_v61 = vadd.f32 %v9789_v63, %v12284_v10  ;;  %v12595_v63 = vpack.c.bf16 %v2505_v16, %v2504_v52  ;;  %v2681_v52 = vld [vmem:[%s16699_s3 + $0x250] sm:$0xff]  ;;  %v2682_v16 = vld [vmem:[%s16699_s3 + $0x258] sm:$0xff]  ;;  %17099 = vst [vmem:[#allocation38_spill] sm:$0xff] %v12635_v41  ;;  %17102 = vst [vmem:[#allocation41_spill] sm:$0xff] %v12653_v21 }
 0x105   :  { %v343_v37 = vadd.f32 %v12284_v10, %v342_v47  ;;  %v12599_v47 = vpack.c.bf16 %v1175_v60, %v1174_v4  ;;  %v605_v60 = vsel %vm12322_vm13, %v603_v25, %v604_v2  ;;  %17098 = vst [vmem:[#allocation37_spill] sm:$0xff] %v12633_v54  ;;  %17105 = vst [vmem:[#allocation44_spill] sm:$0xff] %v12667_v0 }
 0x106   :  { %v12629_v43 = vcombine.low %v602_v11, %v605_v60  ;;  %v1506_v11 = vld [vmem:[%s16699_s3 + $0xd8] sm:$0xff]  ;;  %v12646_v60 = vmax.f32 %v348_v61, 0.0 }
 0x107   :  { %v12616_v33 = vmax.f32 %v343_v37, 0.0  ;;  %v9792_v4 = vpop.f32.mrb[20].mxu0  ;;  %v1504_v37 = vld [vmem:[%s16699_s3 + $0xc8] sm:$0xff]  ;;  %v12676_v41 = vpack.c.bf16 %v1506_v11, %v1505_v38 }
 0x108   :  { %17097 = vst [vmem:[#allocation36_spill] sm:$0xff] %v12629_v43  ;;  %v358_v2 = vadd.f32 %v9792_v4, %v12284_v10  ;;  %v352_v25 = vpop.f32.mrb[21].mxu0  ;;  %17100 = vst [vmem:[#allocation39_spill] sm:$0xff] %v12646_v60  ;;  %v2684_v4 = vld [vmem:[%s16699_s3 + $0x268] sm:$0xff]  ;;  %9840 = vmatmul.mubr.msk.f32.gmra.mrb[42].mxu0 %vm686_vm12, %v12629_v43  ;;  %v12674_v51 = vpack.c.bf16 %v1504_v37, %v1503_v58  ;;  %v611_v38 = vrot.slane %v12646_v60, 5 }
 0x109   :  { %17095 = vst [vmem:[#allocation34_spill] sm:$0xff] %v12616_v33  ;;  %v12650_v62 = vcombine.high %v12616_v33, %v12616_v33  ;;  %v353_v57 = vadd.f32 %v12284_v10, %v352_v25  ;;  %v12669_v25 = vpack.c.bf16 %v2682_v16, %v2681_v52  ;;  %17108 = vst [vmem:[#allocation47_spill] sm:$0xff] %v12676_v41  ;;  %v8418_v30 = vrot.slane %v12616_v33, 9 }
 0x10a   :  { %v12663_v61 = vmax.f32 %v358_v2, 0.0  ;;  %17107 = vst [vmem:[#allocation46_spill] sm:$0xff] %v12674_v51  ;;  %v12684_v28 = vpack.c.bf16 %v2684_v4, %v2683_v7  ;;  %v12694_v2 = vcombine.high %v12646_v60, %v12646_v60 }
 0x10b   :  { %17101 = vst [vmem:[#allocation40_spill] sm:$0xff] %v12650_v62  ;;  %17106 = vst [vmem:[#allocation45_spill] sm:$0xff] %v12669_v25  ;;  %v12671_v39 = vmax.f32 %v353_v57, 0.0  ;;  %v9795_v48 = vpop.f32.mrb[22].mxu0  ;;  %v608_v21 = vrot.slane %v12650_v62, 5 }
 0x10c   :  { %17103 = vst [vmem:[#allocation42_spill] sm:$0xff] %v12663_v61  ;;  %v12680_v43 = vcombine.high %v12663_v61, %v12663_v61  ;;  %v368_v56 = vadd.f32 %v9795_v48, %v12284_v10  ;;  %v362_v59 = vpop.f32.mrb[23].mxu0  ;;  %17110 = vst [vmem:[#allocation49_spill] sm:$0xff] %v12684_v28 }
 0x10d   :  { %v12688_v52 = vcombine.high %v12671_v39, %v12671_v39  ;;  %v363_v16 = vadd.f32 %v12284_v10, %v362_v59  ;;  %v610_v58 = vrot.slane %v608_v21, 4  ;;  %17112 = vst [vmem:[#allocation51_spill] sm:$0xff] %v12694_v2  ;;  %v615_v11 = vrot.slane %v12671_v39, 5 }
 0x10e   :  { %17109 = vst [vmem:[#allocation48_spill] sm:$0xff] %v12680_v43  ;;  %v12696_v37 = vmax.f32 %v368_v56, 0.0  ;;  %v622_v57 = vrot.slane %v12680_v43, 5  ;;  %v609_v48 = vsel %vm12322_vm13, %v8418_v30, %v608_v21 }
 0x10f   :  { %17111 = vst [vmem:[#allocation50_spill] sm:$0xff] %v12688_v52  ;;  %v12700_v7 = vmax.f32 %v363_v16, 0.0  ;;  %v9798_v4 = vpop.f32.mrb[24].mxu0  ;;  %v612_v59 = vsel %vm12322_vm13, %v610_v58, %v611_v38  ;;  %v618_v28 = vrot.slane %v12688_v52, 5  ;;  %v617_v58 = vrot.slane %v615_v11, 4 }
 0x110   :  { %17113 = vst [vmem:[#allocation52_spill] sm:$0xff] %v12696_v37  ;;  %v12709_v25 = vcombine.high %v12696_v37, %v12696_v37  ;;  %v372_v56 = vpop.f32.mrb[25].mxu0  ;;  %v678_v41 = vcombine.low %v609_v48, %v612_v59  ;;  %v378_v21 = vadd.f32 %v9798_v4, %v12284_v10  ;;  %v8419_v38 = vrot.slane %v12694_v2, 9 }
 0x111   :  { %17114 = vst [vmem:[#allocation53_spill] sm:$0xff] %v12700_v7  ;;  %v12715_v51 = vcombine.high %v12700_v7, %v12700_v7  ;;  %v373_v30 = vadd.f32 %v12284_v10, %v372_v56  ;;  %v624_v0 = vrot.slane %v622_v57, 4  ;;  %v625_v48 = vrot.slane %v12700_v7, 5 }
 0x112   :  { %17115 = vst [vmem:[#allocation54_spill] sm:$0xff] %v12709_v25  ;;  %9842 = vmatprep.mubr.msk.f32.mxu0 %vm686_vm12, %v678_v41  ;;  %v619_v17 = vsel %vm12322_vm13, %v617_v58, %v618_v28  ;;  %v8420_v4 = vrot.slane %v12663_v61, 9  ;;  %v629_v56 = vrot.slane %v12696_v37, 5  ;;  %v616_v41 = vsel %vm12322_vm13, %v8419_v38, %v615_v11 }
 0x113   :  { %17116 = vst [vmem:[#allocation55_spill] sm:$0xff] %v12715_v51  ;;  %v12723_v60 = vmax.f32 %v373_v30, 0.0  ;;  %v9801_v16 = vpop.f32.mrb[26].mxu0  ;;  %v8421_v33 = vrot.slane %v12715_v51, 9  ;;  %v12735_v59 = vmax.f32 %v378_v21, 0.0  ;;  %v632_v61 = vrot.slane %v12709_v25, 5 }
 0x114   :  { %v382_v45 = vpop.f32.mrb[27].mxu0  ;;  %v623_v58 = vsel %vm12322_vm13, %v8420_v4, %v622_v57  ;;  %v388_v11 = vadd.f32 %v9801_v16, %v12284_v10  ;;  %v679_v51 = vcombine.low %v616_v41, %v619_v17  ;;  %v626_v62 = vsel %vm12322_vm13, %v624_v0, %v625_v48 }
 0x115   :  { %17117 = vst [vmem:[#allocation56_spill] sm:$0xff] %v12723_v60  ;;  %17118 = vst [vmem:[#allocation57_spill] sm:$0xff] %v12735_v59  ;;  %v12739_v28 = vcombine.high %v12723_v60, %v12723_v60  ;;  %v383_v38 = vadd.f32 %v12284_v10, %v382_v45  ;;  %v12748_v30 = vcombine.low %v623_v58, %v626_v62  ;;  %v631_v7 = vrot.slane %v629_v56, 4 }
 0x116   :  { %v12752_v43 = vmax.f32 %v388_v11, 0.0  ;;  %9843 = vmatmul.mubr.msk.f32.gmra.mrb[44].mxu0 %vm686_vm12, %v679_v51  ;;  %10082 = vmatprep.mubr.msk.f32.mxu1 %vm686_vm12, %v679_v51  ;;  %v630_v0 = vsel %vm12322_vm13, %v8421_v33, %v629_v56  ;;  %v12771_v4 = vcombine.high %v12735_v59, %v12735_v59  ;;  %v639_v33 = vrot.slane %v12735_v59, 5 }
 0x117   :  { %17119 = vst [vmem:[#allocation58_spill] sm:$0xff] %v12748_v30  ;;  %v9804_v21 = vpop.f32.mrb[28].mxu0  ;;  %v636_v2 = vrot.slane %v12739_v28, 5  ;;  %v12754_v57 = vmax.f32 %v383_v38, 0.0  ;;  %9845 = vmatprep.mubr.msk.f32.mxu0 %vm686_vm12, %v12748_v30  ;;  %10083 = vmatmul.mubr.msk.f32.vlgmr.msra.gmra.mrb[0].mxu1 %vm686_vm12, %v12748_v30  ;;  %v633_v16 = vsel %vm12322_vm13, %v631_v7, %v632_v61  ;;  %v8422_v56 = vrot.slane %v12723_v60, 9 }
 0x118   :  { %v398_v17 = vadd.f32 %v9804_v21, %v12284_v10  ;;  %v392_v45 = vpop.f32.mrb[29].mxu0  ;;  %17121 = vst [vmem:[#allocation60_spill] sm:$0xff] %v12771_v4  ;;  %v12777_v41 = vcombine.high %v12752_v43, %v12752_v43  ;;  %11254 = vmatpush3.bf16.msra.mxu1 %v12278_v9  ;;  %v12788_v11 = vcombine.low %v630_v0, %v633_v16  ;;  %v17127_v16 = vrot.slane %v12300_v23, 6 }
 0x119   :  { %17120 = vst [vmem:[#allocation59_spill] sm:$0xff] %v12754_v57  ;;  %v393_v62 = vadd.f32 %v12284_v10, %v392_v45  ;;  %v638_v48 = vrot.slane %v636_v2, 4  ;;  %v12782_v61 = vcombine.high %v12754_v57, %v12754_v57  ;;  %11256 = vmatprep.subr.bf16.mxu1 %v12565_v31  ;;  %v643_v9 = vrot.slane %v12754_v57, 5 }
 0x11a   :  { %17122 = vst [vmem:[#allocation61_spill] sm:$0xff] %v12777_v41  ;;  %v12784_v7 = vmax.f32 %v398_v17, 0.0  ;;  %17126 = vst [vmem:[#allocation65_spill] sm:$0xff] %v12788_v11  ;;  %v650_v51 = vrot.slane %v12777_v41, 5  ;;  %v313_v17 = vadd.f32 %v12284_v10, %v12444_v1  ;;  %9846 = vmatmul.mubr.msk.f32.gmra.mrb[46].mxu0 %vm686_vm12, %v12788_v11  ;;  %10085 = vmatprep.mubr.msk.f32.mxu1 %vm686_vm12, %v12788_v11  ;;  %v1072_v30 = vrot.slane %v12313_v29, 6 }
 0x11b   :  { %17123 = vst [vmem:[#allocation62_spill] sm:$0xff] %v12782_v61  ;;  %v12786_v58 = vmax.f32 %v393_v62, 0.0  ;;  %v9807_v38 = vpop.f32.mrb[30].mxu0  ;;  %v640_v37 = vsel %vm12322_vm13, %v638_v48, %v639_v33  ;;  %v637_v62 = vsel %vm12322_vm13, %v8422_v56, %v636_v2  ;;  %v1071_v48 = vrot.slane %v17127_v16, 4 }
 0x11c   :  { %17124 = vst [vmem:[#allocation63_spill] sm:$0xff] %v12784_v7  ;;  %v408_v21 = vadd.f32 %v9807_v38, %v12284_v10  ;;  %v402_v45 = vpop.f32.mrb[31].mxu0  ;;  %v12812_v38 = vcombine.low %v637_v62, %v640_v37  ;;  %11258 = vmatpush3.bf16.msra.mxu1 %v12565_v31  ;;  %v8424_v41 = vrot.slane %v12752_v43, 9  ;;  %v8423_v11 = vrot.slane %v12771_v4, 9 }
 0x11d   :  { %17125 = vst [vmem:[#allocation64_spill] sm:$0xff] %v12786_v58  ;;  %v12800_v0 = vcombine.high %v12786_v58, %v12786_v58  ;;  %v653_v33 = vrot.slane %v12786_v58, 5  ;;  %v403_v1 = vadd.f32 %v12284_v10, %v402_v45  ;;  %v645_v2 = vrot.slane %v643_v9, 4  ;;  %11260 = vmatprep.subr.bf16.mxu1 %v12567_v19 }
 0x11e   :  { %17128 = vst [vmem:[#allocation66_spill] sm:$0xff] %v12812_v38  ;;  %v646_v56 = vrot.slane %v12782_v61, 5  ;;  %v12824_v45 = vcombine.high %v12784_v7, %v12784_v7  ;;  %v12826_v37 = vmax.f32 %v408_v21, 0.0  ;;  %9848 = vmatprep.mubr.msk.f32.mxu0 %vm686_vm12, %v12812_v38  ;;  %10086 = vmatmul.mubr.msk.f32.gmra.mrb[2].mxu1 %vm686_vm12, %v12812_v38  ;;  %v652_v16 = vrot.slane %v650_v51, 4 }
 0x11f   :  { %v12817_v60 = vpop.f32.mrb[32].mxu0  ;;  %v12828_v31 = vmax.f32 %v403_v1, 0.0  ;;  %v8425_v21 = vrot.slane %v12800_v0, 9  ;;  %v657_v1 = vrot.slane %v12784_v7, 5  ;;  %v651_v38 = vsel %vm12322_vm13, %v8424_v41, %v650_v51 }
 0x120   :  { %17129 = vst [vmem:[#allocation67_spill] sm:$0xff] %v12817_v60  ;;  %17130 = vst [vmem:[#allocation68_spill] sm:$0xff] %v12824_v45  ;;  %v12834_v62 = vpop.f32.mrb[33].mxu0  ;;  %v644_v60 = vsel %vm12322_vm13, %v8423_v11, %v643_v9  ;;  %v647_v29 = vsel %vm12322_vm13, %v645_v2, %v646_v56  ;;  %11262 = vmatpush3.bf16.msra.mxu1 %v12567_v19  ;;  %v1093_v11 = vrot.slane %v12420_v44, 6  ;;  %v1083_v56 = vrot.slane %v12379_v6, 6 }
 0x121   :  { %17131 = vst [vmem:[#allocation69_spill] sm:$0xff] %v12834_v62  ;;  %v12844_v4 = vcombine.high %v12828_v31, %v12828_v31  ;;  %v12846_v58 = vcombine.low %v644_v60, %v647_v29  ;;  %v654_v62 = vsel %vm12322_vm13, %v652_v16, %v653_v33  ;;  %v659_v2 = vrot.slane %v657_v1, 4  ;;  %11264 = vmatprep.subr.bf16.mxu1 %v12593_v42 }
 0x122   :  { %v12854_v9 = vcombine.low %v651_v38, %v654_v62  ;;  %v658_v19 = vsel %vm12322_vm13, %v8425_v21, %v657_v1  ;;  %v660_v60 = vrot.slane %v12824_v45, 5  ;;  %v12868_v33 = vmax.f32 %v313_v17, 0.0 }
 0x123   :  { %17132 = vst [vmem:[#allocation70_spill] sm:$0xff] %v12844_v4  ;;  %17133 = vst [vmem:[#allocation71_spill] sm:$0xff] %v12846_v58  ;;  %9849 = vmatmul.mubr.msk.f32.gmra.mrb[48].mxu0 %vm686_vm12, %v12846_v58  ;;  %10088 = vmatprep.mubr.msk.f32.mxu1 %vm686_vm12, %v12846_v58  ;;  %v2121_v51 = vrot.slane %v12844_v4, 5  ;;  %v1073_v38 = vsel %vm12356_vm15, %v1071_v48, %v1072_v30  ;;  %v8461_v62 = vrot.slane %v12385_v13, 10  ;;  %v12877_v16 = vpop.f32.mrb[34].mxu0  ;;  %v8555_v1 = vrot.slane %v12828_v31, 9 }
 0x124   :  { %17134 = vst [vmem:[#allocation72_spill] sm:$0xff] %v12854_v9  ;;  %17135 = vst [vmem:[#allocation73_spill] sm:$0xff] %v12868_v33  ;;  %9851 = vmatprep.mubr.msk.f32.mxu0 %vm686_vm12, %v12854_v9  ;;  %10089 = vmatmul.mubr.msk.f32.gmra.mrb[4].mxu1 %vm686_vm12, %v12854_v9  ;;  %v661_v21 = vsel %vm12322_vm13, %v659_v2, %v660_v60  ;;  %v2124_v41 = vrot.slane %v12826_v37, 5  ;;  %v12884_v29 = vpop.f32.mrb[35].mxu0  ;;  %v1085_v30 = vrot.slane %v1083_v56, 4  ;;  %v1086_v48 = vrot.slane %v12412_v34, 6 }
 0x125   :  { %17136 = vst [vmem:[#allocation74_spill] sm:$0xff] %v12877_v16  ;;  %v2123_v17 = vrot.slane %v2121_v51, 4  ;;  %11266 = vmatpush3.bf16.msra.mxu1 %v12593_v42  ;;  %17137 = vst [vmem:[#allocation75_spill] sm:$0xff] %v12884_v29  ;;  %v12886_v9 = vcombine.low %v658_v19, %v661_v21  ;;  %v1090_v16 = vrot.slane %v12424_v46, 6  ;;  %v318_v2 = vadd.f32 %v12437_v53, %v12284_v10 }
 0x126   :  { %11268 = vmatprep.subr.bf16.mxu1 %v12595_v63  ;;  %v2122_v60 = vsel %vm12322_vm13, %v8555_v1, %v2121_v51  ;;  %v1097_v58 = vrot.slane %v12414_v35, 6  ;;  %v12900_v19 = vcombine.high %v12868_v33, %v12868_v33  ;;  %v17141_v10 = vrot.slane %v12300_v23, 6 }
 0x127   :  { %17138 = vst [vmem:[#allocation76_spill] sm:$0xff] %v12886_v9  ;;  %v2125_v42 = vsel %vm12322_vm13, %v2123_v17, %v2124_v41  ;;  %9852 = vmatmul.mubr.msk.f32.gmra.mrb[50].mxu0 %vm686_vm12, %v12886_v9  ;;  %10091 = vmatprep.mubr.msk.f32.mxu1 %vm686_vm12, %v12886_v9  ;;  %v17142_v53 = vrot.slane %v12305_v26, 10  ;;  %v1092_v41 = vrot.slane %v1090_v16, 4  ;;  %v17143_v1 = vcombine.low %v12288_v15, %v12295_v20 }
 0x128   :  { %17139 = vst [vmem:[#allocation77_spill] sm:$0xff] %v12900_v19  ;;  %v12906_v21 = vcombine.low %v2122_v60, %v2125_v42  ;;  %v12920_v17 = vcombine.low %v12305_v26, %v12300_v23  ;;  %v1084_v60 = vsel %vm12356_vm15, %v8461_v62, %v1083_v56  ;;  %v1104_v42 = vrot.slane %v12466_v18, 6 }
 0x129   :  { %v1070_v51 = vsel %vm12356_vm15, %v17142_v53, %v17141_v10  ;;  %9870 = vmatprep.mubr.msk.f32.mxu0 %vm686_vm12, %v17143_v1  ;;  %v1087_v10 = vsel %vm12356_vm15, %v1085_v30, %v1086_v48  ;;  %v1099_v53 = vrot.slane %v1097_v58, 4  ;;  %v1100_v1 = vrot.slane %v12431_v50, 6 }
 0x12a   :  { %17140 = vst [vmem:[#allocation78_spill] sm:$0xff] %v12906_v21  ;;  %17144 = vst [vmem:[#allocation79_spill] sm:$0xff] %v12920_v17  ;;  %v12922_v9 = vcombine.low %v1070_v51, %v1073_v38  ;;  %10092 = vmatmul.mubr.msk.f32.gmra.mrb[6].mxu1 %vm686_vm12, %v12906_v21  ;;  %v1107_v29 = vrot.slane %v12446_v3, 6  ;;  %v12934_v38 = vmax.f32 %v318_v2, 0.0  ;;  %v12938_v56 = vcombine.low %v12298_v22, %v12309_v27 }
 0x12b   :  { %v8465_v62 = vrot.slane %v12483_v5, 10  ;;  %9871 = vmatmul.mubr.msk.f32.vlgmr.msra.gmra.mrb[36].mxu0 %vm686_vm12, %v12920_v17  ;;  %v1094_v30 = vsel %vm12356_vm15, %v1092_v41, %v1093_v11  ;;  %v1106_v48 = vrot.slane %v1104_v42, 4  ;;  %v1113_v51 = vrot.slane %v1111_v36, 4 }
 0x12c   :  { %17145 = vst [vmem:[#allocation80_spill] sm:$0xff] %v12922_v9  ;;  %17146 = vst [vmem:[#allocation81_spill] sm:$0xff] %v12934_v38  ;;  %10110 = vmatprep.mubr.msk.f32.mxu1 %vm686_vm12, %v12922_v9  ;;  %v1114_v2 = vrot.slane %v12489_v40, 6  ;;  %9873 = vmatprep.mubr.msk.f32.mxu0 %vm686_vm12, %v12938_v56  ;;  %v12952_v22 = vcombine.low %v12385_v13, %v12379_v6  ;;  %v12954_v27 = vcombine.low %v1084_v60, %v1087_v10 }
 0x12d   :  { %17147 = vst [vmem:[#allocation82_spill] sm:$0xff] %v12938_v56  ;;  %v8463_v21 = vrot.slane %v12456_v12, 10  ;;  %11174 = vmatpush3.bf16.msra.mxu0 %v12477_v32  ;;  %v2303_v17 = vrot.slane %v12900_v19, 6  ;;  %v12961_v11 = vcombine.low %v12397_v24, %v12424_v46  ;;  %v17151_v41 = vrot.slane %v12397_v24, 10  ;;  %v17172_v19 = vld [vmem:[#allocation42_spill] sm:$0xff] }
 0x12e   :  { %17148 = vst [vmem:[#allocation83_spill] sm:$0xff] %v12952_v22  ;;  %17149 = vst [vmem:[#allocation84_spill] sm:$0xff] %v12954_v27  ;;  %10111 = vmatmul.mubr.msk.f32.vlgmr.msra.gmra.mrb[8].mxu1 %vm686_vm12, %v12633_v54  ;;  %v1101_v60 = vsel %vm12356_vm15, %v1099_v53, %v1100_v1  ;;  %v1125_v10 = vrot.slane %v12671_v39, 6  ;;  %11176 = vmatprep.subr.bf16.mxu0 %v12599_v47  ;;  %v1115_v53 = vsel %vm12356_vm15, %v1113_v51, %v1114_v2  ;;  %v17158_v2 = vld [vmem:[#allocation52_spill] sm:$0xff] }
 0x12f   :  { %17150 = vst [vmem:[#allocation85_spill] sm:$0xff] %v12961_v11  ;;  %v1091_v56 = vsel %vm12356_vm15, %v17151_v41, %v1090_v16  ;;  %11270 = vmatpush3.bf16.msra.mxu1 %v12595_v63  ;;  %10113 = vmatprep.mubr.msk.f32.mxu1 %vm686_vm12, %v12954_v27  ;;  %v1098_v54 = vsel %vm12356_vm15, %v8463_v21, %v1097_v58  ;;  %v2305_v41 = vrot.slane %v2303_v17, 4  ;;  %v2306_v21 = vrot.slane %v12934_v38, 6  ;;  %v17170_v27 = vld [vmem:[#allocation34_spill] sm:$0xff] }
 0x130   :  { %v12976_v32 = vcombine.low %v1091_v56, %v1094_v30  ;;  %v1112_v16 = vsel %vm12356_vm15, %v8465_v62, %v1111_v36  ;;  %9874 = vmatmul.mubr.msk.f32.gmra.mrb[38].mxu0 %vm686_vm12, %v12952_v22  ;;  %11272 = vmatprep.subr.bf16.mxu1 %v12597_v8  ;;  %v1108_v63 = vsel %vm12356_vm15, %v1106_v48, %v1107_v29  ;;  %v1127_v1 = vrot.slane %v1125_v10, 4  ;;  %v17155_v29 = vld [vmem:[#allocation48_spill] sm:$0xff] }
 0x131   :  { %v1128_v56 = vrot.slane %v12688_v52, 6  ;;  %9876 = vmatprep.mubr.msk.f32.mxu0 %vm686_vm12, %v12961_v11  ;;  %v12994_v36 = vcombine.low %v12456_v12, %v12414_v35  ;;  %v12996_v58 = vcombine.low %v1098_v54, %v1101_v60  ;;  %11178 = vmatpush3.bf16.msra.mxu0 %v12599_v47  ;;  %v1132_v62 = vrot.slane %v17155_v29, 6  ;;  %v17159_v11 = vld [vmem:[#allocation38_spill] sm:$0xff]  ;;  %v17165_v52 = vld [vmem:[#allocation55_spill] sm:$0xff] }
 0x132   :  { %17152 = vst [vmem:[#allocation86_spill] sm:$0xff] %v12976_v32  ;;  %v13003_v30 = vcombine.low %v12427_v49, %v12466_v18  ;;  %10114 = vmatmul.mubr.msk.f32.gmra.mrb[10].mxu1 %vm686_vm12, %v12976_v32  ;;  %v17157_v48 = vrot.slane %v12427_v49, 10  ;;  %v8572_v54 = vrot.slane %v12868_v33, 10  ;;  %v1139_v60 = vrot.slane %v17158_v2, 6  ;;  %11180 = vmatprep.subr.bf16.mxu0 %v17159_v11  ;;  %v17162_v32 = vld [vmem:[#allocation51_spill] sm:$0xff] }
 0x133   :  { %17153 = vst [vmem:[#allocation87_spill] sm:$0xff] %v12994_v36  ;;  %17154 = vst [vmem:[#allocation88_spill] sm:$0xff] %v12996_v58  ;;  %10116 = vmatprep.mubr.msk.f32.mxu1 %vm686_vm12, %v12996_v58  ;;  %11274 = vmatpush3.bf16.msra.mxu1 %v12597_v8  ;;  %v13019_v22 = vcombine.low %v1112_v16, %v1115_v53  ;;  %v2307_v38 = vsel %vm12356_vm15, %v2305_v41, %v2306_v21  ;;  %v17163_v33 = vld [vmem:[#allocation35_spill] sm:$0xff]  ;;  %v1134_v58 = vrot.slane %v1132_v62, 4 }
 0x134   :  { %17156 = vst [vmem:[#allocation48_spill] sm:$0xff] %v13003_v30  ;;  %v1105_v51 = vsel %vm12356_vm15, %v17157_v48, %v1104_v42  ;;  %v8467_v42 = vrot.slane %v17162_v32, 10  ;;  %9877 = vmatmul.mubr.msk.f32.gmra.mrb[40].mxu0 %vm686_vm12, %v12994_v36  ;;  %v1129_v48 = vsel %vm12356_vm15, %v1127_v1, %v1128_v56  ;;  %11276 = vmatprep.subr.bf16.mxu1 %v17163_v33  ;;  %v8469_v8 = vrot.slane %v17165_v52, 10  ;;  %v17166_v56 = vld [vmem:[#allocation56_spill] sm:$0xff] }
 0x135   :  { %v13016_v47 = vcombine.low %v1105_v51, %v1108_v63  ;;  %17161 = vst [vmem:[#allocation38_spill] sm:$0xff] %v13019_v22  ;;  %v17164_v63 = vld [vmem:[#allocation53_spill] sm:$0xff]  ;;  %9879 = vmatprep.mubr.msk.f32.mxu0 %vm686_vm12, %v13003_v30  ;;  %v1141_v16 = vrot.slane %v1139_v60, 4  ;;  %v1142_v41 = vrot.slane %v12709_v25, 6  ;;  %11182 = vmatpush3.bf16.msra.mxu0 %v17159_v11  ;;  %v1146_v53 = vrot.slane %v12739_v28, 6  ;;  %v17169_v11 = vld [vmem:[#allocation40_spill] sm:$0xff] }
 0x136   :  { %v1135_v51 = vrot.slane %v17164_v63, 6  ;;  %v1153_v21 = vrot.slane %v12754_v57, 6  ;;  %v1149_v1 = vrot.slane %v12735_v59, 6  ;;  %v8470_v36 = vrot.slane %v17166_v56, 10  ;;  %v17168_v25 = vld [vmem:[#allocation41_spill] sm:$0xff] }
 0x137   :  { %17160 = vst [vmem:[#allocation52_spill] sm:$0xff] %v13016_v47  ;;  %v13041_v63 = vcombine.low %v12483_v5, %v12460_v14  ;;  %10117 = vmatmul.mubr.msk.f32.gmra.mrb[12].mxu1 %vm686_vm12, %v13016_v47  ;;  %v2304_v30 = vsel %vm12356_vm15, %v8572_v54, %v2303_v17  ;;  %11184 = vmatprep.subr.bf16.mxu0 %v17168_v25  ;;  %v8468_v5 = vrot.slane %v17172_v19, 10 }
 0x138   :  { %v872_v40 = vcombine.low %v17170_v27, %v17169_v11  ;;  %10119 = vmatprep.mubr.msk.f32.mxu1 %vm686_vm12, %v13019_v22  ;;  %v13052_v59 = vcombine.low %v2304_v30, %v2307_v38  ;;  %v1126_v9 = vsel %vm12356_vm15, %v8467_v42, %v1125_v10  ;;  %11278 = vmatpush3.bf16.msra.mxu1 %v17163_v33  ;;  %v1148_v38 = vrot.slane %v1146_v53, 4  ;;  %v17174_v30 = vld [vmem:[#allocation43_spill] sm:$0xff] }
 0x139   :  { %17167 = vst [vmem:[#allocation51_spill] sm:$0xff] %v13041_v63  ;;  %9880 = vmatmul.mubr.msk.f32.gmra.mrb[42].mxu0 %vm686_vm12, %v13041_v63  ;;  %v13060_v17 = vcombine.low %v1126_v9, %v1129_v48  ;;  %v1136_v54 = vsel %vm12356_vm15, %v1134_v58, %v1135_v51  ;;  %v1140_v22 = vsel %vm12356_vm15, %v8469_v8, %v1139_v60  ;;  %v1155_v33 = vrot.slane %v1153_v21, 4  ;;  %v17175_v9 = vld [vmem:[#allocation61_spill] sm:$0xff]  ;;  %v17177_v8 = vld [vmem:[#allocation64_spill] sm:$0xff] }
 0x13a   :  { %17171 = vst [vmem:[#allocation35_spill] sm:$0xff] %v13052_v59  ;;  %11280 = vmatprep.subr.bf16.mxu1 %v17174_v30  ;;  %9882 = vmatprep.mubr.msk.f32.mxu0 %vm686_vm12, %v872_v40  ;;  %v1143_v10 = vsel %vm12356_vm15, %v1141_v16, %v1142_v41  ;;  %v1156_v42 = vrot.slane %v12782_v61, 6  ;;  %v1160_v48 = vrot.slane %v17175_v9, 6  ;;  %v8472_v58 = vrot.slane %v12752_v43, 10  ;;  %v17180_v63 = vld [vmem:[#allocation60_spill] sm:$0xff] }
 0x13b   :  { %17173 = vst [vmem:[#allocation55_spill] sm:$0xff] %v13060_v17  ;;  %11186 = vmatpush3.bf16.msra.mxu0 %v17168_v25  ;;  %v13076_v60 = vcombine.low %v17162_v32, %v12671_v39  ;;  %10120 = vmatmul.mubr.msk.f32.gmra.mrb[14].mxu1 %vm686_vm12, %v13052_v59  ;;  %v1133_v40 = vsel %vm12356_vm15, %v8468_v5, %v1132_v62  ;;  %v1167_v51 = vrot.slane %v12784_v7, 6  ;;  %v1163_v16 = vrot.slane %v17177_v8, 6 }
 0x13c   :  { %v13086_v25 = vcombine.low %v17172_v19, %v17155_v29  ;;  %10122 = vmatprep.mubr.msk.f32.mxu1 %vm686_vm12, %v13060_v17  ;;  %v13090_v41 = vcombine.low %v1133_v40, %v1136_v54  ;;  %v8471_v61 = vrot.slane %v17180_v63, 10  ;;  %11282 = vmatpush3.bf16.msra.mxu1 %v17174_v30  ;;  %v13096_v5 = vcombine.low %v1140_v22, %v1143_v10  ;;  %v17183_v17 = vld [vmem:[#allocation44_spill] sm:$0xff]  ;;  %v17185_v40 = vld [vmem:[#allocation13_spill] sm:$0xff] }
 0x13d   :  { %17176 = vst [vmem:[#allocation41_spill] sm:$0xff] %v13076_v60  ;;  %9883 = vmatmul.mubr.msk.f32.gmra.mrb[44].mxu0 %vm686_vm12, %v13076_v60  ;;  %v1150_v62 = vsel %vm12356_vm15, %v1148_v38, %v1149_v1  ;;  %v17182_v59 = vrot.slane %v12295_v20, 6  ;;  %v8473_v19 = vrot.slane %v12800_v0, 10  ;;  %11284 = vmatprep.subr.bf16.mxu1 %v17183_v17  ;;  %v1157_v54 = vsel %vm12356_vm15, %v1155_v33, %v1156_v42  ;;  %v17184_v10 = vld [vmem:[#allocation16_spill] sm:$0xff]  ;;  %v17187_v1 = vld [vmem:[#allocation46_spill] sm:$0xff] }
 0x13e   :  { %17178 = vst [vmem:[#allocation40_spill] sm:$0xff] %v13086_v25  ;;  %17179 = vst [vmem:[#allocation34_spill] sm:$0xff] %v13090_v41  ;;  %9885 = vmatprep.mubr.msk.f32.mxu0 %vm686_vm12, %v13086_v25  ;;  %v1162_v30 = vrot.slane %v1160_v48, 4  ;;  %v2310_v22 = vrot.slane %v12844_v4, 6  ;;  %v13111_v60 = vcombine.low %v17185_v40, %v17184_v10  ;;  %11188 = vmatprep.subr.bf16.mxu0 %v17187_v1  ;;  %v1169_v38 = vrot.slane %v1167_v51, 4 }
 0x13f   :  { %17181 = vst [vmem:[#allocation43_spill] sm:$0xff] %v13096_v5  ;;  %v1064_v8 = vrot.slane %v17182_v59, 4  ;;  %v13116_v59 = vcombine.low %v17165_v52, %v17158_v2  ;;  %10123 = vmatmul.mubr.msk.f32.gmra.mrb[0].mxu1 %vm686_vm12, %v13090_v41  ;;  %v1170_v25 = vrot.slane %v12824_v45, 6  ;;  %v1400_v33 = vrot.slane %v12300_v23, 7 }
 0x140   :  { %17186 = vst [vmem:[#allocation44_spill] sm:$0xff] %v13111_v60  ;;  %v13124_v42 = vcombine.low %v17166_v56, %v12739_v28  ;;  %10125 = vmatprep.mubr.msk.f32.mxu1 %vm686_vm12, %v13096_v5  ;;  %v13130_v10 = vcombine.low %v17180_v63, %v12754_v57  ;;  %v1147_v40 = vsel %vm12356_vm15, %v8470_v36, %v1146_v53  ;;  %v17194_v56 = vld [vmem:[#allocation7_spill] sm:$0xff]  ;;  %v2312_v53 = vrot.slane %v2310_v22, 4 }
 0x141   :  { %17188 = vst [vmem:[#allocation16_spill] sm:$0xff] %v13116_v59  ;;  %v1154_v4 = vsel %vm12356_vm15, %v8471_v61, %v1153_v21  ;;  %9886 = vmatmul.mubr.msk.f32.gmra.mrb[46].mxu0 %vm686_vm12, %v13116_v59  ;;  %v13140_v23 = vcombine.low %v12752_v43, %v17175_v9  ;;  %v13142_v41 = vcombine.low %v1147_v40, %v1150_v62  ;;  %v17195_v63 = vrot.slane %v17194_v56, 6  ;;  %v17196_v21 = vld [vmem:[#allocation10_spill] sm:$0xff] }
 0x142   :  { %17189 = vst [vmem:[#allocation13_spill] sm:$0xff] %v13124_v42  ;;  %17190 = vst [vmem:[#allocation46_spill] sm:$0xff] %v13130_v10  ;;  %v13144_v5 = vcombine.low %v1154_v4, %v1157_v54  ;;  %9888 = vmatprep.mubr.msk.f32.mxu0 %vm686_vm12, %v13124_v42  ;;  %v1164_v61 = vsel %vm12356_vm15, %v1162_v30, %v1163_v16  ;;  %v1168_v36 = vsel %vm12356_vm15, %v8473_v19, %v1167_v51 }
 0x143   :  { %17191 = vst [vmem:[#allocation89_spill] sm:$0xff] %v13140_v23  ;;  %17192 = vst [vmem:[#allocation90_spill] sm:$0xff] %v13142_v41  ;;  %v1066_v45 = vsel %vm12356_vm15, %v1064_v8, %v17195_v63  ;;  %v1403_v62 = vrot.slane %v17196_v21, 7  ;;  %10126 = vmatmul.mubr.msk.f32.gmra.mrb[2].mxu1 %vm686_vm12, %v13142_v41  ;;  %v1171_v4 = vsel %vm12356_vm15, %v1169_v38, %v1170_v25  ;;  %v1402_v54 = vrot.slane %v1400_v33, 4 }
 0x144   :  { %17193 = vst [vmem:[#allocation91_spill] sm:$0xff] %v13144_v5  ;;  %v1414_v63 = vrot.slane %v12379_v6, 7  ;;  %v1421_v8 = vrot.slane %v12424_v46, 7  ;;  %10128 = vmatprep.mubr.msk.f32.mxu1 %vm686_vm12, %v13144_v5  ;;  %v17197_v16 = vrot.slane %v12295_v20, 6  ;;  %v17198_v19 = vrot.slane %v12288_v15, 10 }
 0x145   :  { %v1161_v30 = vsel %vm12356_vm15, %v8472_v58, %v1160_v48  ;;  %v2313_v25 = vrot.slane %v12826_v37, 6  ;;  %v1428_v38 = vrot.slane %v12414_v35, 7  ;;  %v1424_v40 = vrot.slane %v12420_v44, 7  ;;  %9889 = vmatmul.mubr.msk.f32.gmra.mrb[48].mxu0 %vm686_vm12, %v13130_v10 }
 0x146   :  { %v1063_v51 = vsel %vm12356_vm15, %v17198_v19, %v17197_v16  ;;  %v13180_v42 = vcombine.low %v12800_v0, %v12784_v7  ;;  %v13182_v46 = vcombine.low %v1161_v30, %v1164_v61  ;;  %9891 = vmatprep.mubr.msk.f32.mxu0 %vm686_vm12, %v13140_v23  ;;  %v13186_v48 = vcombine.low %v1168_v36, %v1171_v4 }
 0x147   :  { %v1180_v59 = vcombine.low %v1063_v51, %v1066_v45  ;;  %v8573_v58 = vrot.slane %v12828_v31, 10  ;;  %v2314_v16 = vsel %vm12356_vm15, %v2312_v53, %v2313_v25  ;;  %v8493_v19 = vrot.slane %v12385_v13, 11 }
 0x148   :  { %17199 = vst [vmem:[#allocation7_spill] sm:$0xff] %v13180_v42  ;;  %17200 = vst [vmem:[#allocation10_spill] sm:$0xff] %v13182_v46  ;;  %10129 = vmatmul.mubr.msk.f32.gmra.mrb[4].mxu1 %vm686_vm12, %v13182_v46  ;;  %v1404_v45 = vsel %vm12328_vm14, %v1402_v54, %v1403_v62  ;;  %v1416_v61 = vrot.slane %v1414_v63, 4  ;;  %v1417_v51 = vrot.slane %v12412_v34, 7  ;;  %v1423_v30 = vrot.slane %v1421_v8, 4 }
 0x149   :  { %17201 = vst [vmem:[#allocation92_spill] sm:$0xff] %v13186_v48  ;;  %10131 = vmatprep.mubr.msk.f32.mxu1 %vm686_vm12, %v13186_v48  ;;  %v2311_v36 = vsel %vm12356_vm15, %v8573_v58, %v2310_v22  ;;  %v1430_v4 = vrot.slane %v1428_v38, 4  ;;  %v1431_v53 = vrot.slane %v12431_v50, 7  ;;  %v1435_v13 = vrot.slane %v12466_v18, 7  ;;  %9892 = vmatmul.mubr.msk.f32.gmra.mrb[50].mxu0 %vm686_vm12, %v13180_v42 }
 0x14a   :  { %v8494_v25 = vrot.slane %v12397_v24, 11  ;;  %v13206_v62 = vcombine.low %v2311_v36, %v2314_v16  ;;  %v17204_v54 = vrot.slane %v12305_v26, 11  ;;  %v1442_v35 = vrot.slane %v12460_v14, 7  ;;  %9910 = vmatprep.mubr.msk.f32.mxu0 %vm686_vm12, %v1180_v59  ;;  %v17205_v59 = vld [vmem:[#allocation27_spill] sm:$0xff]  ;;  %v17206_v36 = vld [vmem:[#allocation77_spill] sm:$0xff] }
 0x14b   :  { %v8496_v22 = vrot.slane %v12427_v49, 11  ;;  %v1438_v58 = vrot.slane %v12446_v3, 7  ;;  %v8495_v24 = vrot.slane %v12456_v12, 11  ;;  %v1415_v26 = vsel %vm12328_vm14, %v8493_v19, %v1414_v63  ;;  %v17207_v63 = vld [vmem:[#allocation80_spill] sm:$0xff] }
 0x14c   :  { %17203 = vst [vmem:[#allocation93_spill] sm:$0xff] %v13206_v62  ;;  %v1401_v23 = vsel %vm12328_vm14, %v17204_v54, %v1400_v33  ;;  %10132 = vmatmul.mubr.msk.f32.gmra.mrb[6].mxu1 %vm686_vm12, %v13206_v62  ;;  %v1418_v33 = vsel %vm12328_vm14, %v1416_v61, %v1417_v51  ;;  %v1425_v49 = vsel %vm12328_vm14, %v1423_v30, %v1424_v40  ;;  %v1118_v16 = vrot.slane %v17169_v11, 6  ;;  %v17208_v40 = vld [vmem:[#allocation28_spill] sm:$0xff]  ;;  %v1507_v62 = vld [vmem:[%s16699_s3 + $0xe0] sm:$0xff]  ;;  %v17211_v30 = vld [vmem:[#allocation39_spill] sm:$0xff] }
 0x14d   :  { %v13216_v18 = vcombine.low %v1401_v23, %v1404_v45  ;;  %v1432_v23 = vsel %vm12328_vm14, %v1430_v4, %v1431_v53  ;;  %v1437_v12 = vrot.slane %v1435_v13, 4  ;;  %v8497_v45 = vrot.slane %v17205_v59, 11  ;;  %9911 = vmatmul.mubr.msk.f32.vlgmr.msra.gmra.mrb[36].mxu0 %vm686_vm12, %v17207_v63  ;;  %v1508_v4 = vld [vmem:[%s16699_s3 + $0xe8] sm:$0xff]  ;;  %v17209_v53 = vld [vmem:[#allocation37_spill] sm:$0xff] }
 0x14e   :  { %v2492_v54 = vrot.slane %v17206_v36, 7  ;;  %v8466_v19 = vrot.slane %v17170_v27, 10  ;;  %v1444_v61 = vrot.slane %v1442_v35, 4  ;;  %v1445_v51 = vrot.slane %v17208_v40, 7  ;;  %9913 = vmatprep.mubr.msk.f32.mxu0 %vm686_vm12, %v17209_v53  ;;  %11190 = vmatpush3.bf16.msra.mxu0 %v17187_v1  ;;  %v17221_v53 = vld [vmem:[#allocation81_spill] sm:$0xff] }
 0x14f   :  { %10150 = vmatprep.mubr.msk.f32.mxu1 %vm686_vm12, %v13216_v18  ;;  %v13247_v59 = vcombine.low %v1415_v26, %v1418_v33  ;;  %v1422_v63 = vsel %vm12328_vm14, %v8494_v25, %v1421_v8  ;;  %v1429_v42 = vsel %vm12328_vm14, %v8495_v24, %v1428_v38  ;;  %v1121_v36 = vrot.slane %v17211_v30, 6  ;;  %v17214_v8 = vld [vmem:[#allocation47_spill] sm:$0xff]  ;;  %v1509_v24 = vld [vmem:[%s16699_s3 + $0xf0] sm:$0xff] }
 0x150   :  { %10151 = vmatmul.mubr.msk.f32.vlgmr.msra.gmra.mrb[8].mxu1 %vm686_vm12, %v13111_v60  ;;  %v13257_v14 = vcombine.low %v1422_v63, %v1425_v49  ;;  %v13259_v40 = vcombine.low %v1429_v42, %v1432_v23  ;;  %v13263_v26 = vsel %vm12356_vm15, %v8466_v19, %v1118_v16  ;;  %v1120_v33 = vrot.slane %v1118_v16, 4  ;;  %11192 = vmatprep.subr.bf16.mxu0 %v17214_v8  ;;  %v1510_v49 = vld [vmem:[%s16699_s3 + $0xf8] sm:$0xff]  ;;  %v17219_v19 = vld [vmem:[#allocation86_spill] sm:$0xff] }
 0x151   :  { %17210 = vst [vmem:[#allocation27_spill] sm:$0xff] %v13247_v59  ;;  %11286 = vmatpush3.bf16.msra.mxu1 %v17183_v17  ;;  %10153 = vmatprep.mubr.msk.f32.mxu1 %vm686_vm12, %v13247_v59  ;;  %v1439_v1 = vsel %vm12328_vm14, %v1437_v12, %v1438_v58  ;;  %v1443_v38 = vsel %vm12328_vm14, %v8497_v45, %v1442_v35  ;;  %v2494_v42 = vrot.slane %v2492_v54, 4  ;;  %v17215_v17 = vld [vmem:[#allocation84_spill] sm:$0xff]  ;;  %v17216_v16 = vld [vmem:[#allocation45_spill] sm:$0xff]  ;;  %v17217_v35 = vrot.slane %v12671_v39, 7 }
 0x152   :  { %17212 = vst [vmem:[#allocation80_spill] sm:$0xff] %v13257_v14  ;;  %17213 = vst [vmem:[#allocation39_spill] sm:$0xff] %v13259_v40  ;;  %v11195_v25 = vpack.c.bf16 %v1508_v4, %v1507_v62  ;;  %9914 = vmatmul.mubr.msk.f32.gmra.mrb[38].mxu0 %vm686_vm12, %v17215_v17  ;;  %11288 = vmatprep.subr.bf16.mxu1 %v17216_v16  ;;  %v1446_v58 = vsel %vm12328_vm14, %v1444_v61, %v1445_v51  ;;  %v17218_v62 = vld [vmem:[#allocation50_spill] sm:$0xff]  ;;  %v17220_v63 = vld [vmem:[#allocation73_spill] sm:$0xff]  ;;  %v2495_v3 = vrot.slane %v17221_v53, 7 }
 0x153   :  { %v1458_v23 = vrot.slane %v17217_v35, 4  ;;  %v1459_v12 = vrot.slane %v17218_v62, 7  ;;  %9916 = vmatprep.mubr.msk.f32.mxu0 %vm686_vm12, %v17219_v19  ;;  %v1436_v4 = vsel %vm12328_vm14, %v8496_v22, %v1435_v13  ;;  %v8590_v17 = vrot.slane %v17220_v63, 11  ;;  %11194 = vmatpush3.bf16.msra.mxu0 %v17214_v8  ;;  %v2685_v13 = vld [vmem:[%s16699_s3 + $0x270] sm:$0xff]  ;;  %v2686_v22 = vld [vmem:[%s16699_s3 + $0x278] sm:$0xff]  ;;  %v17231_v63 = vld [vmem:[#allocation42_spill] sm:$0xff] }
 0x154   :  { %v1470_v61 = vrot.slane %v17158_v2, 7  ;;  %10154 = vmatmul.mubr.msk.f32.gmra.mrb[10].mxu1 %vm686_vm12, %v13257_v14  ;;  %v1122_v51 = vsel %vm12356_vm15, %v1120_v33, %v1121_v36  ;;  %v13300_v35 = vcombine.low %v1436_v4, %v1439_v1  ;;  %11196 = vmatprep.subr.bf16.mxu0 %v11195_v25  ;;  %v11199_v45 = vpack.c.bf16 %v1510_v49, %v1509_v24  ;;  %v17223_v24 = vld [vmem:[#allocation88_spill] sm:$0xff]  ;;  %v17224_v4 = vld [vmem:[#allocation49_spill] sm:$0xff] }
 0x155   :  { %10156 = vmatprep.mubr.msk.f32.mxu1 %vm686_vm12, %v13259_v40  ;;  %11290 = vmatpush3.bf16.msra.mxu1 %v17216_v16  ;;  %v13311_v8 = vcombine.low %v1443_v38, %v1446_v58  ;;  %v2493_v36 = vsel %vm12328_vm14, %v8590_v17, %v2492_v54  ;;  %v2496_v33 = vsel %vm12328_vm14, %v2494_v42, %v2495_v3  ;;  %v8499_v1 = vrot.slane %v17162_v32, 11  ;;  %v17226_v58 = vld [vmem:[#allocation53_spill] sm:$0xff]  ;;  %v17227_v32 = vld [vmem:[#allocation54_spill] sm:$0xff] }
 0x156   :  { %17222 = vst [vmem:[#allocation47_spill] sm:$0xff] %v13300_v35  ;;  %9917 = vmatmul.mubr.msk.f32.gmra.mrb[40].mxu0 %vm686_vm12, %v17223_v24  ;;  %v1460_v49 = vsel %vm12328_vm14, %v1458_v23, %v1459_v12  ;;  %11292 = vmatprep.subr.bf16.mxu1 %v17224_v4  ;;  %v17225_v16 = vrot.slane %v17155_v29, 7  ;;  %v1466_v55 = vrot.slane %v17226_v58, 7  ;;  %v8501_v54 = vrot.slane %v17165_v52, 11 }
 0x157   :  { %9919 = vmatprep.mubr.msk.f32.mxu0 %vm686_vm12, %v13016_v47  ;;  %v1472_v3 = vrot.slane %v1470_v61, 4  ;;  %v1473_v42 = vrot.slane %v17227_v32, 7  ;;  %11198 = vmatpush3.bf16.msra.mxu0 %v11195_v25  ;;  %v1477_v17 = vrot.slane %v12739_v28, 7  ;;  %v11295_v24 = vpack.c.bf16 %v2686_v22, %v2685_v13 }
 0x158   :  { %v1465_v38 = vrot.slane %v17225_v16, 4  ;;  %10157 = vmatmul.mubr.msk.f32.gmra.mrb[12].mxu1 %vm686_vm12, %v13300_v35  ;;  %v1484_v23 = vrot.slane %v12754_v57, 7  ;;  %11200 = vmatprep.subr.bf16.mxu0 %v11199_v45  ;;  %v8505_v12 = vrot.slane %v12800_v0, 11  ;;  %v1498_v52 = vrot.slane %v12784_v7, 7  ;;  %v17228_v16 = vld [vmem:[#allocation68_spill] sm:$0xff]  ;;  %v2854_v0 = vld [vmem:[%s16699_s3 + $0x280] sm:$0xff] }
 0x159   :  { %v1501_v19 = vrot.slane %v17228_v16, 7  ;;  %v1188_v47 = vcombine.low %v13263_v26, %v1122_v51  ;;  %10159 = vmatprep.mubr.msk.f32.mxu1 %vm686_vm12, %v13311_v8  ;;  %v13340_v25 = vcombine.low %v2493_v36, %v2496_v33  ;;  %v17230_v13 = vrot.slane %v12671_v39, 7  ;;  %11294 = vmatpush3.bf16.msra.mxu1 %v17224_v4  ;;  %v2855_v26 = vld [vmem:[%s16699_s3 + $0x288] sm:$0xff]  ;;  %v17232_v51 = vld [vmem:[#allocation38_spill] sm:$0xff] }
 0x15a   :  { %v8500_v57 = vrot.slane %v17231_v63, 11  ;;  %9920 = vmatmul.mubr.msk.f32.gmra.mrb[42].mxu0 %vm686_vm12, %v17232_v51  ;;  %v1467_v33 = vsel %vm12328_vm14, %v1465_v38, %v1466_v55  ;;  %11296 = vmatprep.subr.bf16.mxu1 %v11295_v24  ;;  %v1499_v63 = vsel %vm12328_vm14, %v8505_v12, %v1498_v52  ;;  %v1471_v4 = vsel %vm12328_vm14, %v8501_v54, %v1470_v61  ;;  %v17233_v38 = vld [vmem:[#allocation62_spill] sm:$0xff]  ;;  %v17238_v51 = vld [vmem:[#allocation55_spill] sm:$0xff] }
 0x15b   :  { %17229 = vst [vmem:[#allocation45_spill] sm:$0xff] %v13340_v25  ;;  %v1457_v22 = vsel %vm12328_vm14, %v8499_v1, %v17230_v13  ;;  %v1500_v1 = vrot.slane %v1498_v52, 4  ;;  %9922 = vmatprep.mubr.msk.f32.mxu0 %vm686_vm12, %v1188_v47  ;;  %v1474_v13 = vsel %vm12328_vm14, %v1472_v3, %v1473_v42  ;;  %v1479_v7 = vrot.slane %v1477_v17, 4  ;;  %11202 = vmatpush3.bf16.msra.mxu0 %v11199_v45  ;;  %v17234_v52 = vld [vmem:[#allocation57_spill] sm:$0xff]  ;;  %v1720_v42 = vld [vmem:[%s16699_s3 + $0x100] sm:$0xff] }
 0x15c   :  { %v13356_v36 = vcombine.low %v1457_v22, %v1460_v49  ;;  %v1491_v49 = vrot.slane %v17175_v9, 7  ;;  %10160 = vmatmul.mubr.msk.f32.gmra.mrb[14].mxu1 %vm686_vm12, %v13340_v25  ;;  %v1486_v55 = vrot.slane %v1484_v23, 4  ;;  %v1487_v22 = vrot.slane %v17233_v38, 7 }
 0x15d   :  { %v1502_v12 = vsel %vm12328_vm14, %v1500_v1, %v1501_v19  ;;  %v13373_v47 = vpack.c.bf16 %v2855_v26, %v2854_v0  ;;  %v1480_v61 = vrot.slane %v17234_v52, 7  ;;  %v17235_v45 = vrot.slane %v17155_v29, 7  ;;  %11298 = vmatpush3.bf16.msra.mxu1 %v11295_v24  ;;  %v1721_v19 = vld [vmem:[%s16699_s3 + $0x108] sm:$0xff]  ;;  %v17236_v0 = vld [vmem:[#allocation56_spill] sm:$0xff]  ;;  %v17239_v24 = vld [vmem:[#allocation34_spill] sm:$0xff] }
 0x15e   :  { %10162 = vmatprep.mubr.msk.f32.mxu1 %vm686_vm12, %v13356_v36  ;;  %v13382_v3 = vcombine.low %v1499_v63, %v1502_v12  ;;  %v8502_v26 = vrot.slane %v17236_v0, 11  ;;  %v17237_v1 = vld [vmem:[#allocation64_spill] sm:$0xff]  ;;  %9923 = vmatmul.mubr.msk.f32.gmra.mrb[44].mxu0 %vm686_vm12, %v17238_v51  ;;  %v13400_v63 = vcombine.low %v1471_v4, %v1474_v13  ;;  %v17240_v0 = vld [vmem:[#allocation70_spill] sm:$0xff]  ;;  %v17242_v13 = vld [vmem:[#allocation43_spill] sm:$0xff] }
 0x15f   :  { %v1464_v54 = vsel %vm12328_vm14, %v8500_v57, %v17235_v45  ;;  %v1494_v25 = vrot.slane %v17237_v1, 7  ;;  %v1393_v57 = vrot.slane %v12295_v20, 7  ;;  %11300 = vmatprep.subr.bf16.mxu1 %v13373_v47  ;;  %9925 = vmatprep.mubr.msk.f32.mxu0 %vm686_vm12, %v17239_v24  ;;  %v1481_v12 = vsel %vm12328_vm14, %v1479_v7, %v1480_v61  ;;  %v17241_v51 = vld [vmem:[#allocation60_spill] sm:$0xff] }
 0x160   :  { %v13394_v16 = vcombine.low %v1464_v54, %v1467_v33  ;;  %v1493_v45 = vrot.slane %v1491_v49, 4  ;;  %v2499_v9 = vrot.slane %v17240_v0, 7  ;;  %v8503_v33 = vrot.slane %v17241_v51, 11 }
 0x161   :  { %v1488_v54 = vsel %vm12328_vm14, %v1486_v55, %v1487_v22  ;;  %v11203_v20 = vpack.c.bf16 %v1721_v19, %v1720_v42  ;;  %v1478_v4 = vsel %vm12328_vm14, %v8502_v26, %v1477_v17  ;;  %v1395_v24 = vrot.slane %v1393_v57, 4 }
 0x162   :  { %10163 = vmatmul.mubr.msk.f32.gmra.mrb[0].mxu1 %vm686_vm12, %v13394_v16  ;;  %9926 = vmatmul.mubr.msk.f32.gmra.mrb[46].mxu0 %vm686_vm12, %v17242_v13  ;;  %v13416_v7 = vcombine.low %v1478_v4, %v1481_v12  ;;  %v1485_v61 = vsel %vm12328_vm14, %v8503_v33, %v1484_v23  ;;  %v8504_v51 = vrot.slane %v12752_v43, 11  ;;  %v1495_v17 = vsel %vm12328_vm14, %v1493_v45, %v1494_v25  ;;  %v13450_v45 = vld [vmem:[%s16700_s2] ss:$0 sm:$0xff] }
 0x163   :  { %10165 = vmatprep.mubr.msk.f32.mxu1 %vm686_vm12, %v13400_v63  ;;  %11204 = vmatprep.subr.bf16.mxu0 %v11203_v20  ;;  %v13423_v55 = vcombine.low %v1485_v61, %v1488_v54  ;;  %v2501_v22 = vrot.slane %v2499_v9, 4  ;;  %v1396_v42 = vrot.slane %v17194_v56, 7  ;;  %v2502_v23 = vrot.slane %v12826_v37, 7  ;;  %v17243_v33 = vld [vmem:[#allocation26_spill] sm:$0xff]  ;;  %v1722_v61 = vld [vmem:[%s16699_s3 + $0x110] sm:$0xff] }
 0x164   :  { %9928 = vmatprep.mubr.msk.f32.mxu0 %vm686_vm12, %v13142_v41  ;;  %v1492_v43 = vsel %vm12328_vm14, %v8504_v51, %v1491_v49  ;;  %v8490_v19 = vrot.slane %v12288_v15, 11  ;;  %v8591_v12 = vrot.slane %v12828_v31, 11  ;;  %v323_v15 = vadd.f32 %v13450_v45, %v17243_v33  ;;  %v1723_v51 = vld [vmem:[%s16699_s3 + $0x118] sm:$0xff] }
 0x165   :  { %v1397_v25 = vsel %vm12328_vm14, %v1395_v24, %v1396_v42  ;;  %v13440_v26 = vcombine.low %v1492_v43, %v1495_v17  ;;  %v2503_v49 = vsel %vm12328_vm14, %v2501_v22, %v2502_v23  ;;  %v17244_v17 = vld [vmem:[#allocation69_spill] sm:$0xff]  ;;  %v2856_v43 = vld [vmem:[%s16699_s3 + $0x290] sm:$0xff]  ;;  %v1449_v33 = vrot.slane %v17169_v11, 7 }
 0x166   :  { %10166 = vmatmul.mubr.msk.f32.gmra.mrb[2].mxu1 %vm686_vm12, %v13416_v7  ;;  %9929 = vmatmul.mubr.msk.f32.gmra.mrb[48].mxu0 %vm686_vm12, %v13144_v5  ;;  %v1394_v24 = vsel %vm12328_vm14, %v8490_v19, %v1393_v57  ;;  %v2500_v4 = vsel %vm12328_vm14, %v8591_v12, %v2499_v9  ;;  %v413_v57 = vadd.f32 %v13450_v45, %v17244_v17  ;;  %v17246_v9 = vld [vmem:[#allocation9_spill] sm:$0xff]  ;;  %v13485_v19 = vmax.f32 %v323_v15, 0.0  ;;  %v1725_v12 = vld [vmem:[%s16699_s3 + $0x128] sm:$0xff]  ;;  %v1726_v17 = vld [vmem:[%s16699_s3 + $0x130] sm:$0xff] }
 0x167   :  { %10168 = vmatprep.mubr.msk.f32.mxu1 %vm686_vm12, %v13423_v55  ;;  %9931 = vmatprep.mubr.msk.f32.mxu0 %vm686_vm12, %v13182_v46  ;;  %v1511_v54 = vcombine.low %v1394_v24, %v1397_v25  ;;  %v13472_v22 = vcombine.low %v2500_v4, %v2503_v49  ;;  %v13477_v42 = vcombine.low %v17246_v9, %v17196_v21  ;;  %v2857_v23 = vld [vmem:[%s16699_s3 + $0x298] sm:$0xff]  ;;  %v1724_v21 = vld [vmem:[%s16699_s3 + $0x120] sm:$0xff]  ;;  %v2859_v4 = vld [vmem:[%s16699_s3 + $0x2a8] sm:$0xff] }
 0x168   :  { %v11207_v25 = vpack.c.bf16 %v1723_v51, %v1722_v61  ;;  %v13497_v49 = vmax.f32 %v413_v57, 0.0  ;;  %v11303_v15 = vpack.c.bf16 %v2857_v23, %v2856_v43  ;;  %v13506_v24 = vcombine.low %v12379_v6, %v12412_v34  ;;  %v17248_v61 = vld [vmem:[#allocation15_spill] sm:$0xff]  ;;  %v17249_v6 = vld [vmem:[#allocation29_spill] sm:$0xff]  ;;  %v17256_v46 = vld [vmem:[#allocation28_spill] sm:$0xff] }
 0x169   :  { %17245 = vst [vmem:[#allocation50_spill] sm:$0xff] %v13472_v22  ;;  %v11211_v51 = vpack.c.bf16 %v1725_v12, %v1724_v21  ;;  %v338_v34 = vadd.f32 %v13450_v45, %v17249_v6  ;;  %v1727_v57 = vld [vmem:[%s16699_s3 + $0x138] sm:$0xff]  ;;  %v1451_v23 = vrot.slane %v1449_v33, 4  ;;  %v17252_v12 = vld [vmem:[#allocation31_spill] sm:$0xff]  ;;  %v17257_v5 = vld [vmem:[#allocation22_spill] sm:$0xff] }
 0x16a   :  { %10169 = vmatmul.mubr.msk.f32.gmra.mrb[4].mxu1 %vm686_vm12, %v13440_v26  ;;  %9932 = vmatmul.mubr.msk.f32.gmra.mrb[50].mxu0 %vm686_vm12, %v13186_v48  ;;  %v13537_v9 = vcombine.high %v13497_v49, %v13497_v49  ;;  %v333_v6 = vadd.f32 %v13450_v45, %v17252_v12  ;;  %v1452_v12 = vrot.slane %v17211_v30, 7  ;;  %v13577_v41 = vcombine.low %v17257_v5, %v17256_v46 }
 0x16b   :  { %10171 = vmatprep.mubr.msk.f32.mxu1 %vm686_vm12, %v13382_v3  ;;  %9950 = vmatprep.mubr.msk.f32.mxu0 %vm686_vm12, %v1511_v54  ;;  %v2858_v54 = vld [vmem:[%s16699_s3 + $0x2a0] sm:$0xff]  ;;  %v3416_v5 = vrot.slane %v13497_v49, 7 }
 0x16c   :  { %17250 = vst [vmem:[#allocation49_spill] sm:$0xff] %v13537_v9  ;;  %v11307_v21 = vpack.c.bf16 %v2859_v4, %v2858_v54  ;;  %v2861_v54 = vld [vmem:[%s16699_s3 + $0x2b8] sm:$0xff]  ;;  %v3409_v4 = vrot.slane %v13485_v19, 7 }
 0x16e   :  { %10172 = vmatmul.mubr.msk.f32.gmra.mrb[6].mxu1 %vm686_vm12, %v13472_v22  ;;  %9951 = vmatmul.mubr.msk.f32.vlgmr.msra.gmra.mrb[36].mxu0 %vm686_vm12, %v13216_v18  ;;  %v13516_v18 = vcombine.high %v13485_v19, %v13485_v19  ;;  %v13549_v22 = vcombine.high %v12826_v37, %v12826_v37  ;;  %v3411_v13 = vrot.slane %v3409_v4, 4 }
 0x16f   :  { %10190 = vmatprep.mubr.msk.f32.mxu1 %vm686_vm12, %v13477_v42  ;;  %9953 = vmatprep.mubr.msk.f32.mxu0 %vm686_vm12, %v13111_v60  ;;  %v17253_v60 = vld [vmem:[#allocation18_spill] sm:$0xff] }
 0x170   :  { %11206 = vmatpush3.bf16.msra.mxu0 %v11203_v20  ;;  %17247 = vst [vmem:[#allocation81_spill] sm:$0xff] %v13516_v18  ;;  %v13522_v20 = vcombine.high %v17221_v53, %v17221_v53 }
 0x171   :  { %11208 = vmatprep.subr.bf16.mxu0 %v11207_v25 }
 0x172   :  { %10191 = vmatmul.mubr.msk.f32.vlgmr.msra.gmra.mrb[8].mxu1 %vm686_vm12, %v17248_v61  ;;  %9954 = vmatmul.mubr.msk.f32.gmra.mrb[38].mxu0 %vm686_vm12, %v13247_v59  ;;  %v13555_v59 = vcombine.low %v17253_v60, %v12431_v50  ;;  %v11215_v50 = vpack.c.bf16 %v1727_v57, %v1726_v17  ;;  %v3412_v60 = vrot.slane %v13516_v18, 7  ;;  %v1938_v17 = vld [vmem:[%s16699_s3 + $0x148] sm:$0xff]  ;;  %v8676_v57 = vrot.slane %v13522_v20, 11 }
 0x173   :  { %11302 = vmatpush3.bf16.msra.mxu1 %v13373_v47  ;;  %10193 = vmatprep.mubr.msk.f32.mxu1 %vm686_vm12, %v13506_v24  ;;  %v17251_v47 = vld [vmem:[#allocation19_spill] sm:$0xff] }
 0x174   :  { %v13543_v43 = vcombine.low %v17251_v47, %v12420_v44  ;;  %11304 = vmatprep.subr.bf16.mxu1 %v11303_v15  ;;  %9956 = vmatprep.mubr.msk.f32.mxu0 %vm686_vm12, %v13257_v14  ;;  %v2860_v44 = vld [vmem:[%s16699_s3 + $0x2b0] sm:$0xff]  ;;  %v8498_v47 = vrot.slane %v17170_v27, 11  ;;  %v17255_v14 = vld [vmem:[#allocation23_spill] sm:$0xff]  ;;  %v1937_v27 = vld [vmem:[%s16699_s3 + $0x140] sm:$0xff] }
 0x175   :  { %11210 = vmatpush3.bf16.msra.mxu0 %v11207_v25  ;;  %v17254_v25 = vld [vmem:[#allocation21_spill] sm:$0xff]  ;;  %v11311_v46 = vpack.c.bf16 %v2861_v54, %v2860_v44  ;;  %v3410_v44 = vsel %vm12328_vm14, %v8676_v57, %v3409_v4  ;;  %v3413_v54 = vsel %vm12328_vm14, %v3411_v13, %v3412_v60 }
 0x176   :  { %10194 = vmatmul.mubr.msk.f32.gmra.mrb[10].mxu1 %vm686_vm12, %v13543_v43  ;;  %11212 = vmatprep.subr.bf16.mxu0 %v11211_v51  ;;  %v13573_v48 = vcombine.low %v17255_v14, %v17254_v25  ;;  %v1453_v14 = vsel %vm12328_vm14, %v1451_v23, %v1452_v12  ;;  %v1450_v25 = vsel %vm12328_vm14, %v8498_v47, %v1449_v33  ;;  %v3044_v23 = vld [vmem:[%s16699_s3 + $0x2c8] sm:$0xff]  ;;  %v8677_v47 = vrot.slane %v13549_v22, 11  ;;  %v17260_v13 = vld [vmem:[#allocation77_spill] sm:$0xff] }
 0x177   :  { %10196 = vmatprep.mubr.msk.f32.mxu1 %vm686_vm12, %v13555_v59  ;;  %11306 = vmatpush3.bf16.msra.mxu1 %v11303_v15  ;;  %v3419_v15 = vrot.slane %v13537_v9, 7  ;;  %v13608_v33 = vpack.c.bf16 %v1938_v17, %v1937_v27  ;;  %v3418_v12 = vrot.slane %v3416_v5, 4  ;;  %v13615_v9 = vmax.f32 %v333_v6, 0.0  ;;  %v17299_v10 = vld [vmem:[#allocation81_spill] sm:$0xff] }
 0x178   :  { %9957 = vmatmul.mubr.msk.f32.gmra.mrb[40].mxu0 %vm686_vm12, %v13259_v40  ;;  %11308 = vmatprep.subr.bf16.mxu1 %v11307_v21  ;;  %v3043_v40 = vld [vmem:[%s16699_s3 + $0x2c0] sm:$0xff]  ;;  %v1519_v18 = vcombine.low %v1450_v25, %v1453_v14  ;;  %v13621_v4 = vcombine.low %v17260_v13, %v17221_v53  ;;  %v13632_v27 = vcombine.low %v12671_v39, %v17218_v62  ;;  %v17269_v25 = vld [vmem:[#allocation8_spill] sm:$0xff]  ;;  %v17290_v14 = vld [vmem:[#allocation7_spill] sm:$0xff] }
 0x179   :  { %9959 = vmatprep.mubr.msk.f32.mxu0 %vm686_vm12, %v13300_v35  ;;  %11214 = vmatpush3.bf16.msra.mxu0 %v11211_v51  ;;  %v13610_v51 = vcombine.low %v3410_v44, %v3413_v54  ;;  %v13613_v35 = vmax.f32 %v338_v34, 0.0  ;;  %17259 = vst [vmem:[#allocation54_spill] sm:$0xff] %v13615_v9  ;;  %v11315_v60 = vpack.c.bf16 %v3044_v23, %v3043_v40  ;;  %v1940_v44 = vld [vmem:[%s16699_s3 + $0x158] sm:$0xff] }
 0x17a   :  { %10197 = vmatmul.mubr.msk.f32.gmra.mrb[12].mxu1 %vm686_vm12, %v13573_v48  ;;  %11216 = vmatprep.subr.bf16.mxu0 %v11215_v50  ;;  %v3417_v34 = vsel %vm12328_vm14, %v8677_v47, %v3416_v5  ;;  %v3420_v6 = vsel %vm12328_vm14, %v3418_v12, %v3419_v15  ;;  %v13653_v39 = vcombine.low %v17155_v29, %v17226_v58  ;;  %v17268_v5 = vld [vmem:[#allocation63_spill] sm:$0xff]  ;;  %v3046_v47 = vld [vmem:[%s16699_s3 + $0x2d8] sm:$0xff] }
 0x17b   :  { %17258 = vst [vmem:[#allocation53_spill] sm:$0xff] %v13613_v35  ;;  %10199 = vmatprep.mubr.msk.f32.mxu1 %vm686_vm12, %v13577_v41  ;;  %11310 = vmatpush3.bf16.msra.mxu1 %v11307_v21  ;;  %v13634_v17 = vcombine.low %v3417_v34, %v3420_v6  ;;  %v13641_v40 = vcombine.high %v13613_v35, %v13613_v35  ;;  %v17270_v34 = vld [vmem:[#allocation82_spill] sm:$0xff]  ;;  %v1942_v6 = vld [vmem:[%s16699_s3 + $0x168] sm:$0xff] }
 0x17c   :  { %9960 = vmatmul.mubr.msk.f32.gmra.mrb[42].mxu0 %vm686_vm12, %v13311_v8  ;;  %11312 = vmatprep.subr.bf16.mxu1 %v11311_v46  ;;  %v13645_v21 = vcombine.high %v13615_v9, %v13615_v9  ;;  %v13659_v62 = vcombine.low %v17158_v2, %v17227_v32  ;;  %v13672_v58 = vcombine.low %v12739_v28, %v17234_v52  ;;  %v17263_v2 = vld [vmem:[#allocation59_spill] sm:$0xff]  ;;  %v3239_v9 = vld [vmem:[%s16699_s3 + $0x338] sm:$0xff] }
 0x17d   :  { %9962 = vmatprep.mubr.msk.f32.mxu0 %vm686_vm12, %v1519_v18  ;;  %11218 = vmatpush3.bf16.msra.mxu0 %v11215_v50  ;;  %17261 = vst [vmem:[#allocation42_spill] sm:$0xff] %v13641_v40  ;;  %v5243_v18 = vrot.slane %v13613_v35, 7  ;;  %v5246_v29 = vrot.slane %v13641_v40, 7  ;;  %v13678_v32 = vcombine.low %v17263_v2, %v17233_v38  ;;  %v17266_v38 = vld [vmem:[#allocation61_spill] sm:$0xff]  ;;  %v1728_v23 = vcombine.low %v17269_v25, %v17194_v56  ;;  %v3045_v56 = vld [vmem:[%s16699_s3 + $0x2d0] sm:$0xff]  ;;  %v17271_v2 = vld [vmem:[#allocation83_spill] sm:$0xff] }
 0x17e   :  { %10200 = vmatmul.mubr.msk.f32.gmra.mrb[14].mxu1 %vm686_vm12, %v13621_v4  ;;  %11220 = vmatprep.subr.bf16.mxu0 %v13608_v33  ;;  %17262 = vst [vmem:[#allocation62_spill] sm:$0xff] %v13645_v21  ;;  %v13696_v52 = vcombine.low %v17266_v38, %v17237_v1  ;;  %v1939_v1 = vld [vmem:[%s16699_s3 + $0x150] sm:$0xff]  ;;  %v13722_v54 = vcombine.low %v17240_v0, %v12826_v37  ;;  %v1941_v37 = vld [vmem:[%s16699_s3 + $0x160] sm:$0xff]  ;;  %v1944_v38 = vld [vmem:[%s16699_s3 + $0x178] sm:$0xff] }
 0x17f   :  { %10202 = vmatprep.mubr.msk.f32.mxu1 %vm686_vm12, %v13632_v27  ;;  %11314 = vmatpush3.bf16.msra.mxu1 %v11311_v46  ;;  %v5245_v57 = vrot.slane %v5243_v18, 4  ;;  %v17267_v46 = vld [vmem:[#allocation68_spill] sm:$0xff]  ;;  %v11223_v12 = vpack.c.bf16 %v1940_v44, %v1939_v1  ;;  %v17273_v25 = vld [vmem:[#allocation87_spill] sm:$0xff] }
 0x180   :  { %9963 = vmatmul.mubr.msk.f32.gmra.mrb[44].mxu0 %vm686_vm12, %v13356_v36  ;;  %11316 = vmatprep.subr.bf16.mxu1 %v11315_v60  ;;  %v8848_v36 = vrot.slane %v13645_v21, 11  ;;  %v13704_v15 = vcombine.low %v17268_v5, %v17267_v46  ;;  %v3050_v5 = vld [vmem:[%s16699_s3 + $0x2f8] sm:$0xff]  ;;  %v17274_v1 = vld [vmem:[#allocation48_spill] sm:$0xff]  ;;  %v17275_v44 = vld [vmem:[#allocation67_spill] sm:$0xff] }
 0x181   :  { %9965 = vmatprep.mubr.msk.f32.mxu0 %vm686_vm12, %v13394_v16  ;;  %v13690_v28 = vsel %vm12328_vm14, %v5245_v57, %v5246_v29  ;;  %v3048_v29 = vld [vmem:[%s16699_s3 + $0x2e8] sm:$0xff]  ;;  %v11227_v57 = vpack.c.bf16 %v1942_v6, %v1941_v37  ;;  %v3232_v6 = vld [vmem:[%s16699_s3 + $0x300] sm:$0xff]  ;;  %v17295_v21 = vld [vmem:[#allocation20_spill] sm:$0xff] }
 0x182   :  { %10203 = vmatmul.mubr.msk.f32.gmra.mrb[0].mxu1 %vm686_vm12, %v13653_v39  ;;  %v13682_v50 = vsel %vm12328_vm14, %v8848_v36, %v5243_v18  ;;  %17265 = vst [vmem:[#allocation56_spill] sm:$0xff] %v13690_v28  ;;  %v11319_v36 = vpack.c.bf16 %v3046_v47, %v3045_v56  ;;  %v3047_v18 = vld [vmem:[%s16699_s3 + $0x2e0] sm:$0xff]  ;;  %v418_v56 = vadd.f32 %v13450_v45, %v17275_v44  ;;  %v17285_v44 = vld [vmem:[#allocation13_spill] sm:$0xff]  ;;  %v17296_v35 = vld [vmem:[#allocation24_spill] sm:$0xff] }
 0x183   :  { %10205 = vmatprep.mubr.msk.f32.mxu1 %vm686_vm12, %v13659_v62  ;;  %17264 = vst [vmem:[#allocation57_spill] sm:$0xff] %v13682_v50  ;;  %v11323_v46 = vpack.c.bf16 %v3048_v29, %v3047_v18  ;;  %v17277_v18 = vld [vmem:[#allocation51_spill] sm:$0xff]  ;;  %v1736_v29 = vcombine.low %v17169_v11, %v17211_v30  ;;  %v17281_v30 = vld [vmem:[#allocation40_spill] sm:$0xff] }
 0x184   :  { %9966 = vmatmul.mubr.msk.f32.gmra.mrb[46].mxu0 %vm686_vm12, %v13400_v63  ;;  %v17280_v11 = vld [vmem:[#allocation3_spill] sm:$0xff] }
 0x185   :  { %9968 = vmatprep.mubr.msk.f32.mxu0 %vm686_vm12, %v13416_v7 }
 0x186   :  { %10206 = vmatmul.mubr.msk.f32.gmra.mrb[2].mxu1 %vm686_vm12, %v13672_v58 }
 0x187   :  { %10208 = vmatprep.mubr.msk.f32.mxu1 %vm686_vm12, %v13678_v32 }
 0x188   :  { %9969 = vmatmul.mubr.msk.f32.gmra.mrb[48].mxu0 %vm686_vm12, %v13423_v55 }
 0x189   :  { %9971 = vmatprep.mubr.msk.f32.mxu0 %vm686_vm12, %v13440_v26 }
 0x18a   :  { %10209 = vmatmul.mubr.msk.f32.gmra.mrb[4].mxu1 %vm686_vm12, %v13696_v52 }
 0x18b   :  { %10211 = vmatprep.mubr.msk.f32.mxu1 %vm686_vm12, %v13704_v15 }
 0x18c   :  { %9972 = vmatmul.mubr.msk.f32.gmra.mrb[50].mxu0 %vm686_vm12, %v13382_v3 }
 0x18d   :  { %9990 = vmatprep.mubr.msk.f32.mxu0 %vm686_vm12, %v1728_v23 }
 0x18e   :  { %10212 = vmatmul.mubr.msk.f32.gmra.mrb[6].mxu1 %vm686_vm12, %v13722_v54 }
 0x18f   :  { %10230 = vmatprep.mubr.msk.f32.mxu1 %vm686_vm12, %v17270_v34 }
 0x190   :  { %9991 = vmatmul.mubr.msk.f32.vlgmr.msra.gmra.mrb[36].mxu0 %vm686_vm12, %v13477_v42  ;;  %v17272_v42 = vld [vmem:[#allocation85_spill] sm:$0xff] }
 0x191   :  { %9993 = vmatprep.mubr.msk.f32.mxu0 %vm686_vm12, %v17248_v61  ;;  %11222 = vmatpush3.bf16.msra.mxu0 %v13608_v33  ;;  %v1943_v33 = vld [vmem:[%s16699_s3 + $0x170] sm:$0xff] }
 0x192   :  { %10231 = vmatmul.mubr.msk.f32.vlgmr.msra.gmra.mrb[8].mxu1 %vm686_vm12, %v17271_v2  ;;  %11224 = vmatprep.subr.bf16.mxu0 %v11223_v12  ;;  %v11231_v23 = vpack.c.bf16 %v1944_v38, %v1943_v33  ;;  %v13804_v33 = vcombine.low %v13522_v20, %v13485_v19 }
 0x193   :  { %11318 = vmatpush3.bf16.msra.mxu1 %v11315_v60  ;;  %10233 = vmatprep.mubr.msk.f32.mxu1 %vm686_vm12, %v17272_v42  ;;  %v3049_v60 = vld [vmem:[%s16699_s3 + $0x2f0] sm:$0xff] }
 0x194   :  { %9994 = vmatmul.mubr.msk.f32.gmra.mrb[38].mxu0 %vm686_vm12, %v13506_v24  ;;  %11320 = vmatprep.subr.bf16.mxu1 %v11319_v36  ;;  %v11327_v47 = vpack.c.bf16 %v3050_v5, %v3049_v60  ;;  %17279 = vst [vmem:[#allocation55_spill] sm:$0xff] %v13804_v33  ;;  %v17283_v60 = vld [vmem:[#allocation75_spill] sm:$0xff] }
 0x195   :  { %9996 = vmatprep.mubr.msk.f32.mxu0 %vm686_vm12, %v13543_v43  ;;  %11226 = vmatpush3.bf16.msra.mxu0 %v11223_v12  ;;  %v17276_v12 = vld [vmem:[#allocation73_spill] sm:$0xff]  ;;  %v423_v5 = vadd.f32 %v13450_v45, %v17283_v60  ;;  %v13844_v60 = vcombine.low %v12828_v31, %v17240_v0  ;;  %v13863_v31 = vcombine.low %v13549_v22, %v13497_v49 }
 0x196   :  { %10234 = vmatmul.mubr.msk.f32.gmra.mrb[10].mxu1 %vm686_vm12, %v17273_v25  ;;  %11228 = vmatprep.subr.bf16.mxu0 %v11227_v57  ;;  %v13784_v37 = vcombine.low %v17276_v12, %v17260_v13 }
 0x197   :  { %10236 = vmatprep.mubr.msk.f32.mxu1 %vm686_vm12, %v17274_v1  ;;  %11322 = vmatpush3.bf16.msra.mxu1 %v11319_v36  ;;  %v3233_v36 = vld [vmem:[%s16699_s3 + $0x308] sm:$0xff]  ;;  %17289 = vst [vmem:[#allocation26_spill] sm:$0xff] %v13844_v60  ;;  %17292 = vst [vmem:[#allocation9_spill] sm:$0xff] %v13863_v31 }
 0x198   :  { %9997 = vmatmul.mubr.msk.f32.gmra.mrb[40].mxu0 %vm686_vm12, %v13555_v59  ;;  %11324 = vmatprep.subr.bf16.mxu1 %v11323_v46  ;;  %v11331_v38 = vpack.c.bf16 %v3233_v36, %v3232_v6  ;;  %v17288_v6 = vld [vmem:[#allocation89_spill] sm:$0xff] }
 0x199   :  { %9999 = vmatprep.mubr.msk.f32.mxu0 %vm686_vm12, %v13573_v48  ;;  %11230 = vmatpush3.bf16.msra.mxu0 %v11227_v57  ;;  %v13798_v57 = vmax.f32 %v418_v56, 0.0 }
 0x19a   :  { %10237 = vmatmul.mubr.msk.f32.gmra.mrb[12].mxu1 %vm686_vm12, %v17277_v18  ;;  %11232 = vmatprep.subr.bf16.mxu0 %v11231_v23 }
 0x19b   :  { %10239 = vmatprep.mubr.msk.f32.mxu1 %vm686_vm12, %v13784_v37  ;;  %11326 = vmatpush3.bf16.msra.mxu1 %v11323_v46  ;;  %17278 = vst [vmem:[#allocation64_spill] sm:$0xff] %v13798_v57  ;;  %v13814_v46 = vcombine.high %v13798_v57, %v13798_v57  ;;  %v8763_v36 = vrot.slane %v13798_v57, 11  ;;  %v17300_v57 = vld [vmem:[#allocation32_spill] sm:$0xff] }
 0x19c   :  { %10000 = vmatmul.mubr.msk.f32.gmra.mrb[42].mxu0 %vm686_vm12, %v13577_v41  ;;  %11328 = vmatprep.subr.bf16.mxu1 %v11327_v47 }
 0x19d   :  { %10002 = vmatprep.mubr.msk.f32.mxu0 %vm686_vm12, %v1736_v29  ;;  %11234 = vmatpush3.bf16.msra.mxu0 %v11231_v23  ;;  %17282 = vst [vmem:[#allocation70_spill] sm:$0xff] %v13814_v46  ;;  %v17284_v23 = vld [vmem:[#allocation16_spill] sm:$0xff]  ;;  %v4333_v56 = vrot.slane %v13814_v46, 7 }
 0x19e   :  { %10240 = vmatmul.mubr.msk.f32.gmra.mrb[14].mxu1 %vm686_vm12, %v13804_v33  ;;  %11236 = vmatprep.subr.bf16.mxu0 %v17280_v11 }
 0x19f   :  { %10242 = vmatprep.mubr.msk.f32.mxu1 %vm686_vm12, %v17281_v30  ;;  %11330 = vmatpush3.bf16.msra.mxu1 %v11327_v47  ;;  %v17287_v47 = vld [vmem:[#allocation46_spill] sm:$0xff]  ;;  %v4335_v29 = vrot.slane %v4333_v56, 4  ;;  %v4334_v28 = vsel %vm12328_vm14, %v8763_v36, %v4333_v56  ;;  %v17294_v56 = vld [vmem:[#allocation79_spill] sm:$0xff]  ;;  %v3234_v36 = vld [vmem:[%s16699_s3 + $0x310] sm:$0xff] }
 0x1a0   :  { %10003 = vmatmul.mubr.msk.f32.gmra.mrb[44].mxu0 %vm686_vm12, %v13632_v27  ;;  %11332 = vmatprep.subr.bf16.mxu1 %v11331_v38  ;;  %v13831_v27 = vmax.f32 %v423_v5, 0.0 }
 0x1a1   :  { %10005 = vmatprep.mubr.msk.f32.mxu0 %vm686_vm12, %v13653_v39 }
 0x1a2   :  { %10243 = vmatmul.mubr.msk.f32.gmra.mrb[0].mxu1 %vm686_vm12, %v17284_v23  ;;  %17286 = vst [vmem:[#allocation60_spill] sm:$0xff] %v13831_v27  ;;  %v4336_v5 = vrot.slane %v13831_v27, 7  ;;  %v13853_v50 = vcombine.low %v13814_v46, %v13831_v27  ;;  %v3034_v27 = vrot.slane %v17299_v10, 5  ;;  %v17302_v46 = vld [vmem:[#allocation5_spill] sm:$0xff] }
 0x1a3   :  { %10245 = vmatprep.mubr.msk.f32.mxu1 %vm686_vm12, %v17285_v44 }
 0x1a4   :  { %10006 = vmatmul.mubr.msk.f32.gmra.mrb[46].mxu0 %vm686_vm12, %v13659_v62  ;;  %17291 = vst [vmem:[#allocation69_spill] sm:$0xff] %v13853_v50  ;;  %v4337_v40 = vsel %vm12328_vm14, %v4335_v29, %v4336_v5  ;;  %v3235_v29 = vld [vmem:[%s16699_s3 + $0x318] sm:$0xff]  ;;  %v2114_v5 = vrot.slane %v17260_v13, 5  ;;  %v3237_v13 = vld [vmem:[%s16699_s3 + $0x328] sm:$0xff] }
 0x1a5   :  { %10008 = vmatprep.mubr.msk.f32.mxu0 %vm686_vm12, %v13672_v58  ;;  %v13865_v0 = vcombine.low %v4334_v28, %v4337_v40  ;;  %v11335_v40 = vpack.c.bf16 %v3235_v29, %v3234_v36  ;;  %v3031_v28 = vrot.slane %v13485_v19, 5  ;;  %v17297_v36 = vld [vmem:[#allocation4_spill] sm:$0xff]  ;;  %v17298_v29 = vld [vmem:[#allocation30_spill] sm:$0xff] }
 0x1a6   :  { %10246 = vmatmul.mubr.msk.f32.gmra.mrb[2].mxu1 %vm686_vm12, %v17287_v47 }
 0x1a7   :  { %10248 = vmatprep.mubr.msk.f32.mxu1 %vm686_vm12, %v17288_v6  ;;  %17293 = vst [vmem:[#allocation15_spill] sm:$0xff] %v13865_v0  ;;  %v3033_v0 = vrot.slane %v3031_v28, 4 }
 0x1a8   :  { %10009 = vmatmul.mubr.msk.f32.gmra.mrb[48].mxu0 %vm686_vm12, %v13678_v32 }
 0x1a9   :  { %10011 = vmatprep.mubr.msk.f32.mxu0 %vm686_vm12, %v13696_v52 }
 0x1aa   :  { %10249 = vmatmul.mubr.msk.f32.gmra.mrb[4].mxu1 %vm686_vm12, %v17290_v14 }
 0x1ab   :  { %10251 = vmatprep.mubr.msk.f32.mxu1 %vm686_vm12, %v13844_v60 }
 0x1ac   :  { %10012 = vmatmul.mubr.msk.f32.gmra.mrb[50].mxu0 %vm686_vm12, %v13704_v15 }
 0x1ad   :  { %10030 = vmatprep.mubr.msk.f32.mxu0 %vm686_vm12, %v17294_v56  ;;  %v3236_v56 = vld [vmem:[%s16699_s3 + $0x320] sm:$0xff] }
 0x1ae   :  { %10252 = vmatmul.mubr.msk.f32.gmra.mrb[6].mxu1 %vm686_vm12, %v13863_v31  ;;  %v11339_v50 = vpack.c.bf16 %v3237_v13, %v3236_v56  ;;  %v17303_v31 = vld [vmem:[#allocation33_spill] sm:$0xff] }
 0x1af   :  { %10270 = vmatprep.mubr.msk.f32.mxu1 %vm686_vm12, %v17295_v21 }
 0x1b0   :  { %10031 = vmatmul.mubr.msk.f32.vlgmr.msra.gmra.mrb[36].mxu0 %vm686_vm12, %v17270_v34  ;;  %v2116_v34 = vrot.slane %v2114_v5, 4 }
 0x1b1   :  { %10033 = vmatprep.mubr.msk.f32.mxu0 %vm686_vm12, %v17271_v2  ;;  %11238 = vmatpush3.bf16.msra.mxu0 %v17280_v11  ;;  %v2117_v11 = vrot.slane %v17221_v53, 5  ;;  %v8554_v53 = vrot.slane %v17276_v12, 9 }
 0x1b2   :  { %10271 = vmatmul.mubr.msk.f32.vlgmr.msra.gmra.mrb[8].mxu1 %vm686_vm12, %v17296_v35  ;;  %11240 = vmatprep.subr.bf16.mxu0 %v17297_v36 }
 0x1b3   :  { %11334 = vmatpush3.bf16.msra.mxu1 %v11331_v38  ;;  %10273 = vmatprep.mubr.msk.f32.mxu1 %vm686_vm12, %v17298_v29  ;;  %v3238_v38 = vld [vmem:[%s16699_s3 + $0x330] sm:$0xff]  ;;  %v2118_v13 = vsel %vm12322_vm13, %v2116_v34, %v2117_v11  ;;  %v8640_v34 = vrot.slane %v13522_v20, 9  ;;  %v3035_v11 = vsel %vm12322_vm13, %v3033_v0, %v3034_v27 }
 0x1b4   :  { %10034 = vmatmul.mubr.msk.f32.gmra.mrb[38].mxu0 %vm686_vm12, %v17272_v42  ;;  %11336 = vmatprep.subr.bf16.mxu1 %v11335_v40  ;;  %v11343_v33 = vpack.c.bf16 %v3239_v9, %v3238_v38  ;;  %v3422_v9 = vld [vmem:[%s16699_s3 + $0x348] sm:$0xff]  ;;  %v17306_v38 = vld [vmem:[#allocation6_spill] sm:$0xff] }
 0x1b5   :  { %10036 = vmatprep.mubr.msk.f32.mxu0 %vm686_vm12, %v17273_v25  ;;  %11242 = vmatpush3.bf16.msra.mxu0 %v17297_v36  ;;  %v2115_v36 = vsel %vm12322_vm13, %v8554_v53, %v2114_v5  ;;  %v17305_v5 = vld [vmem:[#allocation36_spill] sm:$0xff]  ;;  %v3032_v27 = vsel %vm12322_vm13, %v8640_v34, %v3031_v28  ;;  %v17308_v53 = vld [vmem:[#allocation41_spill] sm:$0xff] }
 0x1b6   :  { %10274 = vmatmul.mubr.msk.f32.gmra.mrb[10].mxu1 %vm686_vm12, %v17300_v57  ;;  %11244 = vmatprep.subr.bf16.mxu0 %v17302_v46  ;;  %v13924_v12 = vcombine.low %v2115_v36, %v2118_v13  ;;  %v17309_v13 = vld [vmem:[#allocation58_spill] sm:$0xff]  ;;  %v17310_v28 = vld [vmem:[#allocation65_spill] sm:$0xff] }
 0x1b7   :  { %10276 = vmatprep.mubr.msk.f32.mxu1 %vm686_vm12, %v17303_v31  ;;  %11338 = vmatpush3.bf16.msra.mxu1 %v11335_v40  ;;  %v3421_v40 = vld [vmem:[%s16699_s3 + $0x340] sm:$0xff] }
 0x1b8   :  { %10037 = vmatmul.mubr.msk.f32.gmra.mrb[40].mxu0 %vm686_vm12, %v17274_v1  ;;  %11340 = vmatprep.subr.bf16.mxu1 %v11339_v50  ;;  %17304 = vst [vmem:[#allocation29_spill] sm:$0xff] %v13924_v12  ;;  %v11347_v0 = vpack.c.bf16 %v3422_v9, %v3421_v40  ;;  %v17311_v36 = vld [vmem:[#allocation66_spill] sm:$0xff]  ;;  %v17314_v40 = vld [vmem:[#allocation72_spill] sm:$0xff]  ;;  %v8641_v9 = vrot.slane %v13549_v22, 9 }
 0x1b9   :  { %10039 = vmatprep.mubr.msk.f32.mxu0 %vm686_vm12, %v17277_v18  ;;  %11246 = vmatpush3.bf16.msra.mxu0 %v17302_v46  ;;  %v13945_v46 = vcombine.low %v3032_v27, %v3035_v11  ;;  %v17313_v11 = vld [vmem:[#allocation71_spill] sm:$0xff]  ;;  %v17315_v27 = vld [vmem:[#allocation76_spill] sm:$0xff] }
 0x1ba   :  { %10277 = vmatmul.mubr.msk.f32.gmra.mrb[12].mxu1 %vm686_vm12, %v17305_v5  ;;  %11248 = vmatprep.subr.bf16.mxu0 %v17306_v38 }
 0x1bb   :  { %10279 = vmatprep.mubr.msk.f32.mxu1 %vm686_vm12, %v13924_v12  ;;  %11342 = vmatpush3.bf16.msra.mxu1 %v11339_v50  ;;  %17307 = vst [vmem:[#allocation19_spill] sm:$0xff] %v13945_v46  ;;  %v3038_v50 = vrot.slane %v13497_v49, 5 }
 0x1bc   :  { %10040 = vmatmul.mubr.msk.f32.gmra.mrb[42].mxu0 %vm686_vm12, %v13784_v37  ;;  %11344 = vmatprep.subr.bf16.mxu1 %v11343_v33 }
 0x1bd   :  { %10042 = vmatprep.mubr.msk.f32.mxu0 %vm686_vm12, %v17308_v53  ;;  %11250 = vmatpush3.bf16.msra.mxu0 %v17306_v38  ;;  %v17316_v53 = vld [vmem:[#allocation78_spill] sm:$0xff] }
 0x1be   :  { %10280 = vmatmul.mubr.msk.f32.gmra.mrb[14].mxu1 %vm686_vm12, %v13945_v46 }
 0x1bf   :  { %10282 = vmatprep.mubr.msk.f32.mxu1 %vm686_vm12, %v17309_v13  ;;  %11346 = vmatpush3.bf16.msra.mxu1 %v11343_v33  ;;  %v3040_v33 = vrot.slane %v3038_v50, 4  ;;  %v3039_v13 = vsel %vm12322_vm13, %v8641_v9, %v3038_v50  ;;  %v17319_v50 = vld [vmem:[#allocation37_spill] sm:$0xff] }
 0x1c0   :  { %10043 = vmatmul.mubr.msk.f32.gmra.mrb[44].mxu0 %vm686_vm12, %v17281_v30  ;;  %11348 = vmatprep.subr.bf16.mxu1 %v11347_v0  ;;  %v17312_v30 = vld [vmem:[#allocation49_spill] sm:$0xff] }
 0x1c1   :  { %10045 = vmatprep.mubr.msk.f32.mxu0 %vm686_vm12, %v17284_v23  ;;  %v3041_v34 = vrot.slane %v17312_v30, 5 }
 0x1c2   :  { %10283 = vmatmul.mubr.msk.f32.gmra.mrb[0].mxu1 %vm686_vm12, %v17310_v28 }
 0x1c3   :  { %10285 = vmatprep.mubr.msk.f32.mxu1 %vm686_vm12, %v17311_v36  ;;  %v3042_v38 = vsel %vm12322_vm13, %v3040_v33, %v3041_v34  ;;  %v3423_v33 = vld [vmem:[%s16699_s3 + $0x350] sm:$0xff]  ;;  %v3424_v34 = vld [vmem:[%s16699_s3 + $0x358] sm:$0xff] }
 0x1c4   :  { %10046 = vmatmul.mubr.msk.f32.gmra.mrb[46].mxu0 %vm686_vm12, %v17285_v44  ;;  %v11351_v9 = vpack.c.bf16 %v3424_v34, %v3423_v33  ;;  %v3223_v34 = vrot.slane %v17299_v10, 6 }
 0x1c5   :  { %10048 = vmatprep.mubr.msk.f32.mxu0 %vm686_vm12, %v17287_v47 }
 0x1c6   :  { %10286 = vmatmul.mubr.msk.f32.gmra.mrb[2].mxu1 %vm686_vm12, %v17313_v11  ;;  %v17318_v11 = vld [vmem:[#allocation17_spill] sm:$0xff] }
 0x1c7   :  { %10288 = vmatprep.mubr.msk.f32.mxu1 %vm686_vm12, %v17314_v40  ;;  %v13987_v40 = vcombine.low %v3039_v13, %v3042_v38  ;;  %v3425_v38 = vld [vmem:[%s16699_s3 + $0x360] sm:$0xff]  ;;  %v3426_v13 = vld [vmem:[%s16699_s3 + $0x368] sm:$0xff] }
 0x1c8   :  { %10049 = vmatmul.mubr.msk.f32.gmra.mrb[48].mxu0 %vm686_vm12, %v17288_v6 }
 0x1c9   :  { %10051 = vmatprep.mubr.msk.f32.mxu0 %vm686_vm12, %v17290_v14  ;;  %17317 = vst [vmem:[#allocation31_spill] sm:$0xff] %v13987_v40 }
 0x1ca   :  { %10289 = vmatmul.mubr.msk.f32.gmra.mrb[4].mxu1 %vm686_vm12, %v17315_v27 }
 0x1cb   :  { %10291 = vmatprep.mubr.msk.f32.mxu1 %vm686_vm12, %v17316_v53  ;;  %v3427_v53 = vld [vmem:[%s16699_s3 + $0x370] sm:$0xff] }
 0x1cc   :  { %10052 = vmatmul.mubr.msk.f32.gmra.mrb[50].mxu0 %vm686_vm12, %v13844_v60 }
 0x1cd   :  { %10070 = vmatprep.mubr.msk.f32.mxu0 %vm686_vm12, %v17318_v11  ;;  %v3220_v11 = vrot.slane %v13485_v19, 6 }
 0x1ce   :  { %10292 = vmatmul.mubr.msk.f32.gmra.mrb[6].mxu1 %vm686_vm12, %v13987_v40  ;;  %v17320_v40 = vld [vmem:[#allocation84_spill] sm:$0xff] }
 0x1cf   :  { %10310 = vmatprep.mubr.msk.f32.mxu1 %vm686_vm12, %v17319_v50  ;;  %v17321_v50 = vld [vmem:[#allocation86_spill] sm:$0xff]  ;;  %v3222_v33 = vrot.slane %v3220_v11, 4 }
 0x1d0   :  { %10071 = vmatmul.mubr.msk.f32.vlgmr.msra.gmra.mrb[36].mxu0 %vm686_vm12, %v17295_v21  ;;  %v11355_v21 = vpack.c.bf16 %v3426_v13, %v3425_v38  ;;  %v8658_v13 = vrot.slane %v13522_v20, 10 }
 0x1d1   :  { %10073 = vmatprep.mubr.msk.f32.mxu0 %vm686_vm12, %v17296_v35  ;;  %v3224_v36 = vsel %vm12356_vm15, %v3222_v33, %v3223_v34 }
 0x1d2   :  { %10311 = vmatmul.mubr.msk.f32.vlgmr.msra.gmra.mrb[8].mxu1 %vm686_vm12, %v17320_v40  ;;  %v17323_v40 = vld [vmem:[#allocation52_spill] sm:$0xff]  ;;  %v3221_v20 = vsel %vm12356_vm15, %v8658_v13, %v3220_v11  ;;  %v17329_v11 = vld [vmem:[#allocation90_spill] sm:$0xff] }
 0x1d3   :  { %11350 = vmatpush3.bf16.msra.mxu1 %v11347_v0  ;;  %10313 = vmatprep.mubr.msk.f32.mxu1 %vm686_vm12, %v17321_v50  ;;  %v3428_v0 = vld [vmem:[%s16699_s3 + $0x378] sm:$0xff]  ;;  %v17322_v50 = vld [vmem:[#allocation88_spill] sm:$0xff]  ;;  %v14052_v33 = vcombine.low %v3221_v20, %v3224_v36  ;;  %v17331_v13 = vld [vmem:[#allocation10_spill] sm:$0xff] }
 0x1d4   :  { %10074 = vmatmul.mubr.msk.f32.gmra.mrb[38].mxu0 %vm686_vm12, %v17298_v29  ;;  %11352 = vmatprep.subr.bf16.mxu1 %v11351_v9  ;;  %v11359_v38 = vpack.c.bf16 %v3428_v0, %v3427_v53  ;;  %v17326_v53 = vld [vmem:[#allocation35_spill] sm:$0xff]  ;;  %v17327_v0 = vld [vmem:[#allocation34_spill] sm:$0xff]  ;;  %v17332_v20 = vld [vmem:[#allocation92_spill] sm:$0xff] }
 0x1d5   :  { %10076 = vmatprep.mubr.msk.f32.mxu0 %vm686_vm12, %v17300_v57 }
 0x1d6   :  { %10314 = vmatmul.mubr.msk.f32.gmra.mrb[10].mxu1 %vm686_vm12, %v17322_v50  ;;  %v3596_v50 = vld [vmem:[%s16699_s3 + $0x380] sm:$0xff] }
 0x1d7   :  { %10316 = vmatprep.mubr.msk.f32.mxu1 %vm686_vm12, %v17323_v40  ;;  %11354 = vmatpush3.bf16.msra.mxu1 %v11351_v9  ;;  %v3597_v9 = vld [vmem:[%s16699_s3 + $0x388] sm:$0xff]  ;;  %v17325_v40 = vld [vmem:[#allocation38_spill] sm:$0xff] }
 0x1d8   :  { %10077 = vmatmul.mubr.msk.f32.gmra.mrb[40].mxu0 %vm686_vm12, %v17303_v31  ;;  %11356 = vmatprep.subr.bf16.mxu1 %v11355_v21  ;;  %v11363_v34 = vpack.c.bf16 %v3597_v9, %v3596_v50  ;;  %v17330_v50 = vld [vmem:[#allocation91_spill] sm:$0xff] }
 0x1d9   :  { %10079 = vmatprep.mubr.msk.f32.mxu0 %vm686_vm12, %v17305_v5 }
 0x1da   :  { %10317 = vmatmul.mubr.msk.f32.gmra.mrb[12].mxu1 %vm686_vm12, %v17325_v40  ;;  %v17328_v40 = vld [vmem:[#allocation43_spill] sm:$0xff] }
 0x1db   :  { %10319 = vmatprep.mubr.msk.f32.mxu1 %vm686_vm12, %v17326_v53  ;;  %11358 = vmatpush3.bf16.msra.mxu1 %v11355_v21  ;;  %v3227_v53 = vrot.slane %v13497_v49, 6  ;;  %v3230_v21 = vrot.slane %v17312_v30, 6 }
 0x1dc   :  { %10080 = vmatmul.mubr.msk.f32.gmra.mrb[42].mxu0 %vm686_vm12, %v13924_v12  ;;  %11360 = vmatprep.subr.bf16.mxu1 %v11359_v38 }
 0x1dd   :  { %v3229_v36 = vrot.slane %v3227_v53, 4 }
 0x1de   :  { %10320 = vmatmul.mubr.msk.f32.gmra.mrb[14].mxu1 %vm686_vm12, %v14052_v33 }
 0x1df   :  { %10322 = vmatprep.mubr.msk.f32.mxu1 %vm686_vm12, %v17327_v0  ;;  %11362 = vmatpush3.bf16.msra.mxu1 %v11359_v38  ;;  %v8659_v38 = vrot.slane %v13549_v22, 10  ;;  %v3231_v9 = vsel %vm12356_vm15, %v3229_v36, %v3230_v21  ;;  %v17333_v0 = vld [vmem:[#allocation93_spill] sm:$0xff]  ;;  %v17335_v36 = vld [vmem:[#allocation44_spill] sm:$0xff] }
 0x1e0   :  { %11364 = vmatprep.subr.bf16.mxu1 %v11363_v34  ;;  %v3599_v22 = vld [vmem:[%s16699_s3 + $0x398] sm:$0xff] }
 0x1e2   :  { %10323 = vmatmul.mubr.msk.f32.gmra.mrb[0].mxu1 %vm686_vm12, %v17328_v40 }
 0x1e3   :  { %10325 = vmatprep.mubr.msk.f32.mxu1 %vm686_vm12, %v17329_v11  ;;  %v3228_v11 = vsel %vm12356_vm15, %v8659_v38, %v3227_v53  ;;  %v3600_v53 = vld [vmem:[%s16699_s3 + $0x3a0] sm:$0xff]  ;;  %v17336_v38 = vld [vmem:[#allocation27_spill] sm:$0xff] }
 0x1e4   :  { %v14077_v40 = vcombine.low %v3228_v11, %v3231_v9  ;;  %v3601_v11 = vld [vmem:[%s16699_s3 + $0x3a8] sm:$0xff]  ;;  %v17337_v9 = vld [vmem:[#allocation80_spill] sm:$0xff] }
 0x1e6   :  { %10326 = vmatmul.mubr.msk.f32.gmra.mrb[2].mxu1 %vm686_vm12, %v17330_v50  ;;  %17334 = vst [vmem:[#allocation18_spill] sm:$0xff] %v14077_v40 }
 0x1e7   :  { %10328 = vmatprep.mubr.msk.f32.mxu1 %vm686_vm12, %v17331_v13  ;;  %v3598_v13 = vld [vmem:[%s16699_s3 + $0x390] sm:$0xff] }
 0x1e8   :  { %v11367_v21 = vpack.c.bf16 %v3599_v22, %v3598_v13  ;;  %v3602_v13 = vld [vmem:[%s16699_s3 + $0x3b0] sm:$0xff]  ;;  %v3603_v22 = vld [vmem:[%s16699_s3 + $0x3b8] sm:$0xff] }
 0x1ea   :  { %10329 = vmatmul.mubr.msk.f32.gmra.mrb[4].mxu1 %vm686_vm12, %v17332_v20 }
 0x1eb   :  { %10331 = vmatprep.mubr.msk.f32.mxu1 %vm686_vm12, %v17333_v0  ;;  %v17339_v0 = vld [vmem:[#allocation47_spill] sm:$0xff] }
 0x1ee   :  { %10332 = vmatmul.mubr.msk.f32.gmra.mrb[6].mxu1 %vm686_vm12, %v14077_v40  ;;  %v11371_v40 = vpack.c.bf16 %v3601_v11, %v3600_v53  ;;  %v3771_v53 = vld [vmem:[%s16699_s3 + $0x3c0] sm:$0xff]  ;;  %v3772_v11 = vld [vmem:[%s16699_s3 + $0x3c8] sm:$0xff] }
 0x1ef   :  { %10350 = vmatprep.mubr.msk.f32.mxu1 %vm686_vm12, %v17335_v36  ;;  %v17338_v36 = vld [vmem:[#allocation39_spill] sm:$0xff] }
 0x1f2   :  { %10351 = vmatmul.mubr.msk.f32.vlgmr.msra.gmra.mrb[8].mxu1 %vm686_vm12, %v17336_v38 }
 0x1f3   :  { %11366 = vmatpush3.bf16.msra.mxu1 %v11363_v34  ;;  %10353 = vmatprep.mubr.msk.f32.mxu1 %vm686_vm12, %v17337_v9  ;;  %v11375_v34 = vpack.c.bf16 %v3603_v22, %v3602_v13  ;;  %v17340_v9 = vld [vmem:[#allocation45_spill] sm:$0xff]  ;;  %v3775_v22 = vld [vmem:[%s16699_s3 + $0x3e0] sm:$0xff] }
 0x1f4   :  { %11368 = vmatprep.subr.bf16.mxu1 %v11367_v21 }
 0x1f6   :  { %10354 = vmatmul.mubr.msk.f32.gmra.mrb[10].mxu1 %vm686_vm12, %v17338_v36 }
 0x1f7   :  { %10356 = vmatprep.mubr.msk.f32.mxu1 %vm686_vm12, %v17339_v0  ;;  %11370 = vmatpush3.bf16.msra.mxu1 %v11367_v21  ;;  %v11379_v0 = vpack.c.bf16 %v3772_v11, %v3771_v53  ;;  %v3774_v21 = vld [vmem:[%s16699_s3 + $0x3d8] sm:$0xff] }
 0x1f8   :  { %11372 = vmatprep.subr.bf16.mxu1 %v11371_v40  ;;  %v3778_v11 = vld [vmem:[%s16699_s3 + $0x3f8] sm:$0xff] }
 0x1fa   :  { %10357 = vmatmul.mubr.msk.f32.gmra.mrb[12].mxu1 %vm686_vm12, %v13311_v8 }
 0x1fb   :  { %10359 = vmatprep.mubr.msk.f32.mxu1 %vm686_vm12, %v17340_v9  ;;  %11374 = vmatpush3.bf16.msra.mxu1 %v11371_v40  ;;  %v17341_v40 = vld [vmem:[#allocation50_spill] sm:$0xff] }
 0x1fc   :  { %11376 = vmatprep.subr.bf16.mxu1 %v11375_v34 }
 0x1fe   :  { %10360 = vmatmul.mubr.msk.f32.gmra.mrb[14].mxu1 %vm686_vm12, %v13610_v51 }
 0x1ff   :  { %10362 = vmatprep.mubr.msk.f32.mxu1 %vm686_vm12, %v13394_v16  ;;  %11378 = vmatpush3.bf16.msra.mxu1 %v11375_v34  ;;  %v3773_v16 = vld [vmem:[%s16699_s3 + $0x3d0] sm:$0xff]  ;;  %v3776_v34 = vld [vmem:[%s16699_s3 + $0x3e8] sm:$0xff] }
 0x200   :  { %11380 = vmatprep.subr.bf16.mxu1 %v11379_v0  ;;  %v11383_v13 = vpack.c.bf16 %v3774_v21, %v3773_v16  ;;  %v11387_v53 = vpack.c.bf16 %v3776_v34, %v3775_v22  ;;  %v3960_v16 = vld [vmem:[%s16699_s3 + $0x400] sm:$0xff]  ;;  %v3961_v21 = vld [vmem:[%s16699_s3 + $0x408] sm:$0xff]  ;;  %v17342_v34 = vld [vmem:[#allocation25_spill] sm:$0xff] }
 0x201   :  { %v11395_v22 = vpack.c.bf16 %v3961_v21, %v3960_v16  ;;  %v3967_v16 = vld [vmem:[%s16699_s3 + $0x438] sm:$0xff] }
 0x202   :  { %10363 = vmatmul.mubr.msk.f32.gmra.mrb[0].mxu1 %vm686_vm12, %v13400_v63 }
 0x203   :  { %10365 = vmatprep.mubr.msk.f32.mxu1 %vm686_vm12, %v13416_v7 }
 0x206   :  { %10366 = vmatmul.mubr.msk.f32.gmra.mrb[2].mxu1 %vm686_vm12, %v13423_v55 }
 0x207   :  { %10368 = vmatprep.mubr.msk.f32.mxu1 %vm686_vm12, %v13440_v26 }
 0x20a   :  { %10369 = vmatmul.mubr.msk.f32.gmra.mrb[4].mxu1 %vm686_vm12, %v13382_v3 }
 0x20b   :  { %10371 = vmatprep.mubr.msk.f32.mxu1 %vm686_vm12, %v17341_v40 }
 0x20e   :  { %10372 = vmatmul.mubr.msk.f32.gmra.mrb[6].mxu1 %vm686_vm12, %v13634_v17 }
 0x20f   :  { %10390 = vmatprep.mubr.msk.f32.mxu1 %vm686_vm12, %v17248_v61  ;;  %v3777_v61 = vld [vmem:[%s16699_s3 + $0x3f0] sm:$0xff] }
 0x212   :  { %10391 = vmatmul.mubr.msk.f32.vlgmr.msra.gmra.mrb[8].mxu1 %vm686_vm12, %v13506_v24 }
 0x213   :  { %11382 = vmatpush3.bf16.msra.mxu1 %v11379_v0  ;;  %10393 = vmatprep.mubr.msk.f32.mxu1 %vm686_vm12, %v13543_v43  ;;  %v11391_v0 = vpack.c.bf16 %v3778_v11, %v3777_v61 }
 0x214   :  { %11384 = vmatprep.subr.bf16.mxu1 %v11383_v13 }
 0x216   :  { %10394 = vmatmul.mubr.msk.f32.gmra.mrb[10].mxu1 %vm686_vm12, %v13555_v59 }
 0x217   :  { %10396 = vmatprep.mubr.msk.f32.mxu1 %vm686_vm12, %v13573_v48  ;;  %11386 = vmatpush3.bf16.msra.mxu1 %v11383_v13  ;;  %v14177_v13 = vcombine.low %v13485_v19, %v17299_v10  ;;  %v14197_v10 = vcombine.low %v13497_v49, %v17312_v30  ;;  %v3962_v19 = vld [vmem:[%s16699_s3 + $0x410] sm:$0xff]  ;;  %v3964_v49 = vld [vmem:[%s16699_s3 + $0x420] sm:$0xff]  ;;  %v3965_v30 = vld [vmem:[%s16699_s3 + $0x428] sm:$0xff] }
 0x218   :  { %11388 = vmatprep.subr.bf16.mxu1 %v11387_v53  ;;  %v11403_v11 = vpack.c.bf16 %v3965_v30, %v3964_v49  ;;  %v17344_v49 = vld [vmem:[#allocation9_spill] sm:$0xff]  ;;  %v17346_v30 = vld [vmem:[#allocation64_spill] sm:$0xff] }
 0x21a   :  { %10397 = vmatmul.mubr.msk.f32.gmra.mrb[12].mxu1 %vm686_vm12, %v13577_v41 }
 0x21b   :  { %10399 = vmatprep.mubr.msk.f32.mxu1 %vm686_vm12, %v13621_v4  ;;  %11390 = vmatpush3.bf16.msra.mxu1 %v11387_v53  ;;  %v328_v53 = vadd.f32 %v13450_v45, %v17342_v34  ;;  %v17343_v34 = vld [vmem:[#allocation55_spill] sm:$0xff] }
 0x21c   :  { %11392 = vmatprep.subr.bf16.mxu1 %v11391_v0 }
 0x21e   :  { %10400 = vmatmul.mubr.msk.f32.gmra.mrb[14].mxu1 %vm686_vm12, %v14177_v13 }
 0x21f   :  { %10402 = vmatprep.mubr.msk.f32.mxu1 %vm686_vm12, %v13653_v39  ;;  %11394 = vmatpush3.bf16.msra.mxu1 %v11391_v0  ;;  %v3963_v39 = vld [vmem:[%s16699_s3 + $0x418] sm:$0xff]  ;;  %v3966_v0 = vld [vmem:[%s16699_s3 + $0x430] sm:$0xff] }
 0x220   :  { %11396 = vmatprep.subr.bf16.mxu1 %v11395_v22  ;;  %v11399_v61 = vpack.c.bf16 %v3963_v39, %v3962_v19  ;;  %v4149_v19 = vld [vmem:[%s16699_s3 + $0x440] sm:$0xff]  ;;  %v4150_v39 = vld [vmem:[%s16699_s3 + $0x448] sm:$0xff] }
 0x222   :  { %10403 = vmatmul.mubr.msk.f32.gmra.mrb[0].mxu1 %vm686_vm12, %v13659_v62 }
 0x223   :  { %10405 = vmatprep.mubr.msk.f32.mxu1 %vm686_vm12, %v13672_v58 }
 0x226   :  { %10406 = vmatmul.mubr.msk.f32.gmra.mrb[2].mxu1 %vm686_vm12, %v13678_v32 }
 0x227   :  { %10408 = vmatprep.mubr.msk.f32.mxu1 %vm686_vm12, %v13696_v52 }
 0x22a   :  { %10409 = vmatmul.mubr.msk.f32.gmra.mrb[4].mxu1 %vm686_vm12, %v13704_v15 }
 0x22b   :  { %10411 = vmatprep.mubr.msk.f32.mxu1 %vm686_vm12, %v13722_v54 }
 0x22e   :  { %10412 = vmatmul.mubr.msk.f32.gmra.mrb[6].mxu1 %vm686_vm12, %v14197_v10 }
 0x22f   :  { %10430 = vmatprep.mubr.msk.f32.mxu1 %vm686_vm12, %v17271_v2  ;;  %v14221_v2 = vmax.f32 %v328_v53, 0.0 }
 0x231   :  { %v14235_v21 = vcombine.high %v14221_v2, %v14221_v2 }
 0x232   :  { %10431 = vmatmul.mubr.msk.f32.vlgmr.msra.gmra.mrb[8].mxu1 %vm686_vm12, %v17272_v42 }
 0x233   :  { %11398 = vmatpush3.bf16.msra.mxu1 %v11395_v22  ;;  %10433 = vmatprep.mubr.msk.f32.mxu1 %vm686_vm12, %v17273_v25  ;;  %v11407_v22 = vpack.c.bf16 %v3967_v16, %v3966_v0  ;;  %v14249_v53 = vcombine.low %v14221_v2, %v14235_v21  ;;  %v4151_v0 = vld [vmem:[%s16699_s3 + $0x450] sm:$0xff]  ;;  %v4152_v16 = vld [vmem:[%s16699_s3 + $0x458] sm:$0xff] }
 0x234   :  { %11400 = vmatprep.subr.bf16.mxu1 %v11399_v61 }
 0x236   :  { %10434 = vmatmul.mubr.msk.f32.gmra.mrb[10].mxu1 %vm686_vm12, %v17274_v1 }
 0x237   :  { %10436 = vmatprep.mubr.msk.f32.mxu1 %vm686_vm12, %v17277_v18  ;;  %11402 = vmatpush3.bf16.msra.mxu1 %v11399_v61  ;;  %v11411_v61 = vpack.c.bf16 %v4150_v39, %v4149_v19  ;;  %v3948_v19 = vrot.slane %v14235_v21, 5  ;;  %v4153_v39 = vld [vmem:[%s16699_s3 + $0x460] sm:$0xff] }
 0x238   :  { %11404 = vmatprep.subr.bf16.mxu1 %v11403_v11 }
 0x23a   :  { %10437 = vmatmul.mubr.msk.f32.gmra.mrb[12].mxu1 %vm686_vm12, %v13784_v37 }
 0x23b   :  { %10439 = vmatprep.mubr.msk.f32.mxu1 %vm686_vm12, %v17343_v34  ;;  %11406 = vmatpush3.bf16.msra.mxu1 %v11403_v11 }
 0x23c   :  { %11408 = vmatprep.subr.bf16.mxu1 %v11407_v22 }
 0x23e   :  { %10440 = vmatmul.mubr.msk.f32.gmra.mrb[14].mxu1 %vm686_vm12, %v14249_v53 }
 0x23f   :  { %10442 = vmatprep.mubr.msk.f32.mxu1 %vm686_vm12, %v17284_v23  ;;  %11410 = vmatpush3.bf16.msra.mxu1 %v11407_v22  ;;  %v17345_v23 = vld [vmem:[#allocation70_spill] sm:$0xff]  ;;  %v11415_v22 = vpack.c.bf16 %v4152_v16, %v4151_v0  ;;  %v3950_v0 = vrot.slane %v3948_v19, 4 }
 0x240   :  { %11412 = vmatprep.subr.bf16.mxu1 %v11411_v61  ;;  %v14269_v11 = vcombine.low %v17346_v30, %v17345_v23  ;;  %v17348_v16 = vld [vmem:[#allocation54_spill] sm:$0xff] }
 0x242   :  { %10443 = vmatmul.mubr.msk.f32.gmra.mrb[0].mxu1 %vm686_vm12, %v17285_v44  ;;  %17347 = vst [vmem:[#allocation21_spill] sm:$0xff] %v14269_v11 }
 0x243   :  { %10445 = vmatprep.mubr.msk.f32.mxu1 %vm686_vm12, %v17287_v47 }
 0x246   :  { %10446 = vmatmul.mubr.msk.f32.gmra.mrb[2].mxu1 %vm686_vm12, %v17288_v6  ;;  %v4338_v6 = vld [vmem:[%s16699_s3 + $0x480] sm:$0xff] }
 0x247   :  { %10448 = vmatprep.mubr.msk.f32.mxu1 %vm686_vm12, %v17290_v14  ;;  %v4156_v14 = vld [vmem:[%s16699_s3 + $0x478] sm:$0xff] }
 0x24a   :  { %10449 = vmatmul.mubr.msk.f32.gmra.mrb[4].mxu1 %vm686_vm12, %v13844_v60  ;;  %v4155_v60 = vld [vmem:[%s16699_s3 + $0x470] sm:$0xff] }
 0x24b   :  { %10451 = vmatprep.mubr.msk.f32.mxu1 %vm686_vm12, %v17344_v49  ;;  %v4154_v49 = vld [vmem:[%s16699_s3 + $0x468] sm:$0xff] }
 0x24e   :  { %10452 = vmatmul.mubr.msk.f32.gmra.mrb[6].mxu1 %vm686_vm12, %v14269_v11  ;;  %v3951_v11 = vrot.slane %v17348_v16, 5 }
 0x24f   :  { %10470 = vmatprep.mubr.msk.f32.mxu1 %vm686_vm12, %v17296_v35  ;;  %v11419_v35 = vpack.c.bf16 %v4154_v49, %v4153_v39  ;;  %v17349_v49 = vld [vmem:[#allocation74_spill] sm:$0xff] }
 0x250   :  { %v428_v39 = vadd.f32 %v13450_v45, %v17349_v49 }
 0x252   :  { %10471 = vmatmul.mubr.msk.f32.vlgmr.msra.gmra.mrb[8].mxu1 %vm686_vm12, %v17298_v29  ;;  %v3952_v29 = vsel %vm12322_vm13, %v3950_v0, %v3951_v11  ;;  %v14322_v11 = vmax.f32 %v428_v39, 0.0 }
 0x253   :  { %11414 = vmatpush3.bf16.msra.mxu1 %v11411_v61  ;;  %10473 = vmatprep.mubr.msk.f32.mxu1 %vm686_vm12, %v17300_v57  ;;  %v11423_v61 = vpack.c.bf16 %v4156_v14, %v4155_v60  ;;  %v8726_v57 = vrot.slane %v14221_v2, 9 }
 0x254   :  { %11416 = vmatprep.subr.bf16.mxu1 %v11415_v22 }
 0x255   :  { %v3949_v45 = vsel %vm12322_vm13, %v8726_v57, %v3948_v19  ;;  %v14334_v57 = vcombine.high %v14322_v11, %v14322_v11  ;;  %v17355_v19 = vld [vmem:[#allocation71_spill] sm:$0xff] }
 0x256   :  { %10474 = vmatmul.mubr.msk.f32.gmra.mrb[10].mxu1 %vm686_vm12, %v17303_v31  ;;  %v4339_v31 = vld [vmem:[%s16699_s3 + $0x488] sm:$0xff]  ;;  %v14320_v14 = vcombine.low %v3949_v45, %v3952_v29  ;;  %v17354_v29 = vld [vmem:[#allocation66_spill] sm:$0xff] }
 0x257   :  { %10476 = vmatprep.mubr.msk.f32.mxu1 %vm686_vm12, %v17305_v5  ;;  %11418 = vmatpush3.bf16.msra.mxu1 %v11415_v22  ;;  %v11427_v60 = vpack.c.bf16 %v4339_v31, %v4338_v6  ;;  %v17351_v22 = vld [vmem:[#allocation60_spill] sm:$0xff]  ;;  %17353 = vst [vmem:[#allocation22_spill] sm:$0xff] %v14334_v57  ;;  %v3955_v6 = vrot.slane %v17345_v23, 5  ;;  %v5250_v31 = vrot.slane %v14322_v11, 7  ;;  %v5253_v45 = vrot.slane %v14334_v57, 7 }
 0x258   :  { %11420 = vmatprep.subr.bf16.mxu1 %v11419_v35  ;;  %17350 = vst [vmem:[#allocation23_spill] sm:$0xff] %v14320_v14  ;;  %v14330_v0 = vcombine.high %v17351_v22, %v17351_v22  ;;  %v3958_v49 = vrot.slane %v17351_v22, 5  ;;  %v17366_v5 = vld [vmem:[#allocation88_spill] sm:$0xff] }
 0x259   :  { %v5252_v39 = vrot.slane %v5250_v31, 4 }
 0x25a   :  { %10477 = vmatmul.mubr.msk.f32.gmra.mrb[12].mxu1 %vm686_vm12, %v13924_v12  ;;  %17352 = vst [vmem:[#allocation28_spill] sm:$0xff] %v14330_v0 }
 0x25b   :  { %10479 = vmatprep.mubr.msk.f32.mxu1 %vm686_vm12, %v13945_v46  ;;  %11422 = vmatpush3.bf16.msra.mxu1 %v11419_v35  ;;  %v8849_v35 = vrot.slane %v14330_v0, 11  ;;  %v17361_v0 = vld [vmem:[#allocation78_spill] sm:$0xff] }
 0x25c   :  { %11424 = vmatprep.subr.bf16.mxu1 %v11423_v61 }
 0x25d   :  { %v14350_v12 = vsel %vm12328_vm14, %v8849_v35, %v5250_v31  ;;  %v17362_v31 = vld [vmem:[#allocation31_spill] sm:$0xff] }
 0x25e   :  { %10480 = vmatmul.mubr.msk.f32.gmra.mrb[14].mxu1 %vm686_vm12, %v14320_v14  ;;  %v17356_v14 = vld [vmem:[#allocation72_spill] sm:$0xff]  ;;  %17358 = vst [vmem:[#allocation77_spill] sm:$0xff] %v14350_v12  ;;  %v4345_v12 = vld [vmem:[%s16699_s3 + $0x4b8] sm:$0xff] }
 0x25f   :  { %10482 = vmatprep.mubr.msk.f32.mxu1 %vm686_vm12, %v17310_v28  ;;  %11426 = vmatpush3.bf16.msra.mxu1 %v11423_v61  ;;  %v8727_v28 = vrot.slane %v17346_v30, 9  ;;  %v3957_v61 = vrot.slane %v3955_v6, 4 }
 0x260   :  { %11428 = vmatprep.subr.bf16.mxu1 %v11427_v60 }
 0x261   :  { %v3956_v57 = vsel %vm12322_vm13, %v8727_v28, %v3955_v6  ;;  %v17364_v6 = vld [vmem:[#allocation84_spill] sm:$0xff] }
 0x262   :  { %10483 = vmatmul.mubr.msk.f32.gmra.mrb[0].mxu1 %vm686_vm12, %v17354_v29  ;;  %v17359_v29 = vld [vmem:[#allocation76_spill] sm:$0xff] }
 0x263   :  { %10485 = vmatprep.mubr.msk.f32.mxu1 %vm686_vm12, %v17355_v19  ;;  %v14356_v19 = vsel %vm12328_vm14, %v5252_v39, %v5253_v45  ;;  %v4340_v39 = vld [vmem:[%s16699_s3 + $0x490] sm:$0xff]  ;;  %v4341_v45 = vld [vmem:[%s16699_s3 + $0x498] sm:$0xff] }
 0x264   :  { %17360 = vst [vmem:[#allocation59_spill] sm:$0xff] %v14356_v19  ;;  %v11431_v28 = vpack.c.bf16 %v4341_v45, %v4340_v39  ;;  %v4140_v45 = vrot.slane %v17348_v16, 6  ;;  %v4344_v19 = vld [vmem:[%s16699_s3 + $0x4b0] sm:$0xff] }
 0x266   :  { %10486 = vmatmul.mubr.msk.f32.gmra.mrb[2].mxu1 %vm686_vm12, %v17356_v14  ;;  %v3959_v14 = vsel %vm12322_vm13, %v3957_v61, %v3958_v49  ;;  %v4137_v61 = vrot.slane %v14235_v21, 6  ;;  %v17365_v49 = vld [vmem:[#allocation86_spill] sm:$0xff] }
 0x267   :  { %10488 = vmatprep.mubr.msk.f32.mxu1 %vm686_vm12, %v17359_v29  ;;  %v14368_v35 = vcombine.low %v3956_v57, %v3959_v14  ;;  %v4342_v14 = vld [vmem:[%s16699_s3 + $0x4a0] sm:$0xff]  ;;  %v4343_v57 = vld [vmem:[%s16699_s3 + $0x4a8] sm:$0xff] }
 0x268   :  { %v4139_v39 = vrot.slane %v4137_v61, 4 }
 0x269   :  { %17363 = vst [vmem:[#allocation61_spill] sm:$0xff] %v14368_v35 }
 0x26a   :  { %10489 = vmatmul.mubr.msk.f32.gmra.mrb[4].mxu1 %vm686_vm12, %v17361_v0 }
 0x26b   :  { %10491 = vmatprep.mubr.msk.f32.mxu1 %vm686_vm12, %v17362_v31  ;;  %v4514_v31 = vld [vmem:[%s16699_s3 + $0x4c8] sm:$0xff] }
 0x26e   :  { %10492 = vmatmul.mubr.msk.f32.gmra.mrb[6].mxu1 %vm686_vm12, %v14368_v35  ;;  %v17367_v35 = vld [vmem:[#allocation52_spill] sm:$0xff] }
 0x26f   :  { %10510 = vmatprep.mubr.msk.f32.mxu1 %vm686_vm12, %v17364_v6  ;;  %v11435_v6 = vpack.c.bf16 %v4343_v57, %v4342_v14  ;;  %v11439_v14 = vpack.c.bf16 %v4345_v12, %v4344_v19  ;;  %v8744_v57 = vrot.slane %v14221_v2, 10 }
 0x271   :  { %v4138_v12 = vsel %vm12356_vm15, %v8744_v57, %v4137_v61  ;;  %v17374_v57 = vld [vmem:[#allocation18_spill] sm:$0xff] }
 0x272   :  { %10511 = vmatmul.mubr.msk.f32.vlgmr.msra.gmra.mrb[8].mxu1 %vm686_vm12, %v17365_v49  ;;  %v4513_v49 = vld [vmem:[%s16699_s3 + $0x4c0] sm:$0xff] }
 0x273   :  { %11430 = vmatpush3.bf16.msra.mxu1 %v11427_v60  ;;  %10513 = vmatprep.mubr.msk.f32.mxu1 %vm686_vm12, %v17366_v5  ;;  %v17368_v60 = vld [vmem:[#allocation38_spill] sm:$0xff]  ;;  %v4141_v5 = vsel %vm12356_vm15, %v4139_v39, %v4140_v45  ;;  %v17370_v39 = vld [vmem:[#allocation43_spill] sm:$0xff]  ;;  %v4144_v45 = vrot.slane %v17345_v23, 6 }
 0x274   :  { %11432 = vmatprep.subr.bf16.mxu1 %v11431_v28  ;;  %v14417_v19 = vcombine.low %v4138_v12, %v4141_v5  ;;  %v8745_v5 = vrot.slane %v17346_v30, 10  ;;  %v4516_v12 = vld [vmem:[%s16699_s3 + $0x4d8] sm:$0xff] }
 0x275   :  { %v4146_v61 = vrot.slane %v4144_v45, 4 }
 0x276   :  { %10514 = vmatmul.mubr.msk.f32.gmra.mrb[10].mxu1 %vm686_vm12, %v17367_v35  ;;  %v17369_v35 = vld [vmem:[#allocation35_spill] sm:$0xff]  ;;  %v4145_v23 = vsel %vm12356_vm15, %v8745_v5, %v4144_v45  ;;  %v4326_v45 = vrot.slane %v14235_v21, 7  ;;  %v4517_v5 = vld [vmem:[%s16699_s3 + $0x4e0] sm:$0xff] }
 0x277   :  { %10516 = vmatprep.mubr.msk.f32.mxu1 %vm686_vm12, %v17368_v60  ;;  %11434 = vmatpush3.bf16.msra.mxu1 %v11431_v28  ;;  %v11443_v28 = vpack.c.bf16 %v4514_v31, %v4513_v49  ;;  %v4147_v31 = vrot.slane %v17351_v22, 6  ;;  %v17372_v49 = vld [vmem:[#allocation10_spill] sm:$0xff]  ;;  %v4515_v22 = vld [vmem:[%s16699_s3 + $0x4d0] sm:$0xff] }
 0x278   :  { %11436 = vmatprep.subr.bf16.mxu1 %v11435_v6 }
 0x27a   :  { %10517 = vmatmul.mubr.msk.f32.gmra.mrb[12].mxu1 %vm686_vm12, %v17369_v35  ;;  %v17371_v35 = vld [vmem:[#allocation90_spill] sm:$0xff] }
 0x27b   :  { %10519 = vmatprep.mubr.msk.f32.mxu1 %vm686_vm12, %v14052_v33  ;;  %11438 = vmatpush3.bf16.msra.mxu1 %v11435_v6  ;;  %v4148_v6 = vsel %vm12356_vm15, %v4146_v61, %v4147_v31  ;;  %v4518_v61 = vld [vmem:[%s16699_s3 + $0x4e8] sm:$0xff]  ;;  %v17376_v31 = vld [vmem:[#allocation80_spill] sm:$0xff] }
 0x27c   :  { %11440 = vmatprep.subr.bf16.mxu1 %v11439_v14  ;;  %v14442_v30 = vcombine.low %v4145_v23, %v4148_v6  ;;  %v11451_v6 = vpack.c.bf16 %v4518_v61, %v4517_v5 }
 0x27e   :  { %10520 = vmatmul.mubr.msk.f32.gmra.mrb[14].mxu1 %vm686_vm12, %v14417_v19  ;;  %17375 = vst [vmem:[#allocation68_spill] sm:$0xff] %v14442_v30 }
 0x27f   :  { %10522 = vmatprep.mubr.msk.f32.mxu1 %vm686_vm12, %v17370_v39  ;;  %11442 = vmatpush3.bf16.msra.mxu1 %v11439_v14  ;;  %v17373_v14 = vld [vmem:[#allocation93_spill] sm:$0xff]  ;;  %v11447_v39 = vpack.c.bf16 %v4516_v12, %v4515_v22  ;;  %v4328_v22 = vrot.slane %v4326_v45, 4  ;;  %v4329_v12 = vrot.slane %v17348_v16, 7 }
 0x280   :  { %11444 = vmatprep.subr.bf16.mxu1 %v11443_v28 }
 0x282   :  { %10523 = vmatmul.mubr.msk.f32.gmra.mrb[0].mxu1 %vm686_vm12, %v17371_v35 }
 0x283   :  { %10525 = vmatprep.mubr.msk.f32.mxu1 %vm686_vm12, %v17330_v50 }
 0x286   :  { %10526 = vmatmul.mubr.msk.f32.gmra.mrb[2].mxu1 %vm686_vm12, %v17372_v49 }
 0x287   :  { %10528 = vmatprep.mubr.msk.f32.mxu1 %vm686_vm12, %v17332_v20 }
 0x28a   :  { %10529 = vmatmul.mubr.msk.f32.gmra.mrb[4].mxu1 %vm686_vm12, %v17373_v14 }
 0x28b   :  { %10531 = vmatprep.mubr.msk.f32.mxu1 %vm686_vm12, %v17374_v57  ;;  %v4688_v57 = vld [vmem:[%s16699_s3 + $0x500] sm:$0xff] }
 0x28e   :  { %10532 = vmatmul.mubr.msk.f32.gmra.mrb[6].mxu1 %vm686_vm12, %v14442_v30  ;;  %v4519_v30 = vld [vmem:[%s16699_s3 + $0x4f0] sm:$0xff] }
 0x28f   :  { %10550 = vmatprep.mubr.msk.f32.mxu1 %vm686_vm12, %v17336_v38 }
 0x292   :  { %10551 = vmatmul.mubr.msk.f32.vlgmr.msra.gmra.mrb[8].mxu1 %vm686_vm12, %v17376_v31  ;;  %v4520_v31 = vld [vmem:[%s16699_s3 + $0x4f8] sm:$0xff] }
 0x293   :  { %v14463_v23 = vpop.f32.mrb[44].mxu0  ;;  %11446 = vmatpush3.bf16.msra.mxu1 %v11443_v28  ;;  %10553 = vmatprep.mubr.msk.f32.mxu1 %vm686_vm12, %v17338_v36  ;;  %v11455_v61 = vpack.c.bf16 %v4520_v31, %v4519_v30  ;;  %v4330_v36 = vsel %vm12328_vm14, %v4328_v22, %v4329_v12 }
 0x294   :  { %17377 = vst [vmem:[#allocation63_spill] sm:$0xff] %v14463_v23  ;;  %v14467_v38 = vpop.f32.mrb[45].mxu0  ;;  %11448 = vmatprep.subr.bf16.mxu1 %v11447_v39  ;;  %v17379_v23 = vld [vmem:[#allocation47_spill] sm:$0xff] }
 0x295   :  { %17378 = vst [vmem:[#allocation8_spill] sm:$0xff] %v14467_v38  ;;  %v8762_v38 = vrot.slane %v14221_v2, 11 }
 0x296   :  { %10554 = vmatmul.mubr.msk.f32.gmra.mrb[10].mxu1 %vm686_vm12, %v17379_v23 }
 0x297   :  { %v14478_v28 = vpop.f32.mrb[46].mxu0  ;;  %10556 = vmatprep.mubr.msk.f32.mxu1 %vm686_vm12, %v13311_v8  ;;  %11450 = vmatpush3.bf16.msra.mxu1 %v11447_v39  ;;  %v4327_v2 = vsel %vm12328_vm14, %v8762_v38, %v4326_v45 }
 0x298   :  { %17380 = vst [vmem:[#allocation82_spill] sm:$0xff] %v14478_v28  ;;  %v14482_v5 = vpop.f32.mrb[47].mxu0  ;;  %11452 = vmatprep.subr.bf16.mxu1 %v11451_v6  ;;  %v4689_v28 = vld [vmem:[%s16699_s3 + $0x508] sm:$0xff]  ;;  %v14503_v31 = vcombine.low %v4327_v2, %v4330_v36 }
 0x299   :  { %17381 = vst [vmem:[#allocation83_spill] sm:$0xff] %v14482_v5  ;;  %v11459_v22 = vpack.c.bf16 %v4689_v28, %v4688_v57  ;;  %v4691_v28 = vld [vmem:[%s16699_s3 + $0x518] sm:$0xff]  ;;  %v4693_v5 = vld [vmem:[%s16699_s3 + $0x528] sm:$0xff] }
 0x29a   :  { %10557 = vmatmul.mubr.msk.f32.gmra.mrb[12].mxu1 %vm686_vm12, %v17340_v9 }
 0x29b   :  { %v14495_v39 = vpop.f32.mrb[48].mxu0  ;;  %10559 = vmatprep.mubr.msk.f32.mxu1 %vm686_vm12, %v13610_v51  ;;  %11454 = vmatpush3.bf16.msra.mxu1 %v11451_v6  ;;  %v4690_v6 = vld [vmem:[%s16699_s3 + $0x510] sm:$0xff] }
 0x29c   :  { %17382 = vst [vmem:[#allocation85_spill] sm:$0xff] %v14495_v39  ;;  %v14501_v30 = vpop.f32.mrb[49].mxu0  ;;  %11456 = vmatprep.subr.bf16.mxu1 %v11455_v61 }
 0x29d   :  { %17383 = vst [vmem:[#allocation87_spill] sm:$0xff] %v14501_v30  ;;  %v4692_v30 = vld [vmem:[%s16699_s3 + $0x520] sm:$0xff] }
 0x29e   :  { %10560 = vmatmul.mubr.msk.f32.gmra.mrb[14].mxu1 %vm686_vm12, %v14503_v31 }
 0x29f   :  { %v14507_v12 = vpop.f32.mrb[50].mxu0  ;;  %10562 = vmatprep.mubr.msk.f32.mxu1 %vm686_vm12, %v13400_v63  ;;  %11458 = vmatpush3.bf16.msra.mxu1 %v11455_v61  ;;  %v17386_v61 = vld [vmem:[#allocation15_spill] sm:$0xff] }
 0x2a0   :  { %17384 = vst [vmem:[#allocation48_spill] sm:$0xff] %v14507_v12  ;;  %v14511_v39 = vpop.f32.mrb[51].mxu0  ;;  %11460 = vmatprep.subr.bf16.mxu1 %v11459_v22  ;;  %v11463_v12 = vpack.c.bf16 %v4691_v28, %v4690_v6  ;;  %v4694_v6 = vld [vmem:[%s16699_s3 + $0x530] sm:$0xff]  ;;  %v4695_v28 = vld [vmem:[%s16699_s3 + $0x538] sm:$0xff] }
 0x2a1   :  { %17385 = vst [vmem:[#allocation67_spill] sm:$0xff] %v14511_v39 }
 0x2a2   :  { %10563 = vmatmul.mubr.msk.f32.gmra.mrb[0].mxu1 %vm686_vm12, %v13416_v7 }
 0x2a3   :  { %v14515_v46 = vpop.f32.mrb[36].mxu0  ;;  %10565 = vmatprep.mubr.msk.f32.mxu1 %vm686_vm12, %v13423_v55 }
 0x2a4   :  { %v14519_v36 = vpop.f32.mrb[37].mxu0 }
 0x2a6   :  { %10566 = vmatmul.mubr.msk.f32.gmra.mrb[2].mxu1 %vm686_vm12, %v13440_v26 }
 0x2a7   :  { %v14523_v57 = vpop.f32.mrb[38].mxu0  ;;  %10568 = vmatprep.mubr.msk.f32.mxu1 %vm686_vm12, %v13382_v3 }
 0x2a8   :  { %v14527_v63 = vpop.f32.mrb[39].mxu0 }
 0x2aa   :  { %10569 = vmatmul.mubr.msk.f32.gmra.mrb[4].mxu1 %vm686_vm12, %v17341_v40 }
 0x2ab   :  { %v14531_v45 = vpop.f32.mrb[40].mxu0  ;;  %10571 = vmatprep.mubr.msk.f32.mxu1 %vm686_vm12, %v13634_v17 }
 0x2ac   :  { %v14535_v38 = vpop.f32.mrb[41].mxu0 }
 0x2ae   :  { %10572 = vmatmul.mubr.msk.f32.gmra.mrb[6].mxu1 %vm686_vm12, %v17386_v61 }
 0x2af   :  { %v14545_v2 = vpop.f32.mrb[42].mxu0  ;;  %10590 = vmatprep.mubr.msk.f32.mxu1 %vm686_vm12, %v13506_v24  ;;  %v11467_v24 = vpack.c.bf16 %v4693_v5, %v4692_v30  ;;  %v4877_v5 = vld [vmem:[%s16699_s3 + $0x540] sm:$0xff]  ;;  %v4878_v30 = vld [vmem:[%s16699_s3 + $0x548] sm:$0xff] }
 0x2b0   :  { %17387 = vst [vmem:[#allocation73_spill] sm:$0xff] %v14545_v2  ;;  %v14549_v39 = vpop.f32.mrb[43].mxu0  ;;  %v17404_v2 = vld [vmem:[#allocation19_spill] sm:$0xff] }
 0x2b1   :  { %17388 = vst [vmem:[#allocation51_spill] sm:$0xff] %v14549_v39  ;;  %v5255_v39 = vld [vmem:[%s16699_s3 + $0x5c0] sm:$0xff] }
 0x2b2   :  { %10591 = vmatmul.mubr.msk.f32.vlgmr.msra.gmra.mrb[8].mxu1 %vm686_vm12, %v13543_v43 }
 0x2b3   :  { %11462 = vmatpush3.bf16.msra.mxu1 %v11459_v22  ;;  %10593 = vmatprep.mubr.msk.f32.mxu1 %vm686_vm12, %v13555_v59  ;;  %v11471_v22 = vpack.c.bf16 %v4695_v28, %v4694_v6  ;;  %v11475_v6 = vpack.c.bf16 %v4878_v30, %v4877_v5  ;;  %v4881_v28 = vld [vmem:[%s16699_s3 + $0x560] sm:$0xff]  ;;  %v4884_v30 = vld [vmem:[%s16699_s3 + $0x578] sm:$0xff] }
 0x2b4   :  { %11464 = vmatprep.subr.bf16.mxu1 %v11463_v12 }
 0x2b6   :  { %10594 = vmatmul.mubr.msk.f32.gmra.mrb[10].mxu1 %vm686_vm12, %v13573_v48 }
 0x2b7   :  { %10596 = vmatprep.mubr.msk.f32.mxu1 %vm686_vm12, %v13577_v41  ;;  %11466 = vmatpush3.bf16.msra.mxu1 %v11463_v12  ;;  %v14583_v12 = vcombine.low %v14235_v21, %v17348_v16  ;;  %v4880_v21 = vld [vmem:[%s16699_s3 + $0x558] sm:$0xff] }
 0x2b8   :  { %11468 = vmatprep.subr.bf16.mxu1 %v11467_v24  ;;  %v17389_v16 = vld [vmem:[#allocation69_spill] sm:$0xff] }
 0x2ba   :  { %10597 = vmatmul.mubr.msk.f32.gmra.mrb[12].mxu1 %vm686_vm12, %v13621_v4 }
 0x2bb   :  { %10599 = vmatprep.mubr.msk.f32.mxu1 %vm686_vm12, %v14177_v13  ;;  %11470 = vmatpush3.bf16.msra.mxu1 %v11467_v24 }
 0x2bc   :  { %11472 = vmatprep.subr.bf16.mxu1 %v11471_v22 }
 0x2be   :  { %10600 = vmatmul.mubr.msk.f32.gmra.mrb[14].mxu1 %vm686_vm12, %v14583_v12 }
 0x2bf   :  { %10602 = vmatprep.mubr.msk.f32.mxu1 %vm686_vm12, %v13659_v62  ;;  %11474 = vmatpush3.bf16.msra.mxu1 %v11471_v22  ;;  %v4879_v62 = vld [vmem:[%s16699_s3 + $0x550] sm:$0xff]  ;;  %v4882_v22 = vld [vmem:[%s16699_s3 + $0x568] sm:$0xff] }
 0x2c0   :  { %11476 = vmatprep.subr.bf16.mxu1 %v11475_v6  ;;  %v11479_v24 = vpack.c.bf16 %v4880_v21, %v4879_v62  ;;  %v11483_v5 = vpack.c.bf16 %v4882_v22, %v4881_v28  ;;  %v17395_v28 = vld [vmem:[#allocation9_spill] sm:$0xff] }
 0x2c1   :  { %v17396_v22 = vld [vmem:[#allocation21_spill] sm:$0xff] }
 0x2c2   :  { %10603 = vmatmul.mubr.msk.f32.gmra.mrb[0].mxu1 %vm686_vm12, %v13672_v58 }
 0x2c3   :  { %10605 = vmatprep.mubr.msk.f32.mxu1 %vm686_vm12, %v13678_v32 }
 0x2c6   :  { %10606 = vmatmul.mubr.msk.f32.gmra.mrb[2].mxu1 %vm686_vm12, %v13696_v52 }
 0x2c7   :  { %10608 = vmatprep.mubr.msk.f32.mxu1 %vm686_vm12, %v13704_v15 }
 0x2ca   :  { %10609 = vmatmul.mubr.msk.f32.gmra.mrb[4].mxu1 %vm686_vm12, %v13722_v54 }
 0x2cb   :  { %10611 = vmatprep.mubr.msk.f32.mxu1 %vm686_vm12, %v14197_v10 }
 0x2ce   :  { %10612 = vmatmul.mubr.msk.f32.gmra.mrb[6].mxu1 %vm686_vm12, %v17389_v16 }
 0x2cf   :  { %10630 = vmatprep.mubr.msk.f32.mxu1 %vm686_vm12, %v17272_v42  ;;  %v4883_v42 = vld [vmem:[%s16699_s3 + $0x570] sm:$0xff] }
 0x2d2   :  { %10631 = vmatmul.mubr.msk.f32.vlgmr.msra.gmra.mrb[8].mxu1 %vm686_vm12, %v17273_v25  ;;  %v11487_v25 = vpack.c.bf16 %v4884_v30, %v4883_v42  ;;  %v5069_v42 = vld [vmem:[%s16699_s3 + $0x598] sm:$0xff]  ;;  %v17398_v30 = vld [vmem:[#allocation30_spill] sm:$0xff] }
 0x2d3   :  { %11478 = vmatpush3.bf16.msra.mxu1 %v11475_v6  ;;  %10633 = vmatprep.mubr.msk.f32.mxu1 %vm686_vm12, %v17274_v1  ;;  %v5066_v1 = vld [vmem:[%s16699_s3 + $0x580] sm:$0xff]  ;;  %v5067_v6 = vld [vmem:[%s16699_s3 + $0x588] sm:$0xff] }
 0x2d4   :  { %11480 = vmatprep.subr.bf16.mxu1 %v11479_v24  ;;  %v11491_v21 = vpack.c.bf16 %v5067_v6, %v5066_v1  ;;  %v5070_v6 = vld [vmem:[%s16699_s3 + $0x5a0] sm:$0xff] }
 0x2d6   :  { %10634 = vmatmul.mubr.msk.f32.gmra.mrb[10].mxu1 %vm686_vm12, %v17277_v18  ;;  %v17390_v18 = vld [vmem:[#allocation53_spill] sm:$0xff] }
 0x2d7   :  { %10636 = vmatprep.mubr.msk.f32.mxu1 %vm686_vm12, %v13784_v37  ;;  %11482 = vmatpush3.bf16.msra.mxu1 %v11479_v24  ;;  %v17391_v37 = vld [vmem:[#allocation62_spill] sm:$0xff]  ;;  %v4865_v1 = vrot.slane %v17390_v18, 5 }
 0x2d8   :  { %11484 = vmatprep.subr.bf16.mxu1 %v11483_v5  ;;  %v4696_v62 = vcombine.low %v17391_v37, %v17390_v18  ;;  %v17394_v24 = vld [vmem:[#allocation26_spill] sm:$0xff] }
 0x2da   :  { %10637 = vmatmul.mubr.msk.f32.gmra.mrb[12].mxu1 %vm686_vm12, %v17343_v34  ;;  %v17392_v34 = vld [vmem:[#allocation89_spill] sm:$0xff] }
 0x2db   :  { %10639 = vmatprep.mubr.msk.f32.mxu1 %vm686_vm12, %v14249_v53  ;;  %11486 = vmatpush3.bf16.msra.mxu1 %v11483_v5  ;;  %v17393_v53 = vld [vmem:[#allocation7_spill] sm:$0xff] }
 0x2dc   :  { %11488 = vmatprep.subr.bf16.mxu1 %v11487_v25 }
 0x2de   :  { %10640 = vmatmul.mubr.msk.f32.gmra.mrb[14].mxu1 %vm686_vm12, %v4696_v62  ;;  %v5071_v62 = vld [vmem:[%s16699_s3 + $0x5a8] sm:$0xff] }
 0x2df   :  { %10642 = vmatprep.mubr.msk.f32.mxu1 %vm686_vm12, %v17285_v44  ;;  %11490 = vmatpush3.bf16.msra.mxu1 %v11487_v25  ;;  %v17397_v44 = vld [vmem:[#allocation28_spill] sm:$0xff] }
 0x2e0   :  { %11492 = vmatprep.subr.bf16.mxu1 %v11491_v21  ;;  %v4697_v5 = vcombine.low %v17397_v44, %v14322_v11 }
 0x2e2   :  { %10643 = vmatmul.mubr.msk.f32.gmra.mrb[0].mxu1 %vm686_vm12, %v17287_v47  ;;  %v5068_v47 = vld [vmem:[%s16699_s3 + $0x590] sm:$0xff] }
 0x2e3   :  { %10645 = vmatprep.mubr.msk.f32.mxu1 %vm686_vm12, %v17392_v34  ;;  %v11495_v25 = vpack.c.bf16 %v5069_v42, %v5068_v47  ;;  %v17399_v34 = vld [vmem:[#allocation32_spill] sm:$0xff] }
 0x2e4   :  { %v5072_v42 = vld [vmem:[%s16699_s3 + $0x5b0] sm:$0xff] }
 0x2e6   :  { %10646 = vmatmul.mubr.msk.f32.gmra.mrb[2].mxu1 %vm686_vm12, %v17393_v53  ;;  %v17400_v53 = vld [vmem:[#allocation33_spill] sm:$0xff] }
 0x2e7   :  { %10648 = vmatprep.mubr.msk.f32.mxu1 %vm686_vm12, %v17394_v24  ;;  %v11499_v24 = vpack.c.bf16 %v5071_v62, %v5070_v6 }
 0x2ea   :  { %10649 = vmatmul.mubr.msk.f32.gmra.mrb[4].mxu1 %vm686_vm12, %v17395_v28  ;;  %v8812_v28 = vrot.slane %v17391_v37, 9 }
 0x2eb   :  { %10651 = vmatprep.mubr.msk.f32.mxu1 %vm686_vm12, %v17396_v22  ;;  %v4867_v22 = vrot.slane %v4865_v1, 4 }
 0x2ec   :  { %v4866_v62 = vsel %vm12322_vm13, %v8812_v28, %v4865_v1  ;;  %v17406_v28 = vld [vmem:[#allocation66_spill] sm:$0xff] }
 0x2ee   :  { %10652 = vmatmul.mubr.msk.f32.gmra.mrb[6].mxu1 %vm686_vm12, %v4697_v5  ;;  %v17401_v5 = vld [vmem:[#allocation42_spill] sm:$0xff] }
 0x2ef   :  { %10670 = vmatprep.mubr.msk.f32.mxu1 %vm686_vm12, %v17398_v30  ;;  %v4868_v47 = vrot.slane %v17401_v5, 5  ;;  %v5073_v30 = vld [vmem:[%s16699_s3 + $0x5b8] sm:$0xff] }
 0x2f0   :  { %v11503_v6 = vpack.c.bf16 %v5073_v30, %v5072_v42 }
 0x2f2   :  { %10671 = vmatmul.mubr.msk.f32.vlgmr.msra.gmra.mrb[8].mxu1 %vm686_vm12, %v17399_v34  ;;  %v17402_v34 = vld [vmem:[#allocation36_spill] sm:$0xff] }
 0x2f3   :  { %11494 = vmatpush3.bf16.msra.mxu1 %v11491_v21  ;;  %10673 = vmatprep.mubr.msk.f32.mxu1 %vm686_vm12, %v17400_v53  ;;  %v17403_v21 = vld [vmem:[#allocation29_spill] sm:$0xff]  ;;  %v4869_v53 = vsel %vm12322_vm13, %v4867_v22, %v4868_v47  ;;  %v4872_v22 = vrot.slane %v14322_v11, 5  ;;  %v17407_v47 = vld [vmem:[#allocation71_spill] sm:$0xff] }
 0x2f4   :  { %11496 = vmatprep.subr.bf16.mxu1 %v11495_v25  ;;  %v4885_v42 = vcombine.low %v4866_v62, %v4869_v53  ;;  %v17410_v53 = vld [vmem:[#allocation31_spill] sm:$0xff] }
 0x2f5   :  { %v4874_v30 = vrot.slane %v4872_v22, 4 }
 0x2f6   :  { %10674 = vmatmul.mubr.msk.f32.gmra.mrb[10].mxu1 %vm686_vm12, %v17402_v34  ;;  %v5256_v34 = vld [vmem:[%s16699_s3 + $0x5c8] sm:$0xff] }
 0x2f7   :  { %10676 = vmatprep.mubr.msk.f32.mxu1 %vm686_vm12, %v17403_v21  ;;  %11498 = vmatpush3.bf16.msra.mxu1 %v11495_v25  ;;  %v17405_v25 = vld [vmem:[#allocation23_spill] sm:$0xff]  ;;  %v11507_v1 = vpack.c.bf16 %v5256_v34, %v5255_v39  ;;  %v17409_v21 = vld [vmem:[#allocation22_spill] sm:$0xff]  ;;  %v17411_v34 = vld [vmem:[#allocation61_spill] sm:$0xff] }
 0x2f8   :  { %11500 = vmatprep.subr.bf16.mxu1 %v11499_v24  ;;  %v4875_v39 = vrot.slane %v17409_v21, 5 }
 0x2fa   :  { %10677 = vmatmul.mubr.msk.f32.gmra.mrb[12].mxu1 %vm686_vm12, %v17404_v2  ;;  %v17408_v2 = vld [vmem:[#allocation72_spill] sm:$0xff]  ;;  %v4876_v62 = vsel %vm12322_vm13, %v4874_v30, %v4875_v39  ;;  %v8830_v39 = vrot.slane %v17391_v37, 10 }
 0x2fb   :  { %10679 = vmatprep.mubr.msk.f32.mxu1 %vm686_vm12, %v17405_v25  ;;  %11502 = vmatpush3.bf16.msra.mxu1 %v11499_v24  ;;  %v8813_v24 = vrot.slane %v17397_v44, 9 }
 0x2fc   :  { %11504 = vmatprep.subr.bf16.mxu1 %v11503_v6 }
 0x2fe   :  { %10680 = vmatmul.mubr.msk.f32.gmra.mrb[14].mxu1 %vm686_vm12, %v4885_v42  ;;  %v17412_v42 = vld [vmem:[#allocation86_spill] sm:$0xff] }
 0x2ff   :  { %10682 = vmatprep.mubr.msk.f32.mxu1 %vm686_vm12, %v17406_v28  ;;  %11506 = vmatpush3.bf16.msra.mxu1 %v11503_v6  ;;  %v4873_v6 = vsel %vm12322_vm13, %v8813_v24, %v4872_v22  ;;  %v5054_v28 = vrot.slane %v17390_v18, 6  ;;  %v5259_v22 = vld [vmem:[%s16699_s3 + $0x5e0] sm:$0xff]  ;;  %v17414_v24 = vld [vmem:[#allocation52_spill] sm:$0xff] }
 0x300   :  { %11508 = vmatprep.subr.bf16.mxu1 %v11507_v1  ;;  %v4886_v25 = vcombine.low %v4873_v6, %v4876_v62  ;;  %v5057_v62 = vrot.slane %v17401_v5, 6 }
 0x301   :  { %v5056_v6 = vrot.slane %v5054_v28, 4 }
 0x302   :  { %10683 = vmatmul.mubr.msk.f32.gmra.mrb[0].mxu1 %vm686_vm12, %v17407_v47  ;;  %v5260_v47 = vld [vmem:[%s16699_s3 + $0x5e8] sm:$0xff] }
 0x303   :  { %10685 = vmatprep.mubr.msk.f32.mxu1 %vm686_vm12, %v17408_v2  ;;  %v17413_v2 = vld [vmem:[#allocation88_spill] sm:$0xff]  ;;  %v11515_v30 = vpack.c.bf16 %v5260_v47, %v5259_v22  ;;  %v5064_v22 = vrot.slane %v17409_v21, 6  ;;  %v17416_v47 = vld [vmem:[#allocation18_spill] sm:$0xff] }
 0x306   :  { %10686 = vmatmul.mubr.msk.f32.gmra.mrb[2].mxu1 %vm686_vm12, %v17359_v29  ;;  %v5257_v29 = vld [vmem:[%s16699_s3 + $0x5d0] sm:$0xff] }
 0x307   :  { %10688 = vmatprep.mubr.msk.f32.mxu1 %vm686_vm12, %v17361_v0  ;;  %v5258_v0 = vld [vmem:[%s16699_s3 + $0x5d8] sm:$0xff] }
 0x308   :  { %v11511_v56 = vpack.c.bf16 %v5258_v0, %v5257_v29  ;;  %v5058_v29 = vsel %vm12356_vm15, %v5056_v6, %v5057_v62  ;;  %v5430_v0 = vld [vmem:[%s16699_s3 + $0x600] sm:$0xff]  ;;  %v5436_v62 = vld [vmem:[%s16699_s3 + $0x630] sm:$0xff] }
 0x30a   :  { %10689 = vmatmul.mubr.msk.f32.gmra.mrb[4].mxu1 %vm686_vm12, %v17410_v53  ;;  %v5261_v53 = vld [vmem:[%s16699_s3 + $0x5f0] sm:$0xff] }
 0x30b   :  { %10691 = vmatprep.mubr.msk.f32.mxu1 %vm686_vm12, %v17411_v34  ;;  %v5262_v34 = vld [vmem:[%s16699_s3 + $0x5f8] sm:$0xff] }
 0x30c   :  { %v11519_v37 = vpack.c.bf16 %v5262_v34, %v5261_v53  ;;  %v5437_v53 = vld [vmem:[%s16699_s3 + $0x638] sm:$0xff] }
 0x30d   :  { %v11535_v34 = vpack.c.bf16 %v5437_v53, %v5436_v62 }
 0x30e   :  { %10692 = vmatmul.mubr.msk.f32.gmra.mrb[6].mxu1 %vm686_vm12, %v4886_v25  ;;  %v5055_v25 = vsel %vm12356_vm15, %v8830_v39, %v5054_v28  ;;  %v5061_v28 = vrot.slane %v14322_v11, 6  ;;  %v17419_v39 = vld [vmem:[#allocation39_spill] sm:$0xff] }
 0x30f   :  { %10710 = vmatprep.mubr.msk.f32.mxu1 %vm686_vm12, %v17412_v42  ;;  %v5074_v42 = vcombine.low %v5055_v25, %v5058_v29 }
 0x312   :  { %10711 = vmatmul.mubr.msk.f32.vlgmr.msra.gmra.mrb[8].mxu1 %vm686_vm12, %v17413_v2  ;;  %v17418_v2 = vld [vmem:[#allocation80_spill] sm:$0xff] }
 0x313   :  { %11510 = vmatpush3.bf16.msra.mxu1 %v11507_v1  ;;  %10713 = vmatprep.mubr.msk.f32.mxu1 %vm686_vm12, %v17414_v24  ;;  %v17415_v1 = vld [vmem:[#allocation35_spill] sm:$0xff]  ;;  %v5434_v24 = vld [vmem:[%s16699_s3 + $0x620] sm:$0xff] }
 0x314   :  { %11512 = vmatprep.subr.bf16.mxu1 %v11511_v56 }
 0x316   :  { %10714 = vmatmul.mubr.msk.f32.gmra.mrb[10].mxu1 %vm686_vm12, %v17368_v60  ;;  %v5431_v60 = vld [vmem:[%s16699_s3 + $0x608] sm:$0xff] }
 0x317   :  { %10716 = vmatprep.mubr.msk.f32.mxu1 %vm686_vm12, %v17415_v1  ;;  %11514 = vmatpush3.bf16.msra.mxu1 %v11511_v56  ;;  %v11523_v56 = vpack.c.bf16 %v5431_v60, %v5430_v0  ;;  %v17421_v1 = vld [vmem:[#allocation56_spill] sm:$0xff] }
 0x318   :  { %11516 = vmatprep.subr.bf16.mxu1 %v11515_v30 }
 0x31a   :  { %10717 = vmatmul.mubr.msk.f32.gmra.mrb[12].mxu1 %vm686_vm12, %v14052_v33  ;;  %v8831_v33 = vrot.slane %v17397_v44, 10 }
 0x31b   :  { %10719 = vmatprep.mubr.msk.f32.mxu1 %vm686_vm12, %v14417_v19  ;;  %11518 = vmatpush3.bf16.msra.mxu1 %v11515_v30  ;;  %v5063_v19 = vrot.slane %v5061_v28, 4  ;;  %v5435_v30 = vld [vmem:[%s16699_s3 + $0x628] sm:$0xff] }
 0x31c   :  { %11520 = vmatprep.subr.bf16.mxu1 %v11519_v37  ;;  %v11531_v6 = vpack.c.bf16 %v5435_v30, %v5434_v24 }
 0x31e   :  { %10720 = vmatmul.mubr.msk.f32.gmra.mrb[14].mxu1 %vm686_vm12, %v5074_v42 }
 0x31f   :  { %10722 = vmatprep.mubr.msk.f32.mxu1 %vm686_vm12, %v17371_v35  ;;  %11522 = vmatpush3.bf16.msra.mxu1 %v11519_v37  ;;  %v5062_v35 = vsel %vm12356_vm15, %v8831_v33, %v5061_v28 }
 0x320   :  { %11524 = vmatprep.subr.bf16.mxu1 %v11523_v56 }
 0x322   :  { %10723 = vmatmul.mubr.msk.f32.gmra.mrb[0].mxu1 %vm686_vm12, %v17330_v50  ;;  %v5065_v50 = vsel %vm12356_vm15, %v5063_v19, %v5064_v22 }
 0x323   :  { %10725 = vmatprep.mubr.msk.f32.mxu1 %vm686_vm12, %v17372_v49  ;;  %v17417_v49 = vld [vmem:[#allocation68_spill] sm:$0xff]  ;;  %v5075_v44 = vcombine.low %v5062_v35, %v5065_v50 }
 0x326   :  { %10726 = vmatmul.mubr.msk.f32.gmra.mrb[2].mxu1 %vm686_vm12, %v17332_v20  ;;  %v5432_v20 = vld [vmem:[%s16699_s3 + $0x610] sm:$0xff] }
 0x327   :  { %10728 = vmatprep.mubr.msk.f32.mxu1 %vm686_vm12, %v17373_v14  ;;  %v5433_v14 = vld [vmem:[%s16699_s3 + $0x618] sm:$0xff] }
 0x328   :  { %v11527_v27 = vpack.c.bf16 %v5433_v14, %v5432_v20 }
 0x32a   :  { %10729 = vmatmul.mubr.msk.f32.gmra.mrb[4].mxu1 %vm686_vm12, %v17416_v47 }
 0x32b   :  { %10731 = vmatprep.mubr.msk.f32.mxu1 %vm686_vm12, %v17417_v49 }
 0x32e   :  { %10732 = vmatmul.mubr.msk.f32.gmra.mrb[6].mxu1 %vm686_vm12, %v5075_v44 }
 0x32f   :  { %10750 = vmatprep.mubr.msk.f32.mxu1 %vm686_vm12, %v17418_v2 }
 0x332   :  { %10751 = vmatmul.mubr.msk.f32.vlgmr.msra.gmra.mrb[8].mxu1 %vm686_vm12, %v17419_v39 }
 0x333   :  { %11526 = vmatpush3.bf16.msra.mxu1 %v11523_v56  ;;  %10753 = vmatprep.mubr.msk.f32.mxu1 %vm686_vm12, %v17379_v23  ;;  %v17420_v23 = vld [vmem:[#allocation57_spill] sm:$0xff] }
 0x334   :  { %11528 = vmatprep.subr.bf16.mxu1 %v11527_v27  ;;  %v17422_v37 = vcombine.low %v17420_v23, %v17421_v1  ;;  %v17429_v1 = vld [vmem:[#allocation51_spill] sm:$0xff] }
 0x336   :  { %10754 = vmatmul.mubr.msk.f32.gmra.mrb[10].mxu1 %vm686_vm12, %v13311_v8  ;;  %v17423_v8 = vld [vmem:[#allocation77_spill] sm:$0xff] }
 0x337   :  { %10756 = vmatprep.mubr.msk.f32.mxu1 %vm686_vm12, %v17340_v9  ;;  %11530 = vmatpush3.bf16.msra.mxu1 %v11527_v27  ;;  %v14905_v9 = vld [vmem:[%s16702_s4] ss:$0 sm:$0xff] }
 0x338   :  { %11532 = vmatprep.subr.bf16.mxu1 %v11531_v6 }
 0x33a   :  { %10757 = vmatmul.mubr.msk.f32.gmra.mrb[12].mxu1 %vm686_vm12, %v13610_v51 }
 0x33b   :  { %10759 = vmatprep.mubr.msk.f32.mxu1 %vm686_vm12, %v14503_v31  ;;  %11534 = vmatpush3.bf16.msra.mxu1 %v11531_v6  ;;  %v17428_v6 = vld [vmem:[#allocation73_spill] sm:$0xff] }
 0x33c   :  { %11536 = vmatprep.subr.bf16.mxu1 %v11535_v34 }
 0x33e   :  { %10760 = vmatmul.mubr.msk.f32.gmra.mrb[14].mxu1 %vm686_vm12, %v17422_v37 }
 0x33f   :  { %10762 = vmatprep.mubr.msk.f32.mxu1 %vm686_vm12, %v13416_v7  ;;  %11538 = vmatpush3.bf16.msra.mxu1 %v11535_v34  ;;  %v17424_v7 = vld [vmem:[#allocation59_spill] sm:$0xff] }
 0x340   :  { %v17425_v51 = vcombine.low %v17423_v8, %v17424_v7 }
 0x342   :  { %10763 = vmatmul.mubr.msk.f32.gmra.mrb[0].mxu1 %vm686_vm12, %v13423_v55  ;;  %v5990_v55 = vld [vmem:[%s16701_s5 + $0x28] sm:$0xff] }
 0x343   :  { %10765 = vmatprep.mubr.msk.f32.mxu1 %vm686_vm12, %v13440_v26 }
 0x346   :  { %10766 = vmatmul.mubr.msk.f32.gmra.mrb[2].mxu1 %vm686_vm12, %v13382_v3  ;;  %v5438_v3 = vcombine.low %v17390_v18, %v17401_v5 }
 0x347   :  { %10768 = vmatprep.mubr.msk.f32.mxu1 %vm686_vm12, %v17341_v40 }
 0x34a   :  { %10769 = vmatmul.mubr.msk.f32.gmra.mrb[4].mxu1 %vm686_vm12, %v13634_v17 }
 0x34b   :  { %10771 = vmatprep.mubr.msk.f32.mxu1 %vm686_vm12, %v17386_v61 }
 0x34e   :  { %10772 = vmatmul.mubr.msk.f32.gmra.mrb[6].mxu1 %vm686_vm12, %v17425_v51  ;;  %v17432_v51 = vld [vmem:[#allocation8_spill] sm:$0xff] }
 0x34f   :  { %10790 = vmatprep.mubr.msk.f32.mxu1 %vm686_vm12, %v13543_v43  ;;  %v5991_v43 = vld [vmem:[%s16701_s5 + $0x30] sm:$0xff] }
 0x352   :  { %10791 = vmatmul.mubr.msk.f32.vlgmr.msra.gmra.mrb[8].mxu1 %vm686_vm12, %v13555_v59  ;;  %v5989_v59 = vld [vmem:[%s16701_s5 + $0x20] sm:$0xff] }
 0x353   :  { %10793 = vmatprep.mubr.msk.f32.mxu1 %vm686_vm12, %v13573_v48  ;;  %v16941_v48 = vmov 0.0|0.0   ;;  %v11540_v26 = vpack.c.bf16 %v5990_v55, %v5989_v59  ;;  %v17438_v59 = vld [vmem:[#allocation85_spill] sm:$0xff] }
 0x354   :  { %11539 = vmatprep.subr.bf16.mxu0 %v16941_v48 }
 0x355   :  { %11541 = vmatpush3.bf16.msra.mxu0 %v11540_v26 }
 0x356   :  { %10794 = vmatmul.mubr.msk.f32.gmra.mrb[10].mxu1 %vm686_vm12, %v13577_v41  ;;  %v5439_v41 = vcombine.low %v14322_v11, %v17409_v21  ;;  %11542 = vmatprep.subr.bf16.mxu0 %v16941_v48 }
 0x357   :  { %10796 = vmatprep.mubr.msk.f32.mxu1 %vm686_vm12, %v13621_v4  ;;  %v5992_v4 = vld [vmem:[%s16701_s5 + $0x38] sm:$0xff] }
 0x358   :  { %v11543_v17 = vpack.c.bf16 %v5992_v4, %v5991_v43 }
 0x35a   :  { %10797 = vmatmul.mubr.msk.f32.gmra.mrb[12].mxu1 %vm686_vm12, %v14177_v13  ;;  %11544 = vmatpush3.bf16.msra.mxu0 %v11543_v17  ;;  %v17436_v17 = vld [vmem:[#allocation82_spill] sm:$0xff] }
 0x35b   :  { %10799 = vmatprep.mubr.msk.f32.mxu1 %vm686_vm12, %v14583_v12  ;;  %11545 = vmatprep.subr.bf16.mxu0 %v16941_v48 }
 0x35e   :  { %10800 = vmatmul.mubr.msk.f32.gmra.mrb[14].mxu1 %vm686_vm12, %v5438_v3 }
 0x35f   :  { %10802 = vmatprep.mubr.msk.f32.mxu1 %vm686_vm12, %v13672_v58  ;;  %v16944_v58 = vmov 0.0  }
 0x360   :  { %10822 = vmatprep.mubr.msk.f32.mxu0 %vm11993_vm0, %v16944_v58 }
 0x362   :  { %10803 = vmatmul.mubr.msk.f32.gmra.mrb[0].mxu1 %vm686_vm12, %v13678_v32  ;;  %v11995_v32 = vmov 1983009808  }
 0x363   :  { %10805 = vmatprep.mubr.msk.f32.mxu1 %vm686_vm12, %v13696_v52  ;;  %v5658_v52 = vunpack.c.l.s4 %v11995_v32 }
 0x365   :  { %v5659_v40 = vunpack.c.0.s8 %v5658_v52 }
 0x366   :  { %10806 = vmatmul.mubr.msk.f32.gmra.mrb[2].mxu1 %vm686_vm12, %v13704_v15  ;;  %v5660_v15 = vlaneseq }
 0x367   :  { %10808 = vmatprep.mubr.msk.f32.mxu1 %vm686_vm12, %v13722_v54 }
 0x368   :  { %v5661_v13 = vshrl.u32 %v5660_v15, 7 }
 0x36a   :  { %10809 = vmatmul.mubr.msk.f32.gmra.mrb[4].mxu1 %vm686_vm12, %v14197_v10  ;;  %v14910_v12 = vsub.s32 %v5659_v40, %v5661_v13  ;;  %v17437_v13 = vld [vmem:[#allocation83_spill] sm:$0xff] }
 0x36b   :  { %10811 = vmatprep.mubr.msk.f32.mxu1 %vm686_vm12, %v17389_v16 }
 0x36e   :  { %10812 = vmatmul.mubr.msk.f32.gmra.mrb[6].mxu1 %vm686_vm12, %v5439_v41 }
 0x425   :  { %v10792_v54 = vpop.f32.mrb[8].mxu1 }
 0x426   :  { %v11601_v10 = vadd.f32 %v10792_v54, %v14515_v46  ;;  %v5510_v11 = vpop.f32.mrb[9].mxu1 }
 0x427   :  { %v11602_v31 = vadd.f32 %v5510_v11, %v14519_v36  ;;  %v14980_v11 = vld [vmem:[%s16701_s5] sm:$0xff] }
 0x428   :  { %v5613_v61 = vadd.f32 %v11601_v10, %v14905_v9 }
 0x429   :  { %v5612_v16 = vadd.f32 %v11602_v31, %v14905_v9  ;;  %v10795_v18 = vpop.f32.mrb[10].mxu1 }
 0x42a   :  { %v11603_v5 = vadd.f32 %v10795_v18, %v14523_v57  ;;  %v5520_v21 = vpop.f32.mrb[11].mxu1  ;;  %v14915_v0 = vmax.f32 %v5613_v61, 0.0 }
 0x42b   :  { %v5628_v25 = vmax.f32 %v5612_v16, 0.0  ;;  %v11604_v29 = vadd.f32 %v5520_v21, %v14527_v63  ;;  %v14992_v21 = vld [vmem:[%s16701_s5 + $0x10] sm:$0xff] }
 0x42c   :  { %v14925_v33 = vrot.slane %v14915_v0, %v14910_v12  ;;  %v5615_v20 = vadd.f32 %v11603_v5, %v14905_v9  ;;  %v5672_v26 = vcombine.high %v14915_v0, %v14915_v0  ;;  %v14987_v5 = vld [vmem:[%s16701_s5 + $0x8] sm:$0xff] }
 0x42d   :  { %v5656_v60 = vcombine.high %v5628_v25, %v5628_v25  ;;  %v5663_v46 = vrot.slane %v5628_v25, %v14910_v12  ;;  %v10798_v42 = vpop.f32.mrb[12].mxu1  ;;  %v5614_v43 = vadd.f32 %v11604_v29, %v14905_v9  ;;  %v14997_v25 = vld [vmem:[%s16701_s5 + $0x18] sm:$0xff] }
 0x42e   :  { %v5530_v36 = vpop.f32.mrb[13].mxu1  ;;  %v11605_v27 = vadd.f32 %v10798_v42, %v14531_v45  ;;  %v14949_v53 = vcombine.high %v14925_v33, %v14925_v33  ;;  %v5631_v8 = vmax.f32 %v5615_v20, 0.0  ;;  %v11546_v20 = vpack.c.bf16 %v14987_v5, %v14980_v11 }
 0x42f   :  { %v14919_v56 = vrot.slane %v5656_v60, %v14910_v12  ;;  %v14921_v28 = vcombine.high %v5663_v46, %v5663_v46  ;;  %v11606_v24 = vadd.f32 %v5530_v36, %v14535_v38  ;;  %v17431_v38 = vld [vmem:[#allocation63_spill] sm:$0xff]  ;;  %v8883_v15 = vrot.slane %v5663_v46, 9 }
 0x430   :  { %v5617_v40 = vadd.f32 %v11605_v27, %v14905_v9  ;;  %v5881_v29 = vrot.slane %v14949_v53, 7  ;;  %v5704_v60 = vcombine.high %v5631_v8, %v5631_v8  ;;  %v15009_v27 = vrot.slane %v5672_v26, %v14910_v12 }
 0x431   :  { %v6275_v57 = vcombine.low %v5663_v46, %v14921_v28  ;;  %v10801_v19 = vpop.f32.mrb[14].mxu1  ;;  %v6276_v63 = vcombine.low %v14919_v56, %v14925_v33  ;;  %v5871_v47 = vrot.slane %v14921_v28, 7  ;;  %v5852_v34 = vcombine.high %v14919_v56, %v14919_v56 }
 0x432   :  { %v5540_v50 = vpop.f32.mrb[15].mxu1  ;;  %v11607_v62 = vadd.f32 %v10801_v19, %v17428_v6  ;;  %v5874_v23 = vrot.slane %v14919_v56, 7  ;;  %v5616_v16 = vadd.f32 %v11606_v24, %v14905_v9  ;;  %v15020_v6 = vrot.slane %v5631_v8, %v14910_v12 }
 0x433   :  { %v14936_v49 = vrot.slane %v6275_v57, %v14910_v12  ;;  %v14939_v44 = vrot.slane %v6276_v63, %v14910_v12  ;;  %v5873_v39 = vrot.slane %v5871_v47, 2  ;;  %v11608_v37 = vadd.f32 %v5540_v50, %v17429_v1 }
 0x434   :  { %v14956_v45 = vadd.f32 %v11607_v62, %v14905_v9  ;;  %v5876_v31 = vrot.slane %v5874_v23, 2  ;;  %v5877_v61 = vrot.slane %v5852_v34, 7  ;;  %v5872_v0 = vsel %vm14962_vm2, %v8883_v15, %v5871_v47  ;;  %v17439_v15 = vld [vmem:[#allocation87_spill] sm:$0xff] }
 0x435   :  { %17426 = vst [vmem:[#allocation3_spill] sm:$0xff] %v14936_v49  ;;  %17427 = vst [vmem:[#allocation40_spill] sm:$0xff] %v14939_v44  ;;  %v10804_v14 = vpop.f32.mrb[0].mxu1  ;;  %v14970_v4 = vadd.f32 %v11608_v37, %v14905_v9  ;;  %v5875_v54 = vsel %vm14962_vm2, %v5873_v39, %v5874_v23  ;;  %v5630_v57 = vmax.f32 %v5614_v43, 0.0  ;;  %v8884_v63 = vrot.slane %v14925_v33, 9 }
 0x436   :  { %v5550_v30 = vpop.f32.mrb[1].mxu1  ;;  %17430 = vst [vmem:[#allocation75_spill] sm:$0xff] %v14956_v45  ;;  %v11609_v7 = vadd.f32 %v10804_v14, %v17431_v38  ;;  %v5993_v36 = vcombine.low %v5872_v0, %v5875_v54  ;;  %v5633_v50 = vmax.f32 %v5617_v40, 0.0  ;;  %v11549_v14 = vpack.c.bf16 %v14997_v25, %v14992_v21 }
 0x437   :  { %v11610_v3 = vadd.f32 %v5550_v30, %v17432_v51  ;;  %v5632_v47 = vmax.f32 %v5616_v16, 0.0  ;;  %v5878_v30 = vsel %vm14962_vm2, %v5876_v31, %v5877_v61  ;;  %v15017_v39 = vsel %vm14962_vm2, %v8884_v63, %v5881_v29 }
 0x438   :  { %v5621_v46 = vadd.f32 %v11609_v7, %v14905_v9  ;;  %v15023_v62 = vrot.slane %v5704_v60, %v14910_v12  ;;  %v6001_v1 = vrot.slane %v5993_v36, %v14910_v12  ;;  %v5688_v37 = vcombine.high %v5630_v57, %v5630_v57 }
 0x439   :  { %v10807_v41 = vpop.f32.mrb[2].mxu1  ;;  %v5620_v18 = vadd.f32 %v11610_v3, %v14905_v9  ;;  %v15027_v38 = vrot.slane %v5630_v57, %v14910_v12  ;;  %v5736_v3 = vcombine.high %v5633_v50, %v5633_v50  ;;  %v5994_v8 = vcombine.low %v5878_v30, %v15017_v39 }
 0x43a   :  { %v11611_v32 = vadd.f32 %v10807_v41, %v17436_v17  ;;  %v5560_v52 = vpop.f32.mrb[3].mxu1  ;;  %v5637_v34 = vmax.f32 %v5621_v46, 0.0  ;;  %v15036_v43 = vrot.slane %v5633_v50, %v14910_v12  ;;  %v5720_v17 = vcombine.high %v5632_v47, %v5632_v47 }
 0x43b   :  { %v11612_v10 = vadd.f32 %v5560_v52, %v17437_v13  ;;  %v5636_v24 = vmax.f32 %v5620_v18, 0.0  ;;  %v15041_v40 = vrot.slane %v5632_v47, %v14910_v12  ;;  %v15049_v31 = vcombine.high %v15020_v6, %v15020_v6 }
 0x43c   :  { %v5623_v41 = vadd.f32 %v11611_v32, %v14905_v9  ;;  %v5768_v13 = vcombine.high %v5637_v34, %v5637_v34  ;;  %v15044_v11 = vrot.slane %v5637_v34, %v14910_v12  ;;  %v6008_v32 = vrot.slane %v5994_v8, %v14910_v12 }
 0x43d   :  { %v10810_v42 = vpop.f32.mrb[4].mxu1  ;;  %v15030_v7 = vrot.slane %v5636_v24, %v14910_v12  ;;  %v5622_v52 = vadd.f32 %v11612_v10, %v14905_v9  ;;  %17440 = vst [vmem:[#allocation16_spill] sm:$0xff] %v15041_v40  ;;  %v15052_v61 = vrot.slane %v5688_v37, %v14910_v12  ;;  %v5752_v16 = vcombine.high %v5636_v24, %v5636_v24 }
 0x43e   :  { %v5570_v19 = vpop.f32.mrb[5].mxu1  ;;  %v11613_v26 = vadd.f32 %v10810_v42, %v17438_v59  ;;  %v15060_v18 = vcombine.high %v15027_v38, %v15027_v38  ;;  %v15063_v5 = vrot.slane %v5736_v3, %v14910_v12  ;;  %v5639_v0 = vmax.f32 %v5623_v41, 0.0 }
 0x43f   :  { %v11614_v54 = vadd.f32 %v5570_v19, %v17439_v15  ;;  %17441 = vst [vmem:[#allocation13_spill] sm:$0xff] %v15052_v61  ;;  %v15056_v10 = vcombine.high %v15030_v7, %v15030_v7  ;;  %v15067_v60 = vcombine.high %v15009_v27, %v15009_v27  ;;  %v15071_v46 = vcombine.high %v15036_v43, %v15036_v43 }
 0x440   :  { %v5638_v42 = vmax.f32 %v5622_v52, 0.0  ;;  %v6009_v36 = vcombine.low %v6001_v1, %v6008_v32  ;;  %v5625_v57 = vadd.f32 %v11613_v26, %v14905_v9  ;;  %v15075_v19 = vrot.slane %v5720_v17, %v14910_v12  ;;  %v17447_v32 = vld [vmem:[#allocation48_spill] sm:$0xff] }
 0x441   :  { %v10813_v23 = vpop.f32.mrb[6].mxu1  ;;  %v15079_v63 = vcombine.high %v15041_v40, %v15041_v40  ;;  %v15082_v50 = vrot.slane %v5768_v13, %v14910_v12  ;;  %v15086_v47 = vcombine.high %v15044_v11, %v15044_v11  ;;  %v15089_v24 = vrot.slane %v5752_v16, %v14910_v12 }
 0x442   :  { %v5580_v51 = vpop.f32.mrb[7].mxu1  ;;  %17442 = vst [vmem:[#allocation46_spill] sm:$0xff] %v15075_v19  ;;  %v16943_v34 = vrot.slane %v15056_v10, 7  ;;  %10823 = vmatmul.mubr.msk.f32.vlgmr.msra.gmra.mrb[52].mxu0 %vm6146_vm3, %v6009_v36  ;;  %v5624_v1 = vadd.f32 %v11614_v54, %v14905_v9  ;;  %v5800_v37 = vcombine.high %v5639_v0, %v5639_v0  ;;  %v5883_v3 = vrot.slane %v5881_v29, 2 }
 0x443   :  { %17443 = vst [vmem:[#allocation79_spill] sm:$0xff] %v15079_v63  ;;  %17444 = vst [vmem:[#allocation20_spill] sm:$0xff] %v15082_v50  ;;  %11547 = vmatpush3.bf16.msra.mxu0 %v11546_v20  ;;  %10825 = vmatprep.mubr.msk.f32.mxu0 %vm11993_vm0, %v16944_v58  ;;  %v5884_v41 = vrot.slane %v15009_v27, 7  ;;  %v5887_v8 = vrot.slane %v15067_v60, 7  ;;  %v15102_v59 = vrot.slane %v5639_v0, %v14910_v12  ;;  %v5641_v17 = vmax.f32 %v5625_v57, 0.0  ;;  %v17448_v0 = vld [vmem:[#allocation67_spill] sm:$0xff] }
 0x444   :  { %17445 = vst [vmem:[#allocation24_spill] sm:$0xff] %v15086_v47  ;;  %17446 = vst [vmem:[#allocation4_spill] sm:$0xff] %v15089_v24  ;;  %v5784_v26 = vcombine.high %v5638_v42, %v5638_v42  ;;  %v8885_v52 = vrot.slane %v15027_v38, 9  ;;  %11548 = vmatprep.subr.bf16.mxu0 %v16941_v48  ;;  %v5891_v29 = vrot.slane %v15060_v18, 7  ;;  %v5894_v54 = vrot.slane %v15052_v61, 7 }
 0x445   :  { %v15108_v20 = vsel %vm14962_vm2, %v5883_v3, %v5884_v41  ;;  %v5886_v15 = vrot.slane %v5884_v41, 2  ;;  %v11615_v16 = vadd.f32 %v10813_v23, %v17447_v32  ;;  %v11616_v36 = vadd.f32 %v5580_v51, %v17448_v0 }
 0x446   :  { %v15118_v57 = vcombine.high %v15052_v61, %v15052_v61  ;;  %v5640_v2 = vmax.f32 %v5624_v1, 0.0  ;;  %v15126_v41 = vsel %vm14962_vm2, %v8885_v52, %v5891_v29  ;;  %v5893_v35 = vrot.slane %v5891_v29, 2 }
 0x447   :  { %v15122_v3 = vsel %vm14962_vm2, %v5886_v15, %v5887_v8  ;;  %11550 = vmatpush3.bf16.msra.mxu0 %v11549_v14  ;;  %v15132_v23 = vrot.slane %v5638_v42, %v14910_v12  ;;  %v15139_v8 = vadd.f32 %v11615_v16, %v14905_v9  ;;  %v15147_v21 = vadd.f32 %v11616_v36, %v14905_v9 }
 0x448   :  { %17449 = vst [vmem:[#allocation81_spill] sm:$0xff] %v15118_v57  ;;  %v6010_v51 = vcombine.low %v15108_v20, %v15122_v3  ;;  %11551 = vmatprep.subr.bf16.mxu0 %v16941_v48  ;;  %v15144_v52 = vsel %vm14962_vm2, %v5893_v35, %v5894_v54  ;;  %v5896_v25 = vrot.slane %v5894_v54, 2  ;;  %v5897_v14 = vrot.slane %v15118_v57, 7 }
 0x449   :  { %17450 = vst [vmem:[#allocation11_spill] sm:$0xff] %v15132_v23  ;;  %17451 = vst [vmem:[#allocation5_spill] sm:$0xff] %v15139_v8  ;;  %v15152_v42 = vrot.slane %v16943_v34, 2  ;;  %v15155_v15 = vrot.slane %v5800_v37, %v14910_v12  ;;  %v5832_v29 = vcombine.high %v5641_v17, %v5641_v17  ;;  %v6011_v32 = vcombine.low %v15126_v41, %v15144_v52 }
 0x44a   :  { %17452 = vst [vmem:[#allocation6_spill] sm:$0xff] %v15144_v52  ;;  %v15160_v35 = vrot.slane %v5641_v17, %v14910_v12  ;;  %v5816_v16 = vcombine.high %v5640_v2, %v5640_v2  ;;  %v15164_v9 = vcombine.high %v15023_v62, %v15023_v62  ;;  %v5901_v54 = vrot.slane %v15049_v31, 7 }
 0x44b   :  { %v15168_v0 = vrot.slane %v5640_v2, %v14910_v12  ;;  %v6018_v37 = vrot.slane %v6010_v51, %v14910_v12  ;;  %v15172_v36 = vrot.slane %v6011_v32, %v14910_v12  ;;  %v5904_v48 = vrot.slane %v15023_v62, 7 }
 0x44c   :  { %17453 = vst [vmem:[#allocation41_spill] sm:$0xff] %v15164_v9  ;;  %v15177_v17 = vcombine.high %v15102_v59, %v15102_v59  ;;  %v15181_v1 = vsel %vm14962_vm2, %v5896_v25, %v5897_v14  ;;  %v8886_v13 = vrot.slane %v15020_v6, 9  ;;  %v5903_v22 = vrot.slane %v5901_v54, 2 }
 0x44d   :  { %17454 = vst [vmem:[#allocation58_spill] sm:$0xff] %v15172_v36  ;;  %17455 = vst [vmem:[#allocation65_spill] sm:$0xff] %v15181_v1  ;;  %v15185_v2 = vrot.slane %v5784_v26, %v14910_v12  ;;  %v15189_v51 = vcombine.high %v15132_v23, %v15132_v23  ;;  %v15192_v32 = vrot.slane %v5832_v29, %v14910_v12  ;;  %v5906_v14 = vrot.slane %v5904_v48, 2 }
 0x44e   :  { %v6026_v30 = vcombine.low %v6018_v37, %v15172_v36  ;;  %v15197_v34 = vsel %vm14962_vm2, %v8886_v13, %v5901_v54  ;;  %v15201_v25 = vsel %vm14962_vm2, %v5903_v22, %v5904_v48  ;;  %v5907_v26 = vrot.slane %v15164_v9, 7 }
 0x44f   :  { %17456 = vst [vmem:[#allocation49_spill] sm:$0xff] %v15197_v34  ;;  %17457 = vst [vmem:[#allocation17_spill] sm:$0xff] %v15201_v25  ;;  %v15206_v58 = vcombine.high %v15160_v35, %v15160_v35  ;;  %v15209_v29 = vrot.slane %v5816_v16, %v14910_v12  ;;  %v15213_v37 = vcombine.high %v15168_v0, %v15168_v0  ;;  %v17458_v13 = vmov 0.0  }
 0x450   :  { %10826 = vmatmul.mubr.msk.f32.gmra.mrb[54].mxu0 %vm6146_vm3, %v6026_v30  ;;  %v6027_v22 = vcombine.low %v15181_v1, %v15197_v34  ;;  %v15222_v48 = vsel %vm14962_vm2, %v5906_v14, %v5907_v26  ;;  %v15226_v16 = vcombine.high %v15075_v19, %v15075_v19  ;;  %v8887_v54 = vrot.slane %v15041_v40, 9 }
 0x451   :  { %10828 = vmatprep.mubr.msk.f32.mxu0 %vm11993_vm0, %v17458_v13  ;;  %17459 = vst [vmem:[#allocation37_spill] sm:$0xff] %v15222_v48  ;;  %v5911_v8 = vrot.slane %v15079_v63, 7  ;;  %v6028_v30 = vcombine.low %v15201_v25, %v15222_v48  ;;  %v5914_v9 = vrot.slane %v15075_v19, 7  ;;  %v8888_v34 = vrot.slane %v15036_v43, 9 }
 0x452   :  { %17460 = vst [vmem:[#allocation14_spill] sm:$0xff] %v15226_v16  ;;  %v15233_v57 = vrot.slane %v6027_v22, %v14910_v12  ;;  %v5917_v52 = vrot.slane %v15226_v16, 7  ;;  %v5921_v1 = vrot.slane %v15071_v46, 7  ;;  %v15250_v25 = vcombine.high %v15063_v5, %v15063_v5 }
 0x453   :  { %v15239_v14 = vsel %vm14962_vm2, %v8887_v54, %v5911_v8  ;;  %v5913_v26 = vrot.slane %v5911_v8, 2  ;;  %v15244_v45 = vrot.slane %v6028_v30, %v14910_v12  ;;  %v5916_v48 = vrot.slane %v5914_v9, 2 }
 0x454   :  { %17461 = vst [vmem:[#allocation34_spill] sm:$0xff] %v15233_v57  ;;  %17462 = vst [vmem:[#allocation91_spill] sm:$0xff] %v15239_v14  ;;  %v15258_v8 = vsel %vm14962_vm2, %v8888_v34, %v5921_v1  ;;  %v5923_v16 = vrot.slane %v5921_v1, 2  ;;  %v5924_v30 = vrot.slane %v15063_v5, 7  ;;  %v17469_v49 = vrot.slane %v15056_v10, 7 }
 0x455   :  { %17463 = vst [vmem:[#allocation92_spill] sm:$0xff] %v15244_v45  ;;  %17464 = vst [vmem:[#allocation44_spill] sm:$0xff] %v15250_v25  ;;  %v15254_v54 = vsel %vm14962_vm2, %v5913_v26, %v5914_v9  ;;  %v6043_v44 = vcombine.low %v15233_v57, %v15244_v45  ;;  %v15265_v22 = vsel %vm14962_vm2, %v5916_v48, %v5917_v52  ;;  %v5927_v9 = vrot.slane %v15250_v25, 7 }
 0x456   :  { %17465 = vst [vmem:[#allocation27_spill] sm:$0xff] %v15254_v54  ;;  %17466 = vst [vmem:[#allocation45_spill] sm:$0xff] %v15258_v8  ;;  %v6044_v36 = vcombine.low %v15239_v14, %v15254_v54  ;;  %v6045_v26 = vcombine.low %v15265_v22, %v15258_v8  ;;  %v15274_v34 = vsel %vm14962_vm2, %v5923_v16, %v5924_v30  ;;  %v5926_v1 = vrot.slane %v5924_v30, 2 }
 0x457   :  { %17467 = vst [vmem:[#allocation50_spill] sm:$0xff] %v15265_v22  ;;  %17468 = vst [vmem:[#allocation25_spill] sm:$0xff] %v15274_v34  ;;  %v17470_v45 = vrot.slane %v15030_v7, 9  ;;  %10829 = vmatmul.mubr.msk.f32.gmra.mrb[56].mxu0 %vm6146_vm3, %v6043_v44  ;;  %v5934_v57 = vrot.slane %v15089_v24, 7  ;;  %v5858_v8 = vcombine.high %v15089_v24, %v15089_v24  ;;  %v15291_v16 = vcombine.high %v15082_v50, %v15082_v50 }
 0x458   :  { %v15284_v48 = vrot.slane %v6044_v36, %v14910_v12  ;;  %10831 = vmatprep.mubr.msk.f32.mxu0 %vm11993_vm0, %v17458_v13  ;;  %v15296_v30 = vrot.slane %v6045_v26, %v14910_v12  ;;  %v8890_v44 = vrot.slane %v15044_v11, 9  ;;  %v5944_v24 = vrot.slane %v15082_v50, 7 }
 0x459   :  { %v5932_v52 = vsel %vm14962_vm2, %v17470_v45, %v17469_v49  ;;  %v15300_v49 = vsel %vm14962_vm2, %v5926_v1, %v5927_v9  ;;  %v5941_v45 = vrot.slane %v15086_v47, 7  ;;  %v5935_v36 = vsel %vm14962_vm2, %v15152_v42, %v5934_v57 }
 0x45a   :  { %17471 = vst [vmem:[#allocation55_spill] sm:$0xff] %v15284_v48  ;;  %17472 = vst [vmem:[#allocation70_spill] sm:$0xff] %v15296_v30  ;;  %v6061_v54 = vcombine.low %v15274_v34, %v15300_v49  ;;  %v5936_v22 = vrot.slane %v5934_v57, 2  ;;  %v5937_v14 = vrot.slane %v5858_v8, 7  ;;  %v6060_v26 = vcombine.low %v15284_v48, %v15296_v30 }
 0x45b   :  { %17473 = vst [vmem:[#allocation64_spill] sm:$0xff] %v15300_v49  ;;  %v6062_v25 = vcombine.low %v5932_v52, %v5935_v36  ;;  %v15313_v9 = vsel %vm14962_vm2, %v8890_v44, %v5941_v45  ;;  %v5943_v1 = vrot.slane %v5941_v45, 2  ;;  %v5947_v57 = vrot.slane %v15291_v16, 7 }
 0x45c   :  { %17474 = vst [vmem:[#allocation54_spill] sm:$0xff] %v15313_v9  ;;  %v15316_v47 = vrot.slane %v6061_v54, %v14910_v12  ;;  %v5938_v42 = vsel %vm14962_vm2, %v5936_v22, %v5937_v14  ;;  %10832 = vmatmul.mubr.msk.f32.gmra.mrb[58].mxu0 %vm6146_vm3, %v6060_v26  ;;  %v15327_v44 = vcombine.high %v15185_v2, %v15185_v2  ;;  %v8891_v54 = vrot.slane %v15132_v23, 9 }
 0x45d   :  { %v6076_v8 = vrot.slane %v6062_v25, %v14910_v12  ;;  %v6078_v52 = vcombine.low %v5938_v42, %v15313_v9  ;;  %10834 = vmatprep.mubr.msk.f32.mxu0 %vm11993_vm0, %v17458_v13  ;;  %v15334_v14 = vsel %vm14962_vm2, %v5943_v1, %v5944_v24  ;;  %v5946_v22 = vrot.slane %v5944_v24, 2 }
 0x45e   :  { %17475 = vst [vmem:[#allocation74_spill] sm:$0xff] %v15316_v47  ;;  %17476 = vst [vmem:[#allocation60_spill] sm:$0xff] %v15327_v44  ;;  %v5951_v45 = vrot.slane %v15189_v51, 7  ;;  %v5954_v25 = vrot.slane %v15185_v2, 7  ;;  %v5957_v42 = vrot.slane %v15327_v44, 7  ;;  %v8892_v30 = vrot.slane %v15102_v59, 9 }
 0x45f   :  { %17477 = vst [vmem:[#allocation12_spill] sm:$0xff] %v15334_v14  ;;  %v6077_v36 = vcombine.low %v15316_v47, %v6076_v8  ;;  %v6086_v26 = vrot.slane %v6078_v52, %v14910_v12  ;;  %v15344_v48 = vsel %vm14962_vm2, %v5946_v22, %v5947_v57  ;;  %v5961_v52 = vrot.slane %v15177_v17, 7 }
 0x460   :  { %17478 = vst [vmem:[#allocation76_spill] sm:$0xff] %v15344_v48  ;;  %v15348_v1 = vsel %vm14962_vm2, %v8891_v54, %v5951_v45  ;;  %v5953_v24 = vrot.slane %v5951_v45, 2  ;;  %v5956_v9 = vrot.slane %v5954_v25, 2  ;;  %v6079_v8 = vcombine.low %v15334_v14, %v15344_v48 }
 0x461   :  { %17479 = vst [vmem:[#allocation78_spill] sm:$0xff] %v15348_v1  ;;  %10835 = vmatmul.mubr.msk.f32.gmra.mrb[60].mxu0 %vm6146_vm3, %v6077_v36  ;;  %v15356_v47 = vcombine.high %v15155_v15, %v15155_v15  ;;  %v5964_v57 = vrot.slane %v15155_v15, 7  ;;  %v8893_v45 = vrot.slane %v15168_v0, 9  ;;  %v5971_v36 = vrot.slane %v15213_v37, 7 }
 0x462   :  { %10837 = vmatprep.mubr.msk.f32.mxu0 %vm11993_vm0, %v17458_v13  ;;  %v15363_v54 = vsel %vm14962_vm2, %v5953_v24, %v5954_v25  ;;  %v15367_v22 = vsel %vm14962_vm2, %v5956_v9, %v5957_v42  ;;  %v6093_v44 = vrot.slane %v6079_v8, %v14910_v12  ;;  %v15374_v48 = vsel %vm14962_vm2, %v8892_v30, %v5961_v52 }
 0x463   :  { %17480 = vst [vmem:[#allocation84_spill] sm:$0xff] %v15363_v54  ;;  %17481 = vst [vmem:[#allocation38_spill] sm:$0xff] %v15367_v22  ;;  %v6095_v14 = vcombine.low %v15348_v1, %v15363_v54  ;;  %v5963_v49 = vrot.slane %v5961_v52, 2  ;;  %v6096_v25 = vcombine.low %v15367_v22, %v15374_v48  ;;  %v5966_v24 = vrot.slane %v5964_v57, 2 }
 0x464   :  { %17482 = vst [vmem:[#allocation43_spill] sm:$0xff] %v15374_v48  ;;  %v5967_v9 = vrot.slane %v15356_v47, 7  ;;  %v15383_v42 = vsel %vm14962_vm2, %v8893_v45, %v5971_v36  ;;  %v6094_v34 = vcombine.low %v6086_v26, %v6093_v44  ;;  %v5973_v54 = vrot.slane %v5971_v36, 2 }
 0x465   :  { %17483 = vst [vmem:[#allocation90_spill] sm:$0xff] %v15383_v42  ;;  %v15386_v8 = vrot.slane %v6095_v14, %v14910_v12  ;;  %v15390_v30 = vsel %vm14962_vm2, %v5963_v49, %v5964_v57  ;;  %v15393_v52 = vrot.slane %v6096_v25, %v14910_v12  ;;  %v5974_v22 = vrot.slane %v15209_v29, 7 }
 0x466   :  { %17485 = vst [vmem:[#allocation93_spill] sm:$0xff] %v15390_v30  ;;  %v15397_v48 = vsel %vm14962_vm2, %v5966_v24, %v5967_v9  ;;  %v15402_v44 = vcombine.high %v15209_v29, %v15209_v29  ;;  %10838 = vmatmul.mubr.msk.f32.gmra.mrb[62].mxu0 %vm6146_vm3, %v6094_v34  ;;  %v15409_v14 = vcombine.high %v15192_v32, %v15192_v32  ;;  %v8894_v26 = vrot.slane %v15160_v35, 9 }
 0x467   :  { %17484 = vst [vmem:[#allocation10_spill] sm:$0xff] %v15386_v8  ;;  %17486 = vst [vmem:[#allocation47_spill] sm:$0xff] %v15393_v52  ;;  %v6112_v49 = vcombine.low %v15390_v30, %v15397_v48  ;;  %v5981_v57 = vrot.slane %v15206_v58, 7  ;;  %10840 = vmatprep.mubr.msk.f32.mxu0 %vm11993_vm0, %v17458_v13  ;;  %v6111_v45 = vcombine.low %v15386_v8, %v15393_v52  ;;  %v5976_v36 = vrot.slane %v5974_v22, 2 }
 0x468   :  { %17487 = vst [vmem:[#allocation15_spill] sm:$0xff] %v15397_v48  ;;  %17488 = vst [vmem:[#allocation69_spill] sm:$0xff] %v15402_v44  ;;  %v15419_v34 = vsel %vm14962_vm2, %v5973_v54, %v5974_v22  ;;  %v5977_v25 = vrot.slane %v15402_v44, 7  ;;  %v5984_v54 = vrot.slane %v15192_v32, 7  ;;  %v5987_v22 = vrot.slane %v15409_v14, 7 }
 0x469   :  { %17489 = vst [vmem:[#allocation53_spill] sm:$0xff] %v15419_v34  ;;  %v6113_v24 = vcombine.low %v15383_v42, %v15419_v34  ;;  %v15425_v9 = vrot.slane %v6112_v49, %v14910_v12  ;;  %v15429_v48 = vsel %vm14962_vm2, %v8894_v26, %v5981_v57  ;;  %v5983_v30 = vrot.slane %v5981_v57, 2 }
 0x46a   :  { %17491 = vst [vmem:[#allocation89_spill] sm:$0xff] %v15429_v48  ;;  %v15433_v52 = vsel %vm14962_vm2, %v5976_v36, %v5977_v25  ;;  %v6292_v8 = vcombine.low %v14949_v53, %v15009_v27  ;;  %10841 = vmatmul.mubr.msk.f32.gmra.mrb[64].mxu0 %vm6146_vm3, %v6111_v45  ;;  %v6293_v57 = vcombine.low %v15027_v38, %v15060_v18  ;;  %v5634_v25 = vmax.f32 %v14970_v4, 0.0 }
 0x46b   :  { %17490 = vst [vmem:[#allocation62_spill] sm:$0xff] %v15425_v9  ;;  %17492 = vst [vmem:[#allocation7_spill] sm:$0xff] %v15433_v52  ;;  %v15441_v49 = vrot.slane %v6113_v24, %v14910_v12  ;;  %v6129_v26 = vcombine.low %v15433_v52, %v15429_v48  ;;  %v8948_v36 = vcombine.high %v15009_v27, %v15027_v38  ;;  %10843 = vmatprep.mubr.msk.f32.mxu0 %vm11993_vm0, %v17458_v13 }
 0x46c   :  { %v15454_v45 = vsel %vm14962_vm2, %v5983_v30, %v5984_v54  ;;  %v5986_v24 = vrot.slane %v5984_v54, 2  ;;  %v6309_v44 = vcombine.low %v15052_v61, %v15020_v6  ;;  %v15461_v34 = vrot.slane %v6292_v8, %v14910_v12  ;;  %v6556_v54 = vld [vmem:[%s16701_s5 + $0x40] sm:$0xff]  ;;  %v6557_v8 = vld [vmem:[%s16701_s5 + $0x48] sm:$0xff] }
 0x46d   :  { %17493 = vst [vmem:[#allocation26_spill] sm:$0xff] %v15441_v49  ;;  %17494 = vst [vmem:[#allocation9_spill] sm:$0xff] %v15454_v45  ;;  %v6128_v48 = vcombine.low %v15425_v9, %v15441_v49  ;;  %v15464_v52 = vrot.slane %v6293_v57, %v14910_v12  ;;  %v15467_v4 = vrot.slane %v8948_v36, %v14910_v12  ;;  %v5642_v42 = vmax.f32 %v15147_v21, 0.0 }
 0x46e   :  { %17495 = vst [vmem:[#allocation21_spill] sm:$0xff] %v15461_v34  ;;  %v15472_v30 = vsel %vm14962_vm2, %v5986_v24, %v5987_v22  ;;  %v15481_v57 = vrot.slane %v6309_v44, %v14910_v12  ;;  %v15487_v36 = vrot.slane %v6129_v26, %v14910_v12  ;;  %v15494_v24 = vld [vmem:[%s16701_s5 + $0x50] sm:$0xff]  ;;  %v15499_v44 = vld [vmem:[%s16701_s5 + $0x58] sm:$0xff]  ;;  %v11552_v22 = vpack.c.bf16 %v6557_v8, %v6556_v54 }
 0x46f   :  { %17496 = vst [vmem:[#allocation28_spill] sm:$0xff] %v15464_v52  ;;  %17497 = vst [vmem:[#allocation30_spill] sm:$0xff] %v15467_v4  ;;  %10844 = vmatmul.mubr.msk.f32.gmra.mrb[66].mxu0 %vm6146_vm3, %v6128_v48  ;;  %v6130_v21 = vcombine.low %v15454_v45, %v15472_v30  ;;  %v6852_v48 = vcombine.high %v5634_v25, %v5634_v25  ;;  %v17502_v49 = vcombine.low %v14921_v28, %v14919_v56 }
 0x470   :  { %17498 = vst [vmem:[#allocation32_spill] sm:$0xff] %v15472_v30  ;;  %17499 = vst [vmem:[#allocation33_spill] sm:$0xff] %v15481_v57  ;;  %10846 = vmatprep.mubr.msk.f32.mxu0 %vm11993_vm0, %v17458_v13  ;;  %v6868_v45 = vcombine.high %v5642_v42, %v5642_v42  ;;  %v11555_v1 = vpack.c.bf16 %v15499_v44, %v15494_v24  ;;  %v6310_v8 = vcombine.low %v15049_v31, %v15023_v62 }
 0x471   :  { %17500 = vst [vmem:[#allocation42_spill] sm:$0xff] %v15487_v36  ;;  %v15506_v9 = vrot.slane %v6130_v21, %v14910_v12  ;;  %v15514_v30 = vrot.slane %v17502_v49, %v14910_v12  ;;  %v15521_v21 = vrot.slane %v5634_v25, %v14910_v12  ;;  %v15528_v28 = vrot.slane %v6852_v48, %v14910_v12 }
 0x472   :  { %v6344_v49 = vcombine.low %v15030_v7, %v15056_v10  ;;  %v17503_v24 = vcombine.low %v15017_v39, %v15108_v20  ;;  %v17505_v25 = vcombine.low %v15122_v3, %v15126_v41  ;;  %v6326_v48 = vcombine.low %v15041_v40, %v15079_v63 }
 0x473   :  { %17501 = vst [vmem:[#allocation36_spill] sm:$0xff] %v15506_v9  ;;  %v6145_v54 = vcombine.low %v15487_v36, %v15506_v9  ;;  %v6327_v7 = vcombine.low %v15075_v19, %v15036_v43  ;;  %v6411_v4 = vcombine.low %v15209_v29, %v15160_v35  ;;  %v6412_v39 = vcombine.low %v15206_v58, %v15192_v32  ;;  %v17513_v36 = vld [vmem:[#allocation4_spill] sm:$0xff]  ;;  %v17518_v19 = vld [vmem:[#allocation75_spill] sm:$0xff] }
 0x474   :  { %v15536_v44 = vrot.slane %v17503_v24, %v14910_v12  ;;  %v15542_v26 = vrot.slane %v17505_v25, %v14910_v12  ;;  %v15554_v20 = vrot.slane %v5642_v42, %v14910_v12  ;;  %v15557_v3 = vrot.slane %v6868_v45, %v14910_v12 }
 0x475   :  { %10847 = vmatmul.mubr.msk.f32.gmra.mrb[68].mxu0 %vm6146_vm3, %v6145_v54  ;;  %v17507_v41 = vcombine.high %v14919_v56, %v14925_v33  ;;  %v6577_v24 = vcombine.low %v15009_v27, %v15067_v60  ;;  %v6308_v25 = vcombine.low %v15461_v34, %v15464_v52  ;;  %v15572_v42 = vrot.slane %v6310_v8, %v14910_v12  ;;  %v17510_v8 = vld [vmem:[#allocation3_spill] sm:$0xff]  ;;  %v17511_v34 = vld [vmem:[#allocation40_spill] sm:$0xff] }
 0x476   :  { %17504 = vst [vmem:[#allocation29_spill] sm:$0xff] %v15536_v44  ;;  %17506 = vst [vmem:[#allocation19_spill] sm:$0xff] %v15542_v26  ;;  %10857 = vmatprep.mubr.msk.f32.mxu0 %vm11993_vm0, %v17458_v13  ;;  %v15575_v45 = vrot.slane %v6411_v4, %v14910_v12  ;;  %v15578_v40 = vrot.slane %v6412_v39, %v14910_v12  ;;  %v6343_v56 = vcombine.low %v15071_v46, %v15063_v5  ;;  %v17537_v44 = vld [vmem:[#allocation17_spill] sm:$0xff] }
 0x477   :  { %v15565_v54 = vrot.slane %v17507_v41, %v14910_v12  ;;  %17509 = vst [vmem:[#allocation66_spill] sm:$0xff] %v15572_v42  ;;  %v6578_v60 = vcombine.low %v15060_v18, %v15052_v61  ;;  %v8914_v52 = vcombine.high %v15052_v61, %v15020_v6  ;;  %v17512_v9 = vcombine.low %v17510_v8, %v17511_v34 }
 0x478   :  { %v15593_v4 = vrot.slane %v6326_v48, %v14910_v12  ;;  %v15596_v39 = vrot.slane %v6327_v7, %v14910_v12  ;;  %v6360_v41 = vcombine.low %v17513_v36, %v15044_v11  ;;  %v15605_v34 = vrot.slane %v6577_v24, %v14910_v12 }
 0x479   :  { %17508 = vst [vmem:[#allocation23_spill] sm:$0xff] %v15565_v54  ;;  %10858 = vmatmul.mubr.msk.f32.vlgmr.msra.gmra.mrb[70].mxu0 %vm6146_vm3, %v17512_v9  ;;  %v15608_v9 = vrot.slane %v6578_v60, %v14910_v12  ;;  %v15611_v48 = vrot.slane %v8914_v52, %v14910_v12  ;;  %v6325_v7 = vcombine.low %v15481_v57, %v15572_v42  ;;  %v17514_v18 = vmov 0.0|0.0   ;;  %v17516_v52 = vld [vmem:[#allocation24_spill] sm:$0xff] }
 0x47a   :  { %11553 = vmatpush3.bf16.msra.mxu0 %v11552_v22  ;;  %10860 = vmatprep.mubr.msk.f32.mxu0 %vm11993_vm0, %v17458_v13  ;;  %v15616_v8 = vrot.slane %v6344_v49, %v14910_v12  ;;  %v17515_v22 = vld [vmem:[#allocation44_spill] sm:$0xff]  ;;  %v6629_v24 = vcombine.low %v15056_v10, %v17513_v36  ;;  %v15624_v60 = vrot.slane %v6343_v56, %v14910_v12  ;;  %v15644_v54 = vmax.f32 %v17518_v19, 0.0 }
 0x47b   :  { %11554 = vmatprep.subr.bf16.mxu0 %v17514_v18  ;;  %v6628_v61 = vcombine.low %v15063_v5, %v17515_v22  ;;  %v6361_v63 = vcombine.low %v17516_v52, %v15082_v50  ;;  %v6377_v22 = vcombine.low %v15132_v23, %v15189_v51  ;;  %v8916_v56 = vcombine.high %v17513_v36, %v15044_v11 }
 0x47c   :  { %v15639_v10 = vrot.slane %v6629_v24, %v14910_v12  ;;  %17519 = vst [vmem:[#allocation72_spill] sm:$0xff] %v15644_v54  ;;  %v15651_v49 = vrot.slane %v6360_v41, %v14910_v12  ;;  %v6378_v24 = vcombine.low %v15185_v2, %v15102_v59 }
 0x47d   :  { %10861 = vmatmul.mubr.msk.f32.gmra.mrb[72].mxu0 %vm6146_vm3, %v6308_v25  ;;  %v15636_v42 = vrot.slane %v6628_v61, %v14910_v12  ;;  %v6342_v25 = vcombine.low %v15593_v4, %v15596_v39  ;;  %v6646_v61 = vcombine.low %v15082_v50, %v15291_v16  ;;  %v15661_v36 = vrot.slane %v8916_v56, %v14910_v12 }
 0x47e   :  { %17517 = vst [vmem:[#allocation71_spill] sm:$0xff] %v15639_v10  ;;  %10863 = vmatprep.mubr.msk.f32.mxu0 %vm11993_vm0, %v17458_v13  ;;  %11556 = vmatpush3.bf16.msra.mxu0 %v11555_v1  ;;  %v6679_v1 = vcombine.low %v15155_v15, %v15356_v47  ;;  %v15666_v41 = vrot.slane %v6361_v63, %v14910_v12 }
 0x47f   :  { %11557 = vmatprep.subr.bf16.mxu0 %v17514_v18  ;;  %v15669_v57 = vrot.slane %v6646_v61, %v14910_v12  ;;  %v6680_v16 = vcombine.low %v15213_v37, %v15209_v29  ;;  %v8918_v50 = vcombine.high %v15209_v29, %v15160_v35  ;;  %v6394_v56 = vcombine.low %v15177_v17, %v15155_v15 }
 0x480   :  { %v15679_v19 = vrot.slane %v6679_v1, %v14910_v12  ;;  %v6697_v63 = vcombine.low %v15192_v32, %v15409_v14  ;;  %v17520_v47 = vcombine.low %v14925_v33, %v14949_v53  ;;  %v17522_v14 = vcombine.low %v15009_v27, %v15027_v38 }
 0x481   :  { %10864 = vmatmul.mubr.msk.f32.gmra.mrb[74].mxu0 %vm6146_vm3, %v6325_v7  ;;  %v15694_v23 = vrot.slane %v6680_v16, %v14910_v12  ;;  %v15697_v1 = vrot.slane %v8918_v50, %v14910_v12  ;;  %v15706_v33 = vrot.slane %v6377_v22, %v14910_v12  ;;  %v15709_v53 = vrot.slane %v6378_v24, %v14910_v12 }
 0x482   :  { %v15687_v61 = vrot.slane %v17520_v47, %v14910_v12  ;;  %10866 = vmatprep.mubr.msk.f32.mxu0 %vm11993_vm0, %v17458_v13  ;;  %v15703_v10 = vrot.slane %v17522_v14, %v14910_v12  ;;  %v15712_v47 = vrot.slane %v6697_v63, %v14910_v12  ;;  %v6905_v16 = vcombine.low %v15020_v6, %v15049_v31 }
 0x483   :  { %17524 = vst [vmem:[#allocation61_spill] sm:$0xff] %v15706_v33  ;;  %v6395_v50 = vcombine.low %v15168_v0, %v15213_v37  ;;  %v6923_v22 = vcombine.low %v15036_v43, %v15071_v46  ;;  %v6924_v6 = vcombine.low %v15063_v5, %v15521_v21  ;;  %v15734_v31 = vcombine.high %v15521_v21, %v15521_v21 }
 0x484   :  { %17521 = vst [vmem:[#allocation22_spill] sm:$0xff] %v15687_v61  ;;  %17523 = vst [vmem:[#allocation31_spill] sm:$0xff] %v15703_v10  ;;  %v15728_v63 = vrot.slane %v6905_v16, %v14910_v12  ;;  %v6359_v46 = vcombine.low %v15624_v60, %v15616_v8  ;;  %v6376_v37 = vcombine.low %v15651_v49, %v15666_v41  ;;  %v17545_v10 = vld [vmem:[#allocation45_spill] sm:$0xff] }
 0x485   :  { %17525 = vst [vmem:[#allocation86_spill] sm:$0xff] %v15712_v47  ;;  %10867 = vmatmul.mubr.msk.f32.gmra.mrb[76].mxu0 %vm6146_vm3, %v6342_v25  ;;  %v15743_v25 = vrot.slane %v6394_v56, %v14910_v12  ;;  %v6941_v14 = vcombine.low %v15044_v11, %v17516_v52  ;;  %v15750_v38 = vrot.slane %v6923_v22, %v14910_v12  ;;  %v17562_v47 = vld [vmem:[#allocation90_spill] sm:$0xff] }
 0x486   :  { %17526 = vst [vmem:[#allocation88_spill] sm:$0xff] %v15728_v63  ;;  %10869 = vmatprep.mubr.msk.f32.mxu0 %vm11993_vm0, %v17458_v13  ;;  %v15753_v24 = vrot.slane %v6924_v6, %v14910_v12  ;;  %v6940_v8 = vcombine.low %v15734_v31, %v15528_v28  ;;  %v6393_v49 = vcombine.low %v15706_v33, %v15709_v53  ;;  %v7153_v33 = vrot.slane %v15528_v28, 7  ;;  %v17535_v6 = vld [vmem:[#allocation65_spill] sm:$0xff] }
 0x487   :  { %17527 = vst [vmem:[#allocation52_spill] sm:$0xff] %v15750_v38  ;;  %v15760_v56 = vrot.slane %v6941_v14, %v14910_v12  ;;  %v6966_v11 = vcombine.low %v15102_v59, %v15177_v17  ;;  %v6967_v52 = vcombine.low %v15155_v15, %v15168_v0  ;;  %v15768_v22 = vrot.slane %v6395_v50, %v14910_v12  ;;  %v17542_v38 = vld [vmem:[#allocation50_spill] sm:$0xff] }
 0x488   :  { %17528 = vst [vmem:[#allocation35_spill] sm:$0xff] %v15753_v24  ;;  %v15773_v16 = vrot.slane %v6940_v8, %v14910_v12  ;;  %v6983_v14 = vcombine.low %v15160_v35, %v15206_v58  ;;  %v15787_v50 = vcombine.high %v15554_v20, %v15554_v20  ;;  %v6992_v8 = vcombine.low %v15192_v32, %v15554_v20  ;;  %v17536_v35 = vld [vmem:[#allocation6_spill] sm:$0xff] }
 0x489   :  { %17529 = vst [vmem:[#allocation18_spill] sm:$0xff] %v15760_v56  ;;  %10870 = vmatmul.mubr.msk.f32.gmra.mrb[78].mxu0 %vm6146_vm3, %v6359_v46  ;;  %v15780_v17 = vrot.slane %v6966_v11, %v14910_v12  ;;  %v15783_v46 = vrot.slane %v6967_v52, %v14910_v12  ;;  %v8937_v11 = vrot.slane %v15521_v21, 9  ;;  %v7189_v26 = vcombine.low %v17536_v35, %v17535_v6  ;;  %v17538_v56 = vld [vmem:[#allocation49_spill] sm:$0xff]  ;;  %v17539_v52 = vld [vmem:[#allocation91_spill] sm:$0xff] }
 0x48a   :  { %17530 = vst [vmem:[#allocation68_spill] sm:$0xff] %v15773_v16  ;;  %10872 = vmatprep.mubr.msk.f32.mxu0 %vm11993_vm0, %v17458_v13  ;;  %v15794_v58 = vrot.slane %v6983_v14, %v14910_v12  ;;  %v6993_v27 = vcombine.low %v15787_v50, %v15557_v3  ;;  %v15804_v7 = vrot.slane %v6992_v8, %v14910_v12  ;;  %v7150_v14 = vrot.slane %v15734_v31, 7  ;;  %v17557_v16 = vld [vmem:[#allocation38_spill] sm:$0xff] }
 0x48b   :  { %17531 = vst [vmem:[#allocation80_spill] sm:$0xff] %v15780_v17  ;;  %17532 = vst [vmem:[#allocation39_spill] sm:$0xff] %v15783_v46  ;;  %v7190_v24 = vcombine.low %v17538_v56, %v17537_v44  ;;  %v17540_v46 = vld [vmem:[#allocation37_spill] sm:$0xff]  ;;  %v6410_v44 = vcombine.low %v15743_v25, %v15768_v22  ;;  %v15829_v56 = vrot.slane %v7189_v26, %v14910_v12 }
 0x48c   :  { %17533 = vst [vmem:[#allocation57_spill] sm:$0xff] %v15794_v58  ;;  %17534 = vst [vmem:[#allocation56_spill] sm:$0xff] %v15804_v7  ;;  %v7206_v17 = vcombine.low %v17540_v46, %v17539_v52  ;;  %v15819_v8 = vrot.slane %v6993_v27, %v14910_v12  ;;  %v17544_v58 = vld [vmem:[#allocation25_spill] sm:$0xff]  ;;  %v15836_v27 = vcombine.high %v15528_v28, %v15528_v28  ;;  %v17553_v7 = vld [vmem:[#allocation54_spill] sm:$0xff] }
 0x48d   :  { %10873 = vmatmul.mubr.msk.f32.gmra.mrb[80].mxu0 %vm6146_vm3, %v6376_v37  ;;  %v17543_v37 = vld [vmem:[#allocation27_spill] sm:$0xff]  ;;  %v7223_v6 = vcombine.low %v17545_v10, %v17544_v58  ;;  %17546 = vst [vmem:[#allocation59_spill] sm:$0xff] %v15829_v56  ;;  %v15832_v46 = vrot.slane %v7190_v24, %v14910_v12  ;;  %v15848_v26 = vsel %vm14962_vm2, %v8937_v11, %v7150_v14  ;;  %v17550_v58 = vld [vmem:[#allocation64_spill] sm:$0xff] }
 0x48e   :  { %10875 = vmatprep.mubr.msk.f32.mxu0 %vm11993_vm0, %v17458_v13  ;;  %17541 = vst [vmem:[#allocation77_spill] sm:$0xff] %v15819_v8  ;;  %v7207_v63 = vcombine.low %v17543_v37, %v17542_v38  ;;  %v15841_v35 = vrot.slane %v7206_v17, %v14910_v12  ;;  %v7224_v52 = vcombine.low %v17550_v58, %v15848_v26  ;;  %v7152_v37 = vrot.slane %v7150_v14, 2  ;;  %v17555_v58 = vld [vmem:[#allocation78_spill] sm:$0xff]  ;;  %v17563_v8 = vld [vmem:[#allocation15_spill] sm:$0xff] }
 0x48f   :  { %17547 = vst [vmem:[#allocation73_spill] sm:$0xff] %v15832_v46  ;;  %v7155_v38 = vrot.slane %v7153_v33, 2  ;;  %v15860_v17 = vrot.slane %v7223_v6, %v14910_v12  ;;  %v7156_v11 = vrot.slane %v15836_v27, 7  ;;  %v17556_v46 = vld [vmem:[#allocation76_spill] sm:$0xff] }
 0x490   :  { %17548 = vst [vmem:[#allocation51_spill] sm:$0xff] %v15841_v35  ;;  %v15844_v10 = vrot.slane %v7207_v63, %v14910_v12  ;;  %v15866_v24 = vrot.slane %v7224_v52, %v14910_v12  ;;  %v15870_v14 = vsel %vm14962_vm2, %v7152_v37, %v7153_v33  ;;  %v7257_v56 = vcombine.low %v17556_v46, %v17555_v58  ;;  %v17558_v63 = vld [vmem:[#allocation84_spill] sm:$0xff]  ;;  %v17561_v52 = vld [vmem:[#allocation43_spill] sm:$0xff]  ;;  %v17571_v58 = vld [vmem:[#allocation89_spill] sm:$0xff] }
 0x491   :  { %10876 = vmatmul.mubr.msk.f32.gmra.mrb[82].mxu0 %vm6146_vm3, %v6393_v49  ;;  %17551 = vst [vmem:[#allocation8_spill] sm:$0xff] %v15860_v17  ;;  %v17552_v49 = vld [vmem:[#allocation12_spill] sm:$0xff]  ;;  %v15878_v6 = vsel %vm14962_vm2, %v7155_v38, %v7156_v11  ;;  %v7275_v33 = vcombine.low %v17563_v8, %v17562_v47  ;;  %v17568_v8 = vld [vmem:[#allocation7_spill] sm:$0xff]  ;;  %v17570_v11 = vld [vmem:[#allocation9_spill] sm:$0xff] }
 0x492   :  { %17549 = vst [vmem:[#allocation63_spill] sm:$0xff] %v15844_v10  ;;  %10878 = vmatprep.mubr.msk.f32.mxu0 %vm11993_vm0, %v17458_v13  ;;  %v7241_v61 = vcombine.low %v17553_v7, %v17552_v49  ;;  %17554 = vst [vmem:[#allocation2_spill] sm:$0xff] %v15866_v24  ;;  %v7258_v10 = vcombine.low %v17558_v63, %v17557_v16  ;;  %v17560_v7 = vld [vmem:[#allocation93_spill] sm:$0xff]  ;;  %v7240_v16 = vcombine.low %v15870_v14, %v15878_v6  ;;  %v17581_v24 = vld [vmem:[#allocation79_spill] sm:$0xff] }
 0x493   :  { %v7274_v49 = vcombine.low %v17561_v52, %v17560_v7  ;;  %v15893_v38 = vrot.slane %v7257_v56, %v14910_v12  ;;  %v15904_v47 = vrot.slane %v7275_v33, %v14910_v12  ;;  %v7292_v7 = vcombine.low %v17571_v58, %v17570_v11  ;;  %v6884_v56 = vld [vmem:[%s16701_s5 + $0x60] sm:$0xff]  ;;  %v17576_v46 = vld [vmem:[#allocation41_spill] sm:$0xff] }
 0x494   :  { %v15881_v35 = vrot.slane %v7241_v61, %v14910_v12  ;;  %v15896_v61 = vrot.slane %v7258_v10, %v14910_v12  ;;  %v6885_v10 = vld [vmem:[%s16701_s5 + $0x68] sm:$0xff]  ;;  %v15917_v52 = vrot.slane %v7240_v16, %v14910_v12  ;;  %v15923_v33 = vcombine.high %v15557_v3, %v15557_v3 }
 0x495   :  { %10879 = vmatmul.mubr.msk.f32.gmra.mrb[84].mxu0 %vm6146_vm3, %v6410_v44  ;;  %17564 = vst [vmem:[#allocation83_spill] sm:$0xff] %v15893_v38  ;;  %v15901_v37 = vrot.slane %v7274_v49, %v14910_v12  ;;  %17567 = vst [vmem:[#allocation48_spill] sm:$0xff] %v15904_v47  ;;  %v17569_v44 = vld [vmem:[#allocation53_spill] sm:$0xff]  ;;  %v15932_v58 = vrot.slane %v7292_v7, %v14910_v12  ;;  %v7160_v16 = vrot.slane %v15787_v50, 7 }
 0x496   :  { %17559 = vst [vmem:[#allocation82_spill] sm:$0xff] %v15881_v35  ;;  %17565 = vst [vmem:[#allocation85_spill] sm:$0xff] %v15896_v61  ;;  %10881 = vmatprep.mubr.msk.f32.mxu0 %vm11993_vm0, %v17458_v13  ;;  %v7291_v63 = vcombine.low %v17569_v44, %v17568_v8  ;;  %v8938_v8 = vrot.slane %v15554_v20, 9  ;;  %v17575_v49 = vcombine.low %v15575_v45, %v15578_v40  ;;  %v7163_v61 = vrot.slane %v15557_v3, 7  ;;  %v6886_v35 = vld [vmem:[%s16701_s5 + $0x70] sm:$0xff] }
 0x497   :  { %17566 = vst [vmem:[#allocation87_spill] sm:$0xff] %v15901_v37  ;;  %17572 = vst [vmem:[#allocation67_spill] sm:$0xff] %v15917_v52  ;;  %v7166_v44 = vrot.slane %v15923_v33, 7  ;;  %v7162_v37 = vrot.slane %v7160_v16, 2  ;;  %v6595_v38 = vcombine.low %v15023_v62, %v17576_v46  ;;  %v7510_v46 = vcombine.low %v15528_v28, %v15836_v27  ;;  %v17580_v52 = vld [vmem:[#allocation46_spill] sm:$0xff] }
 0x498   :  { %v15929_v11 = vrot.slane %v7291_v63, %v14910_v12  ;;  %17574 = vst [vmem:[#allocation40_spill] sm:$0xff] %v15932_v58  ;;  %v11558_v63 = vpack.c.bf16 %v6885_v10, %v6884_v56  ;;  %v15949_v47 = vsel %vm14962_vm2, %v8938_v8, %v7160_v16  ;;  %v6887_v56 = vld [vmem:[%s16701_s5 + $0x78] sm:$0xff]  ;;  %v7165_v10 = vrot.slane %v7163_v61, 2  ;;  %v17577_v8 = vld [vmem:[#allocation32_spill] sm:$0xff]  ;;  %v17578_v58 = vld [vmem:[#allocation23_spill] sm:$0xff] }
 0x499   :  { %10882 = vmatmul.mubr.msk.f32.gmra.mrb[86].mxu0 %vm6146_vm3, %v17575_v49  ;;  %v15953_v49 = vrot.slane %v15644_v54, %v14910_v12  ;;  %v7308_v7 = vcombine.low %v17577_v8, %v15949_v47  ;;  %v15967_v16 = vsel %vm14962_vm2, %v7162_v37, %v7163_v61  ;;  %v8950_v54 = vcombine.high %v15063_v5, %v15521_v21 }
 0x49a   :  { %17573 = vst [vmem:[#allocation3_spill] sm:$0xff] %v15929_v11  ;;  %10892 = vmatprep.mubr.msk.f32.mxu0 %vm11993_vm0, %v17458_v13  ;;  %v17579_v11 = vcombine.low %v15514_v30, %v17578_v58  ;;  %v6611_v17 = vcombine.low %v17581_v24, %v17580_v52  ;;  %v8915_v8 = vcombine.high %v17580_v52, %v15036_v43 }
 0x49b   :  { %v15983_v61 = vsel %vm14962_vm2, %v7165_v10, %v7166_v44  ;;  %v11561_v5 = vpack.c.bf16 %v6887_v56, %v6886_v35  ;;  %v15990_v27 = vrot.slane %v8950_v54, %v14910_v12  ;;  %v15994_v24 = vcombine.high %v15953_v49, %v15953_v49 }
 0x49c   :  { %v7309_v30 = vcombine.low %v15967_v16, %v15983_v61  ;;  %v15997_v43 = vrot.slane %v6595_v38, %v14910_v12  ;;  %v16001_v37 = vrot.slane %v7510_v46, %v14910_v12  ;;  %v16004_v35 = vrot.slane %v7308_v7, %v14910_v12  ;;  %v17583_v7 = vld [vmem:[#allocation69_spill] sm:$0xff]  ;;  %v17584_v46 = vld [vmem:[#allocation66_spill] sm:$0xff] }
 0x49d   :  { %10893 = vmatmul.mubr.msk.f32.vlgmr.msra.gmra.mrb[88].mxu0 %vm6146_vm3, %v17579_v11  ;;  %v8952_v11 = vcombine.high %v15155_v15, %v15168_v0  ;;  %v17582_v38 = vcombine.low %v15605_v34, %v15608_v9  ;;  %v16018_v58 = vrot.slane %v6611_v17, %v14910_v12  ;;  %v7545_v56 = vcombine.low %v15209_v29, %v17583_v7 }
 0x49e   :  { %11559 = vmatpush3.bf16.msra.mxu0 %v11558_v63  ;;  %10895 = vmatprep.mubr.msk.f32.mxu0 %vm11993_vm0, %v17458_v13  ;;  %v16007_v44 = vrot.slane %v7309_v30, %v14910_v12  ;;  %v8953_v10 = vcombine.high %v15192_v32, %v15554_v20  ;;  %v16029_v15 = vrot.slane %v8915_v8, %v14910_v12 }
 0x49f   :  { %11560 = vmatprep.subr.bf16.mxu0 %v17514_v18  ;;  %v16034_v34 = vrot.slane %v8952_v11, %v14910_v12  ;;  %v6610_v17 = vcombine.low %v15611_v48, %v15997_v43  ;;  %v16040_v32 = vrot.slane %v7545_v56, %v14910_v12  ;;  %v7555_v29 = vcombine.low %v15557_v3, %v15923_v33 }
 0x4a0   :  { %v16057_v33 = vrot.slane %v8953_v10, %v14910_v12  ;;  %v7750_v8 = vcombine.low %v15528_v28, %v15953_v49  ;;  %v7777_v10 = vcombine.low %v15554_v20, %v15787_v50  ;;  %v17586_v20 = vld [vmem:[#allocation26_spill] sm:$0xff] }
 0x4a1   :  { %10896 = vmatmul.mubr.msk.f32.gmra.mrb[90].mxu0 %vm6146_vm3, %v17582_v38  ;;  %v7749_v38 = vcombine.low %v15521_v21, %v15734_v31  ;;  %v16060_v56 = vrot.slane %v7555_v29, %v14910_v12  ;;  %v6627_v29 = vcombine.low %v16018_v58, %v16029_v15  ;;  %v8917_v31 = vcombine.high %v15185_v2, %v15102_v59  ;;  %v17585_v21 = vld [vmem:[#allocation42_spill] sm:$0xff] }
 0x4a2   :  { %10898 = vmatprep.mubr.msk.f32.mxu0 %vm11993_vm0, %v17458_v13  ;;  %11562 = vmatpush3.bf16.msra.mxu0 %v11561_v5  ;;  %v17051_v5 = vrot.slane %v15994_v24, 7  ;;  %v16084_v30 = vrot.slane %v7777_v10, %v14910_v12  ;;  %v7969_v10 = vcombine.low %v15848_v26, %v15870_v14  ;;  %v6662_v59 = vcombine.low %v15189_v51, %v15185_v2  ;;  %v17599_v51 = vld [vmem:[#allocation16_spill] sm:$0xff] }
 0x4a3   :  { %11563 = vmatprep.subr.bf16.mxu0 %v17514_v18  ;;  %v16067_v11 = vrot.slane %v7749_v38, %v14910_v12  ;;  %v16081_v38 = vrot.slane %v7750_v8, %v14910_v12  ;;  %v17587_v8 = vld [vmem:[#allocation71_spill] sm:$0xff]  ;;  %v16119_v14 = vrot.slane %v8917_v31, %v14910_v12  ;;  %v17592_v31 = vld [vmem:[#allocation86_spill] sm:$0xff] }
 0x4a4   :  { %v16107_v63 = vrot.slane %v7969_v10, %v14910_v12  ;;  %v17588_v26 = vcombine.low %v15636_v42, %v17587_v8  ;;  %v8983_v10 = vcombine.high %v15528_v28, %v15953_v49  ;;  %v17597_v8 = vld [vmem:[#allocation31_spill] sm:$0xff] }
 0x4a5   :  { %10899 = vmatmul.mubr.msk.f32.gmra.mrb[92].mxu0 %vm6146_vm3, %v6610_v17  ;;  %v8972_v17 = vrot.slane %v15953_v49, 9  ;;  %v17591_v49 = vld [vmem:[#allocation77_spill] sm:$0xff] }
 0x4a6   :  { %10901 = vmatprep.mubr.msk.f32.mxu0 %vm11993_vm0, %v17458_v13 }
 0x4a7   :  { %v7945_v50 = vsel %vm14962_vm2, %v8972_v17, %v17051_v5  ;;  %v7997_v5 = vcombine.low %v15949_v47, %v15967_v16  ;;  %v17589_v16 = vld [vmem:[#allocation36_spill] sm:$0xff]  ;;  %v17596_v47 = vld [vmem:[#allocation22_spill] sm:$0xff] }
 0x4a8   :  { %v17598_v7 = vcombine.low %v17596_v47, %v17597_v8  ;;  %v17602_v47 = vld [vmem:[#allocation52_spill] sm:$0xff]  ;;  %v17603_v8 = vld [vmem:[#allocation35_spill] sm:$0xff] }
 0x4a9   :  { %10902 = vmatmul.mubr.msk.f32.gmra.mrb[94].mxu0 %vm6146_vm3, %v6627_v29  ;;  %v7970_v29 = vcombine.low %v15878_v6, %v7945_v50  ;;  %v16126_v6 = vrot.slane %v7997_v5, %v14910_v12  ;;  %v16129_v50 = vrot.slane %v6662_v59, %v14910_v12  ;;  %v16148_v59 = vrot.slane %v8983_v10, %v14910_v12  ;;  %v7170_v5 = vld [vmem:[%s16701_s5 + $0x90] sm:$0xff] }
 0x4aa   :  { %10904 = vmatprep.mubr.msk.f32.mxu0 %vm11993_vm0, %v17458_v13  ;;  %v17594_v10 = vcombine.low %v15679_v19, %v15694_v23 }
 0x4ab   :  { %v16110_v17 = vrot.slane %v7970_v29, %v14910_v12  ;;  %v17590_v29 = vcombine.low %v15661_v36, %v15669_v57  ;;  %v6678_v28 = vcombine.low %v16129_v50, %v16119_v14  ;;  %v17593_v36 = vld [vmem:[#allocation68_spill] sm:$0xff]  ;;  %v7168_v57 = vld [vmem:[%s16701_s5 + $0x80] sm:$0xff] }
 0x4ad   :  { %10905 = vmatmul.mubr.msk.f32.gmra.mrb[96].mxu0 %vm6146_vm3, %v17588_v26  ;;  %v7169_v26 = vld [vmem:[%s16701_s5 + $0x88] sm:$0xff] }
 0x4ae   :  { %10907 = vmatprep.mubr.msk.f32.mxu0 %vm11993_vm0, %v17458_v13 }
 0x4b1   :  { %10908 = vmatmul.mubr.msk.f32.gmra.mrb[98].mxu0 %vm6146_vm3, %v17590_v29  ;;  %v7171_v29 = vld [vmem:[%s16701_s5 + $0x98] sm:$0xff] }
 0x4b2   :  { %10910 = vmatprep.mubr.msk.f32.mxu0 %vm11993_vm0, %v17458_v13 }
 0x4b5   :  { %10911 = vmatmul.mubr.msk.f32.gmra.mrb[100].mxu0 %vm6146_vm3, %v6678_v28  ;;  %v17595_v28 = vcombine.low %v15697_v1, %v17592_v31 }
 0x4b6   :  { %10913 = vmatprep.mubr.msk.f32.mxu0 %vm11993_vm0, %v17458_v13 }
 0x4b9   :  { %10914 = vmatmul.mubr.msk.f32.gmra.mrb[102].mxu0 %vm6146_vm3, %v17594_v10  ;;  %v11564_v10 = vpack.c.bf16 %v7169_v26, %v7168_v57  ;;  %v11567_v26 = vpack.c.bf16 %v7171_v29, %v7170_v5  ;;  %v17600_v57 = vld [vmem:[#allocation88_spill] sm:$0xff]  ;;  %v17604_v5 = vcombine.low %v17602_v47, %v17603_v8  ;;  %v17610_v47 = vld [vmem:[#allocation39_spill] sm:$0xff] }
 0x4ba   :  { %10916 = vmatprep.mubr.msk.f32.mxu0 %vm11993_vm0, %v17458_v13  ;;  %v17601_v54 = vcombine.low %v15608_v9, %v17600_v57  ;;  %v17606_v29 = vld [vmem:[#allocation20_spill] sm:$0xff] }
 0x4bd   :  { %10917 = vmatmul.mubr.msk.f32.gmra.mrb[104].mxu0 %vm6146_vm3, %v17595_v28  ;;  %v6914_v28 = vcombine.low %v15023_v62, %v17599_v51 }
 0x4be   :  { %10927 = vmatprep.mubr.msk.f32.mxu0 %vm11993_vm0, %v17458_v13 }
 0x4bf   :  { %v6921_v0 = vrot.slane %v6914_v28, %v14910_v12 }
 0x4c1   :  { %10928 = vmatmul.mubr.msk.f32.vlgmr.msra.gmra.mrb[106].mxu0 %vm6146_vm3, %v17598_v7  ;;  %v6922_v7 = vcombine.low %v6921_v0, %v16018_v58  ;;  %v17607_v0 = vld [vmem:[#allocation18_spill] sm:$0xff] }
 0x4c2   :  { %11565 = vmatpush3.bf16.msra.mxu0 %v11564_v10  ;;  %10930 = vmatprep.mubr.msk.f32.mxu0 %vm11993_vm0, %v17458_v13  ;;  %v17608_v28 = vcombine.low %v17593_v36, %v17607_v0  ;;  %v7462_v0 = vld [vmem:[%s16701_s5 + $0xa0] sm:$0xff] }
 0x4c3   :  { %11566 = vmatprep.subr.bf16.mxu0 %v17514_v18 }
 0x4c5   :  { %10931 = vmatmul.mubr.msk.f32.gmra.mrb[108].mxu0 %vm6146_vm3, %v17601_v54  ;;  %v17605_v54 = vld [vmem:[#allocation11_spill] sm:$0xff] }
 0x4c6   :  { %10933 = vmatprep.mubr.msk.f32.mxu0 %vm11993_vm0, %v17458_v13  ;;  %11568 = vmatpush3.bf16.msra.mxu0 %v11567_v26  ;;  %v6957_v10 = vcombine.low %v17606_v29, %v17605_v54 }
 0x4c7   :  { %11569 = vmatprep.subr.bf16.mxu0 %v17514_v18 }
 0x4c8   :  { %v6964_v26 = vrot.slane %v6957_v10, %v14910_v12 }
 0x4c9   :  { %10934 = vmatmul.mubr.msk.f32.gmra.mrb[110].mxu0 %vm6146_vm3, %v6922_v7  ;;  %v17609_v7 = vld [vmem:[#allocation80_spill] sm:$0xff] }
 0x4ca   :  { %10936 = vmatprep.mubr.msk.f32.mxu0 %vm11993_vm0, %v17458_v13  ;;  %v6965_v57 = vcombine.low %v6964_v26, %v16129_v50  ;;  %v17611_v8 = vcombine.low %v17609_v7, %v17610_v47  ;;  %v17614_v26 = vld [vmem:[#allocation56_spill] sm:$0xff] }
 0x4cb   :  { %v7464_v47 = vld [vmem:[%s16701_s5 + $0xb0] sm:$0xff] }
 0x4cd   :  { %10937 = vmatmul.mubr.msk.f32.gmra.mrb[112].mxu0 %vm6146_vm3, %v17604_v5  ;;  %v17612_v5 = vld [vmem:[#allocation57_spill] sm:$0xff] }
 0x4ce   :  { %10939 = vmatprep.mubr.msk.f32.mxu0 %vm11993_vm0, %v17458_v13  ;;  %v17613_v10 = vcombine.low %v15694_v23, %v17612_v5  ;;  %v17616_v5 = vld [vmem:[#allocation29_spill] sm:$0xff] }
 0x4d1   :  { %10940 = vmatmul.mubr.msk.f32.gmra.mrb[114].mxu0 %vm6146_vm3, %v17608_v28  ;;  %v7463_v28 = vld [vmem:[%s16701_s5 + $0xa8] sm:$0xff] }
 0x4d2   :  { %10942 = vmatprep.mubr.msk.f32.mxu0 %vm11993_vm0, %v17458_v13  ;;  %v11570_v7 = vpack.c.bf16 %v7463_v28, %v7462_v0  ;;  %v17619_v0 = vld [vmem:[#allocation59_spill] sm:$0xff]  ;;  %v17620_v28 = vld [vmem:[#allocation73_spill] sm:$0xff] }
 0x4d5   :  { %10943 = vmatmul.mubr.msk.f32.gmra.mrb[116].mxu0 %vm6146_vm3, %v6965_v57  ;;  %v17615_v57 = vcombine.low %v17614_v26, %v17591_v49  ;;  %v7744_v49 = vld [vmem:[%s16701_s5 + $0xd0] sm:$0xff] }
 0x4d6   :  { %10945 = vmatprep.mubr.msk.f32.mxu0 %vm11993_vm0, %v17458_v13 }
 0x4d9   :  { %10946 = vmatmul.mubr.msk.f32.gmra.mrb[118].mxu0 %vm6146_vm3, %v17611_v8  ;;  %v7465_v8 = vld [vmem:[%s16701_s5 + $0xb8] sm:$0xff] }
 0x4da   :  { %10948 = vmatprep.mubr.msk.f32.mxu0 %vm11993_vm0, %v17458_v13  ;;  %v11573_v26 = vpack.c.bf16 %v7465_v8, %v7464_v47  ;;  %v17625_v47 = vld [vmem:[#allocation8_spill] sm:$0xff]  ;;  %v17626_v8 = vld [vmem:[#allocation2_spill] sm:$0xff] }
 0x4dd   :  { %10949 = vmatmul.mubr.msk.f32.gmra.mrb[120].mxu0 %vm6146_vm3, %v17613_v10  ;;  %v17617_v10 = vld [vmem:[#allocation19_spill] sm:$0xff] }
 0x4de   :  { %10951 = vmatprep.mubr.msk.f32.mxu0 %vm11993_vm0, %v17458_v13  ;;  %v17618_v31 = vcombine.low %v17616_v5, %v17617_v10  ;;  %v17622_v5 = vld [vmem:[#allocation51_spill] sm:$0xff]  ;;  %v17627_v10 = vcombine.low %v17625_v47, %v17626_v8  ;;  %v17635_v47 = vld [vmem:[#allocation48_spill] sm:$0xff] }
 0x4e1   :  { %10952 = vmatmul.mubr.msk.f32.gmra.mrb[122].mxu0 %vm6146_vm3, %v17615_v57  ;;  %v17621_v57 = vcombine.low %v17619_v0, %v17620_v28  ;;  %v17628_v0 = vld [vmem:[#allocation67_spill] sm:$0xff] }
 0x4e2   :  { %10962 = vmatprep.mubr.msk.f32.mxu0 %vm11993_vm0, %v17458_v13 }
 0x4e5   :  { %10963 = vmatmul.mubr.msk.f32.vlgmr.msra.gmra.mrb[124].mxu0 %vm6146_vm3, %v17618_v31  ;;  %v17623_v31 = vld [vmem:[#allocation63_spill] sm:$0xff] }
 0x4e6   :  { %11571 = vmatpush3.bf16.msra.mxu0 %v11570_v7  ;;  %10965 = vmatprep.mubr.msk.f32.mxu0 %vm11993_vm0, %v17458_v13  ;;  %v17624_v7 = vcombine.low %v17622_v5, %v17623_v31  ;;  %v17632_v5 = vld [vmem:[#allocation85_spill] sm:$0xff] }
 0x4e7   :  { %11572 = vmatprep.subr.bf16.mxu0 %v17514_v18 }
 0x4e9   :  { %10966 = vmatmul.mubr.msk.f32.gmra.mrb[126].mxu0 %vm6146_vm3, %v17621_v57  ;;  %v17631_v57 = vld [vmem:[#allocation83_spill] sm:$0xff] }
 0x4ea   :  { %10968 = vmatprep.mubr.msk.f32.mxu0 %vm11993_vm0, %v17458_v13  ;;  %11574 = vmatpush3.bf16.msra.mxu0 %v11573_v26  ;;  %v17629_v26 = vld [vmem:[#allocation82_spill] sm:$0xff]  ;;  %v17633_v31 = vcombine.low %v17631_v57, %v17632_v5  ;;  %v7743_v57 = vld [vmem:[%s16701_s5 + $0xc8] sm:$0xff]  ;;  %v17640_v5 = vld [vmem:[#allocation81_spill] sm:$0xff] }
 0x4eb   :  { %11575 = vmatprep.subr.bf16.mxu0 %v17514_v18  ;;  %v17630_v28 = vcombine.low %v17628_v0, %v17629_v26  ;;  %v17638_v0 = vld [vmem:[#allocation40_spill] sm:$0xff] }
 0x4ed   :  { %10969 = vmatmul.mubr.msk.f32.gmra.mrb[128].mxu0 %vm6146_vm3, %v17624_v7  ;;  %v17634_v7 = vld [vmem:[#allocation87_spill] sm:$0xff] }
 0x4ee   :  { %10971 = vmatprep.mubr.msk.f32.mxu0 %vm11993_vm0, %v17458_v13  ;;  %v17636_v8 = vcombine.low %v17634_v7, %v17635_v47  ;;  %v17642_v47 = vcombine.low %v16004_v35, %v16007_v44  ;;  %v17644_v35 = vld [vmem:[#allocation21_spill] sm:$0xff]  ;;  %v17645_v44 = vld [vmem:[#allocation30_spill] sm:$0xff] }
 0x4f1   :  { %10972 = vmatmul.mubr.msk.f32.gmra.mrb[130].mxu0 %vm6146_vm3, %v17627_v10  ;;  %v17637_v10 = vld [vmem:[#allocation3_spill] sm:$0xff] }
 0x4f2   :  { %10974 = vmatprep.mubr.msk.f32.mxu0 %vm11993_vm0, %v17458_v13  ;;  %v17639_v26 = vcombine.low %v17637_v10, %v17638_v0  ;;  %v17643_v0 = vld [vmem:[#allocation14_spill] sm:$0xff] }
 0x4f5   :  { %10975 = vmatmul.mubr.msk.f32.gmra.mrb[132].mxu0 %vm6146_vm3, %v17630_v28  ;;  %v7742_v28 = vld [vmem:[%s16701_s5 + $0xc0] sm:$0xff] }
 0x4f6   :  { %10977 = vmatprep.mubr.msk.f32.mxu0 %vm11993_vm0, %v17458_v13 }
 0x4f9   :  { %10978 = vmatmul.mubr.msk.f32.gmra.mrb[134].mxu0 %vm6146_vm3, %v17633_v31  ;;  %v17641_v31 = vld [vmem:[#allocation13_spill] sm:$0xff] }
 0x4fa   :  { %10980 = vmatprep.mubr.msk.f32.mxu0 %vm11993_vm0, %v17458_v13  ;;  %v7475_v7 = vcombine.low %v17641_v31, %v17640_v5  ;;  %v7745_v5 = vld [vmem:[%s16701_s5 + $0xd8] sm:$0xff]  ;;  %v17646_v31 = vcombine.low %v17644_v35, %v17645_v44  ;;  %v17649_v35 = vcombine.low %v16001_v37, %v15666_v41  ;;  %v7963_v44 = vld [vmem:[%s16701_s5 + $0xe8] sm:$0xff] }
 0x4fc   :  { %v7482_v10 = vrot.slane %v7475_v7, %v14910_v12 }
 0x4fd   :  { %10981 = vmatmul.mubr.msk.f32.gmra.mrb[136].mxu0 %vm6146_vm3, %v17636_v8  ;;  %v11576_v8 = vpack.c.bf16 %v7743_v57, %v7742_v28  ;;  %v8949_v28 = vcombine.high %v15023_v62, %v17599_v51  ;;  %v17647_v51 = vld [vmem:[#allocation60_spill] sm:$0xff] }
 0x4fe   :  { %10983 = vmatprep.mubr.msk.f32.mxu0 %vm11993_vm0, %v17458_v13  ;;  %v7483_v57 = vcombine.low %v7482_v10, %v17584_v46  ;;  %v8951_v10 = vcombine.high %v17606_v29, %v17605_v54  ;;  %v17650_v54 = vcombine.low %v15743_v25, %v16034_v34  ;;  %v17651_v29 = vcombine.low %v16040_v32, %v15578_v40  ;;  %v7962_v34 = vld [vmem:[%s16701_s5 + $0xe0] sm:$0xff] }
 0x4ff   :  { %v11582_v32 = vpack.c.bf16 %v7963_v44, %v7962_v34 }
 0x501   :  { %10984 = vmatmul.mubr.msk.f32.gmra.mrb[138].mxu0 %vm6146_vm3, %v17639_v26  ;;  %v7485_v26 = vcombine.low %v17580_v52, %v17643_v0  ;;  %v11579_v52 = vpack.c.bf16 %v7745_v5, %v7744_v49  ;;  %v7520_v49 = vcombine.low %v15185_v2, %v17647_v51  ;;  %v7527_v2 = vrot.slane %v8951_v10, %v14910_v12 }
 0x502   :  { %10986 = vmatprep.mubr.msk.f32.mxu0 %vm11993_vm0, %v17458_v13 }
 0x503   :  { %v7499_v7 = vrot.slane %v7485_v26, %v14910_v12  ;;  %v7534_v5 = vrot.slane %v7520_v49, %v14910_v12 }
 0x505   :  { %10987 = vmatmul.mubr.msk.f32.gmra.mrb[140].mxu0 %vm6146_vm3, %v17642_v47  ;;  %v7492_v47 = vrot.slane %v8949_v28, %v14910_v12 }
 0x506   :  { %10997 = vmatprep.mubr.msk.f32.mxu0 %vm11993_vm0, %v17458_v13 }
 0x507   :  { %v7500_v62 = vcombine.low %v7492_v47, %v7499_v7  ;;  %v17653_v47 = vld [vmem:[#allocation72_spill] sm:$0xff] }
 0x509   :  { %10998 = vmatmul.mubr.msk.f32.vlgmr.msra.gmra.mrb[142].mxu0 %vm6146_vm3, %v17646_v31  ;;  %v17652_v31 = vcombine.low %v16057_v33, %v16060_v56  ;;  %v7710_v33 = vcombine.high %v17653_v47, %v17653_v47  ;;  %v17654_v56 = vld [vmem:[#allocation28_spill] sm:$0xff] }
 0x50a   :  { %11577 = vmatpush3.bf16.msra.mxu0 %v11576_v8  ;;  %11000 = vmatprep.mubr.msk.f32.mxu0 %vm11993_vm0, %v17458_v13  ;;  %v17648_v8 = vcombine.low %v15624_v60, %v15990_v27  ;;  %v7535_v27 = vcombine.low %v7527_v2, %v7534_v5  ;;  %v17658_v2 = vcombine.low %v15596_v39, %v15624_v60 }
 0x50b   :  { %11578 = vmatprep.subr.bf16.mxu0 %v17514_v18  ;;  %v16416_v10 = vrot.slane %v7710_v33, %v14910_v12 }
 0x50d   :  { %11001 = vmatmul.mubr.msk.f32.gmra.mrb[144].mxu0 %vm6146_vm3, %v7483_v57  ;;  %v7965_v57 = vld [vmem:[%s16701_s5 + $0xf8] sm:$0xff] }
 0x50e   :  { %11003 = vmatprep.mubr.msk.f32.mxu0 %vm11993_vm0, %v17458_v13  ;;  %11580 = vmatpush3.bf16.msra.mxu0 %v11579_v52  ;;  %v7964_v52 = vld [vmem:[%s16701_s5 + $0xf0] sm:$0xff] }
 0x50f   :  { %11581 = vmatprep.subr.bf16.mxu0 %v17514_v18  ;;  %v11585_v49 = vpack.c.bf16 %v7965_v57, %v7964_v52 }
 0x511   :  { %11004 = vmatmul.mubr.msk.f32.gmra.mrb[146].mxu0 %vm6146_vm3, %v7500_v62  ;;  %v17655_v62 = vld [vmem:[#allocation33_spill] sm:$0xff] }
 0x512   :  { %11006 = vmatprep.mubr.msk.f32.mxu0 %vm11993_vm0, %v17458_v13  ;;  %v17656_v51 = vcombine.low %v17654_v56, %v17655_v62 }
 0x515   :  { %11007 = vmatmul.mubr.msk.f32.gmra.mrb[148].mxu0 %vm6146_vm3, %v17648_v8  ;;  %v16355_v0 = vpop.f32.mrb[52].mxu0 }
 0x516   :  { %11009 = vmatprep.mubr.msk.f32.mxu0 %vm11993_vm0, %v17458_v13  ;;  %v10824_v26 = vpop.f32.mrb[53].mxu0 }
 0x517   :  { %v17657_v26 = vcombine.low %v17584_v46, %v15593_v4  ;;  %v7766_v4 = vcombine.low %v15994_v24, %v16416_v10  ;;  %v17659_v46 = vld [vmem:[#allocation5_spill] sm:$0xff] }
 0x519   :  { %11010 = vmatmul.mubr.msk.f32.gmra.mrb[150].mxu0 %vm6146_vm3, %v17649_v35 }
 0x51a   :  { %11012 = vmatprep.mubr.msk.f32.mxu0 %vm11993_vm0, %v17458_v13 }
 0x51d   :  { %11013 = vmatmul.mubr.msk.f32.gmra.mrb[152].mxu0 %vm6146_vm3, %v7535_v27 }
 0x51e   :  { %11015 = vmatprep.mubr.msk.f32.mxu0 %vm11993_vm0, %v17458_v13 }
 0x521   :  { %11016 = vmatmul.mubr.msk.f32.gmra.mrb[154].mxu0 %vm6146_vm3, %v17650_v54  ;;  %v5643_v54 = vmax.f32 %v17659_v46, 0.0 }
 0x522   :  { %11018 = vmatprep.mubr.msk.f32.mxu0 %vm11993_vm0, %v17458_v13 }
 0x523   :  { %v16376_v41 = vpop.f32.mrb[54].mxu0  ;;  %v7726_v39 = vcombine.high %v5643_v54, %v5643_v54  ;;  %v16446_v60 = vrot.slane %v5643_v54, %v14910_v12 }
 0x524   :  { %v10827_v37 = vpop.f32.mrb[55].mxu0 }
 0x525   :  { %11019 = vmatmul.mubr.msk.f32.gmra.mrb[156].mxu0 %vm6146_vm3, %v17651_v29  ;;  %v17660_v37 = vcombine.low %v16067_v11, %v16081_v38  ;;  %v7773_v29 = vrot.slane %v7766_v4, %v14910_v12  ;;  %v16455_v11 = vrot.slane %v7726_v39, %v14910_v12  ;;  %v16459_v38 = vcombine.high %v16446_v60, %v16446_v60 }
 0x526   :  { %11021 = vmatprep.mubr.msk.f32.mxu0 %vm11993_vm0, %v17458_v13  ;;  %v7786_v56 = vcombine.low %v15557_v3, %v16446_v60 }
 0x527   :  { %v7787_v62 = vcombine.low %v16459_v38, %v16455_v11 }
 0x529   :  { %11022 = vmatmul.mubr.msk.f32.gmra.mrb[158].mxu0 %vm6146_vm3, %v17652_v31  ;;  %v17661_v31 = vld [vmem:[#allocation61_spill] sm:$0xff] }
 0x52a   :  { %11032 = vmatprep.mubr.msk.f32.mxu0 %vm11993_vm0, %v17458_v13  ;;  %v16396_v28 = vpop.f32.mrb[56].mxu0 }
 0x52b   :  { %v10830_v7 = vpop.f32.mrb[57].mxu0 }
 0x52c   :  { %v17662_v7 = vcombine.low %v15709_v53, %v15743_v25  ;;  %v7794_v53 = vrot.slane %v7786_v56, %v14910_v12  ;;  %v7801_v25 = vrot.slane %v7787_v62, %v14910_v12 }
 0x52d   :  { %11033 = vmatmul.mubr.msk.f32.vlgmr.msra.gmra.mrb[160].mxu0 %vm6146_vm3, %v17656_v51  ;;  %v17663_v51 = vcombine.low %v15768_v22, %v15575_v45  ;;  %v8160_v22 = vld [vmem:[%s16701_s5 + $0x100] sm:$0xff] }
 0x52e   :  { %11583 = vmatpush3.bf16.msra.mxu0 %v11582_v32  ;;  %11035 = vmatprep.mubr.msk.f32.mxu0 %vm11993_vm0, %v17458_v13  ;;  %v7774_v32 = vcombine.low %v7773_v29, %v17661_v31  ;;  %v7802_v45 = vcombine.low %v7794_v53, %v7801_v25  ;;  %v17665_v31 = vld [vmem:[#allocation58_spill] sm:$0xff]  ;;  %v17669_v53 = vld [vmem:[#allocation55_spill] sm:$0xff] }
 0x52f   :  { %11584 = vmatprep.subr.bf16.mxu0 %v17514_v18  ;;  %v16413_v8 = vpop.f32.mrb[58].mxu0 }
 0x530   :  { %v10833_v5 = vpop.f32.mrb[59].mxu0 }
 0x531   :  { %11036 = vmatmul.mubr.msk.f32.gmra.mrb[162].mxu0 %vm6146_vm3, %v17657_v26  ;;  %v17664_v5 = vcombine.low %v15578_v40, %v16084_v30  ;;  %v16501_v40 = vcombine.high %v16416_v10, %v16416_v10  ;;  %v7947_v30 = vrot.slane %v16416_v10, 7 }
 0x532   :  { %11038 = vmatprep.mubr.msk.f32.mxu0 %vm11993_vm0, %v17458_v13  ;;  %11586 = vmatpush3.bf16.msra.mxu0 %v11585_v49 }
 0x533   :  { %11587 = vmatprep.subr.bf16.mxu0 %v17514_v18  ;;  %v7949_v56 = vrot.slane %v7947_v30, 2  ;;  %v7950_v62 = vrot.slane %v16501_v40, 7 }
 0x534   :  { %v16425_v35 = vpop.f32.mrb[60].mxu0 }
 0x535   :  { %11039 = vmatmul.mubr.msk.f32.gmra.mrb[164].mxu0 %vm6146_vm3, %v17658_v2  ;;  %v10836_v27 = vpop.f32.mrb[61].mxu0  ;;  %v8161_v2 = vld [vmem:[%s16701_s5 + $0x108] sm:$0xff] }
 0x536   :  { %11041 = vmatprep.mubr.msk.f32.mxu0 %vm11993_vm0, %v17458_v13  ;;  %v11588_v54 = vpack.c.bf16 %v8161_v2, %v8160_v22  ;;  %v7951_v22 = vsel %vm14962_vm2, %v7949_v56, %v7950_v62  ;;  %v17671_v2 = vld [vmem:[#allocation74_spill] sm:$0xff] }
 0x539   :  { %11042 = vmatmul.mubr.msk.f32.gmra.mrb[166].mxu0 %vm6146_vm3, %v17660_v37  ;;  %v16441_v34 = vpop.f32.mrb[62].mxu0  ;;  %v8162_v37 = vld [vmem:[%s16701_s5 + $0x110] sm:$0xff] }
 0x53a   :  { %11044 = vmatprep.mubr.msk.f32.mxu0 %vm11993_vm0, %v17458_v13  ;;  %v10839_v44 = vpop.f32.mrb[63].mxu0 }
 0x53d   :  { %11045 = vmatmul.mubr.msk.f32.gmra.mrb[168].mxu0 %vm6146_vm3, %v7774_v32  ;;  %v16450_v52 = vpop.f32.mrb[64].mxu0  ;;  %v17666_v32 = vld [vmem:[#allocation34_spill] sm:$0xff] }
 0x53e   :  { %11047 = vmatprep.mubr.msk.f32.mxu0 %vm11993_vm0, %v17458_v13  ;;  %v10842_v57 = vpop.f32.mrb[65].mxu0 }
 0x53f   :  { %v17667_v57 = vcombine.low %v17665_v31, %v17666_v32  ;;  %v17673_v32 = vcombine.low %v16107_v63, %v16110_v17  ;;  %v17675_v63 = vld [vmem:[#allocation62_spill] sm:$0xff]  ;;  %v17676_v17 = vld [vmem:[#allocation47_spill] sm:$0xff] }
 0x541   :  { %11048 = vmatmul.mubr.msk.f32.gmra.mrb[170].mxu0 %vm6146_vm3, %v17662_v7  ;;  %v17668_v7 = vrot.slane %v15994_v24, 7 }
 0x542   :  { %v16465_v47 = vpop.f32.mrb[66].mxu0  ;;  %11050 = vmatprep.mubr.msk.f32.mxu0 %vm11993_vm0, %v17458_v13 }
 0x543   :  { %v10845_v33 = vpop.f32.mrb[67].mxu0 }
 0x544   :  { %v7946_v33 = vrot.slane %v17668_v7, 2  ;;  %v17674_v7 = vld [vmem:[#allocation10_spill] sm:$0xff] }
 0x545   :  { %11051 = vmatmul.mubr.msk.f32.gmra.mrb[172].mxu0 %vm6146_vm3, %v17663_v51 }
 0x546   :  { %11053 = vmatprep.mubr.msk.f32.mxu0 %vm11993_vm0, %v17458_v13  ;;  %v7948_v24 = vsel %vm14962_vm2, %v7946_v33, %v7947_v30  ;;  %v16547_v30 = vcombine.high %v16455_v11, %v16455_v11 }
 0x548   :  { %v16481_v49 = vpop.f32.mrb[68].mxu0 }
 0x549   :  { %v10848_v26 = vpop.f32.mrb[69].mxu0  ;;  %11054 = vmatmul.mubr.msk.f32.gmra.mrb[174].mxu0 %vm6146_vm3, %v17664_v5 }
 0x54a   :  { %11056 = vmatprep.mubr.msk.f32.mxu0 %vm11993_vm0, %v17458_v13 }
 0x54c   :  { %v6512_v27 = vpop.f32.mrb[70].mxu0 }
 0x54d   :  { %v16496_v4 = vadd.f32 %v6512_v27, %v16355_v0  ;;  %v10859_v46 = vpop.f32.mrb[71].mxu0  ;;  %11057 = vmatmul.mubr.msk.f32.gmra.mrb[176].mxu0 %vm6146_vm3, %v7802_v45  ;;  %v8163_v0 = vld [vmem:[%s16701_s5 + $0x118] sm:$0xff]  ;;  %v17672_v27 = vld [vmem:[#allocation70_spill] sm:$0xff] }
 0x54e   :  { %11067 = vmatprep.mubr.msk.f32.mxu0 %vm11993_vm0, %v17458_v13  ;;  %v11591_v51 = vpack.c.bf16 %v8163_v0, %v8162_v37  ;;  %v7986_v37 = vcombine.low %v7948_v24, %v7951_v22  ;;  %v7954_v0 = vrot.slane %v16459_v38, 7 }
 0x550   :  { %v6517_v29 = vpop.f32.mrb[72].mxu0  ;;  %v7956_v38 = vrot.slane %v7954_v0, 2 }
 0x551   :  { %v16513_v39 = vadd.f32 %v6517_v29, %v16376_v41  ;;  %v10862_v44 = vpop.f32.mrb[73].mxu0  ;;  %11068 = vmatmul.mubr.msk.f32.vlgmr.msra.gmra.mrb[178].mxu0 %vm6146_vm3, %v17667_v57  ;;  %v17670_v41 = vld [vmem:[#allocation92_spill] sm:$0xff]  ;;  %v7957_v29 = vrot.slane %v16455_v11, 7  ;;  %v7993_v57 = vrot.slane %v7986_v37, %v14910_v12 }
 0x552   :  { %11589 = vmatpush3.bf16.msra.mxu0 %v11588_v54  ;;  %11070 = vmatprep.mubr.msk.f32.mxu0 %vm11993_vm0, %v17458_v13  ;;  %v7967_v25 = vcombine.low %v17670_v41, %v17669_v53  ;;  %v7995_v41 = vcombine.low %v17676_v17, %v17675_v63 }
 0x553   :  { %11590 = vmatprep.subr.bf16.mxu0 %v17514_v18  ;;  %v7968_v18 = vcombine.low %v17672_v27, %v17671_v2  ;;  %v7994_v33 = vcombine.low %v7993_v57, %v17674_v7  ;;  %v7959_v62 = vrot.slane %v7957_v29, 2 }
 0x554   :  { %v6522_v26 = vpop.f32.mrb[74].mxu0 }
 0x555   :  { %v16528_v5 = vadd.f32 %v6522_v26, %v16396_v28  ;;  %v10865_v45 = vpop.f32.mrb[75].mxu0  ;;  %11071 = vmatmul.mubr.msk.f32.gmra.mrb[180].mxu0 %vm6146_vm3, %v7967_v25  ;;  %v8973_v25 = vrot.slane %v16446_v60, 9 }
 0x556   :  { %11073 = vmatprep.mubr.msk.f32.mxu0 %vm11993_vm0, %v17458_v13  ;;  %11592 = vmatpush3.bf16.msra.mxu0 %v11591_v51  ;;  %v7960_v51 = vrot.slane %v16547_v30, 7  ;;  %v7958_v45 = vsel %vm14962_vm2, %v7956_v38, %v7957_v29  ;;  %v17677_v29 = vcombine.low %v17586_v20, %v17585_v21  ;;  %v17681_v38 = vcombine.low %v16029_v15, %v15636_v42 }
 0x557   :  { %v7955_v2 = vsel %vm14962_vm2, %v8973_v25, %v7954_v0  ;;  %v17684_v25 = vcombine.low %v15694_v23, %v15697_v1 }
 0x558   :  { %v6527_v46 = vpop.f32.mrb[76].mxu0  ;;  %v7961_v24 = vsel %vm14962_vm2, %v7959_v62, %v7960_v51  ;;  %v8006_v27 = vcombine.low %v15983_v61, %v7955_v2  ;;  %v17682_v51 = vcombine.low %v17593_v36, %v16148_v59  ;;  %v17683_v36 = vcombine.low %v16119_v14, %v15679_v19 }
 0x559   :  { %v16540_v28 = vadd.f32 %v6527_v46, %v16413_v8  ;;  %v10868_v54 = vpop.f32.mrb[77].mxu0  ;;  %11074 = vmatmul.mubr.msk.f32.gmra.mrb[182].mxu0 %vm6146_vm3, %v7968_v18  ;;  %v8007_v18 = vcombine.low %v7958_v45, %v7961_v24  ;;  %v17685_v45 = vld [vmem:[#allocation86_spill] sm:$0xff] }
 0x55a   :  { %11076 = vmatprep.mubr.msk.f32.mxu0 %vm11993_vm0, %v17458_v13 }
 0x55b   :  { %v8021_v55 = vrot.slane %v8007_v18, %v14910_v12 }
 0x55c   :  { %v6532_v44 = vpop.f32.mrb[78].mxu0 }
 0x55d   :  { %v6533_v31 = vadd.f32 %v6532_v44, %v16425_v35  ;;  %v10871_v8 = vpop.f32.mrb[79].mxu0  ;;  %11077 = vmatmul.mubr.msk.f32.gmra.mrb[184].mxu0 %vm6146_vm3, %v17673_v32 }
 0x55e   :  { %11079 = vmatprep.mubr.msk.f32.mxu0 %vm11993_vm0, %v17458_v13 }
 0x560   :  { %v6537_v56 = vpop.f32.mrb[80].mxu0 }
 0x561   :  { %v6538_v35 = vadd.f32 %v6537_v56, %v16441_v34  ;;  %v10874_v53 = vpop.f32.mrb[81].mxu0  ;;  %11080 = vmatmul.mubr.msk.f32.gmra.mrb[186].mxu0 %vm6146_vm3, %v7994_v33  ;;  %v17680_v56 = vcombine.low %v15997_v43, %v16018_v58 }
 0x562   :  { %11082 = vmatprep.mubr.msk.f32.mxu0 %vm11993_vm0, %v17458_v13 }
 0x564   :  { %v6542_v26 = vpop.f32.mrb[82].mxu0 }
 0x565   :  { %v6543_v34 = vadd.f32 %v6542_v26, %v16450_v52  ;;  %v10877_v22 = vpop.f32.mrb[83].mxu0  ;;  %11083 = vmatmul.mubr.msk.f32.gmra.mrb[188].mxu0 %vm6146_vm3, %v7995_v41  ;;  %v8014_v52 = vrot.slane %v8006_v27, %v14910_v12 }
 0x566   :  { %11085 = vmatprep.mubr.msk.f32.mxu0 %vm11993_vm0, %v17458_v13 }
 0x567   :  { %v8022_v21 = vcombine.low %v8014_v52, %v8021_v55 }
 0x568   :  { %v6547_v46 = vpop.f32.mrb[84].mxu0 }
 0x569   :  { %v6548_v54 = vadd.f32 %v6547_v46, %v16465_v47  ;;  %v10880_v37 = vpop.f32.mrb[85].mxu0  ;;  %11086 = vmatmul.mubr.msk.f32.gmra.mrb[190].mxu0 %vm6146_vm3, %v17677_v29  ;;  %v17678_v47 = vcombine.low %v17589_v16, %v16126_v6  ;;  %v17679_v6 = vcombine.low %v15608_v9, %v15611_v48 }
 0x56a   :  { %11088 = vmatprep.mubr.msk.f32.mxu0 %vm11993_vm0, %v17458_v13 }
 0x56c   :  { %v6552_v0 = vpop.f32.mrb[86].mxu0 }
 0x56d   :  { %v6553_v61 = vadd.f32 %v6552_v0, %v16481_v49  ;;  %v10883_v44 = vpop.f32.mrb[87].mxu0  ;;  %11089 = vmatmul.mubr.msk.f32.gmra.mrb[192].mxu0 %vm6146_vm3, %v17678_v47 }
 0x56e   :  { %11091 = vmatprep.mubr.msk.f32.mxu0 %vm11993_vm0, %v17458_v13 }
 0x570   :  { %v6797_v20 = vpop.f32.mrb[88].mxu0 }
 0x571   :  { %v6841_v8 = vadd.f32 %v6797_v20, %v16496_v4  ;;  %v10894_v32 = vpop.f32.mrb[89].mxu0  ;;  %11092 = vmatmul.mubr.msk.f32.gmra.mrb[194].mxu0 %vm6146_vm3, %v8022_v21 }
 0x572   :  { %11102 = vmatprep.mubr.msk.f32.mxu0 %vm11993_vm0, %v17458_v13 }
 0x574   :  { %v6802_v49 = vpop.f32.mrb[90].mxu0 }
 0x575   :  { %v6842_v57 = vadd.f32 %v6802_v49, %v16513_v39  ;;  %v10897_v7 = vpop.f32.mrb[91].mxu0  ;;  %11103 = vmatmul.mubr.msk.f32.vlgmr.msra.gmra.mrb[196].mxu0 %vm6146_vm3, %v17679_v6 }
 0x576   :  { %11105 = vmatprep.mubr.msk.f32.mxu0 %vm11993_vm0, %v17458_v13 }
 0x578   :  { %v6807_v16 = vpop.f32.mrb[92].mxu0 }
 0x579   :  { %v6843_v4 = vadd.f32 %v6807_v16, %v16528_v5  ;;  %v10900_v33 = vpop.f32.mrb[93].mxu0  ;;  %11106 = vmatmul.mubr.msk.f32.gmra.mrb[198].mxu0 %vm6146_vm3, %v17680_v56  ;;  %v8176_v5 = vcombine.low %v16416_v10, %v16501_v40 }
 0x57a   :  { %11108 = vmatprep.mubr.msk.f32.mxu0 %vm11993_vm0, %v17458_v13 }
 0x57c   :  { %v6812_v39 = vpop.f32.mrb[94].mxu0 }
 0x57d   :  { %v6844_v9 = vadd.f32 %v6812_v39, %v16540_v28  ;;  %v10903_v48 = vpop.f32.mrb[95].mxu0  ;;  %11109 = vmatmul.mubr.msk.f32.gmra.mrb[200].mxu0 %vm6146_vm3, %v17681_v38  ;;  %v8183_v28 = vrot.slane %v8176_v5, %v14910_v12 }
 0x57e   :  { %11111 = vmatprep.mubr.msk.f32.mxu0 %vm11993_vm0, %v17458_v13 }
 0x57f   :  { %v8184_v42 = vcombine.low %v8183_v28, %v16129_v50  ;;  %v8984_v50 = vcombine.high %v15557_v3, %v16446_v60 }
 0x580   :  { %v6817_v43 = vpop.f32.mrb[96].mxu0 }
 0x581   :  { %v6845_v58 = vadd.f32 %v6817_v43, %v6533_v31  ;;  %v10906_v62 = vpop.f32.mrb[97].mxu0  ;;  %11112 = vmatmul.mubr.msk.f32.gmra.mrb[202].mxu0 %vm6146_vm3, %v17682_v51  ;;  %v8196_v19 = vrot.slane %v8984_v50, %v14910_v12 }
 0x582   :  { %11114 = vmatprep.mubr.msk.f32.mxu0 %vm11993_vm0, %v17458_v13 }
 0x584   :  { %v6822_v15 = vpop.f32.mrb[98].mxu0 }
 0x585   :  { %v6846_v10 = vadd.f32 %v6822_v15, %v6538_v35  ;;  %v10909_v40 = vpop.f32.mrb[99].mxu0  ;;  %11115 = vmatmul.mubr.msk.f32.gmra.mrb[204].mxu0 %vm6146_vm3, %v8184_v42  ;;  %v8189_v35 = vcombine.low %v16455_v11, %v16547_v30  ;;  %v17686_v11 = vld [vmem:[#allocation77_spill] sm:$0xff] }
 0x586   :  { %11117 = vmatprep.mubr.msk.f32.mxu0 %vm11993_vm0, %v17458_v13  ;;  %v17687_v30 = vcombine.low %v17685_v45, %v17686_v11 }
 0x587   :  { %v8203_v14 = vrot.slane %v8189_v35, %v14910_v12 }
 0x588   :  { %v6827_v31 = vpop.f32.mrb[100].mxu0 }
 0x589   :  { %v6847_v53 = vadd.f32 %v6827_v31, %v6543_v34  ;;  %v10912_v59 = vpop.f32.mrb[101].mxu0  ;;  %11118 = vmatmul.mubr.msk.f32.gmra.mrb[206].mxu0 %vm6146_vm3, %v17683_v36  ;;  %v8204_v23 = vcombine.low %v8196_v19, %v8203_v14 }
 0x58a   :  { %11120 = vmatprep.mubr.msk.f32.mxu0 %vm11993_vm0, %v17458_v13 }
 0x58c   :  { %v6832_v63 = vpop.f32.mrb[102].mxu0 }
 0x58d   :  { %v6848_v17 = vadd.f32 %v6832_v63, %v6548_v54  ;;  %v10915_v41 = vpop.f32.mrb[103].mxu0  ;;  %11121 = vmatmul.mubr.msk.f32.gmra.mrb[208].mxu0 %vm6146_vm3, %v17684_v25 }
 0x58e   :  { %11123 = vmatprep.mubr.msk.f32.mxu0 %vm11993_vm0, %v17458_v13 }
 0x590   :  { %v6837_v26 = vpop.f32.mrb[104].mxu0 }
 0x591   :  { %v6849_v3 = vadd.f32 %v6837_v26, %v6553_v61  ;;  %v10918_v60 = vpop.f32.mrb[105].mxu0  ;;  %11124 = vmatmul.mubr.msk.f32.gmra.mrb[210].mxu0 %vm6146_vm3, %v17687_v30 }
 0x592   :  { %11126 = vmatprep.mubr.msk.f32.mxu0 %vm11993_vm0, %v17458_v13 }
 0x594   :  { %v7093_v1 = vpop.f32.mrb[106].mxu0 }
 0x595   :  { %v7137_v24 = vadd.f32 %v7093_v1, %v6841_v8  ;;  %v10929_v34 = vpop.f32.mrb[107].mxu0  ;;  %11127 = vmatmul.mubr.msk.f32.gmra.mrb[212].mxu0 %vm6146_vm3, %v8204_v23 }
 0x598   :  { %v7098_v22 = vpop.f32.mrb[108].mxu0 }
 0x599   :  { %v7138_v2 = vadd.f32 %v7098_v22, %v6842_v57  ;;  %v10932_v12 = vpop.f32.mrb[109].mxu0 }
 0x59c   :  { %v7103_v27 = vpop.f32.mrb[110].mxu0 }
 0x59d   :  { %v7139_v18 = vadd.f32 %v7103_v27, %v6843_v4  ;;  %v10935_v46 = vpop.f32.mrb[111].mxu0 }
 0x5a0   :  { %v7108_v54 = vpop.f32.mrb[112].mxu0 }
 0x5a1   :  { %v7140_v37 = vadd.f32 %v7108_v54, %v6844_v9  ;;  %v10938_v29 = vpop.f32.mrb[113].mxu0 }
 0x5a4   :  { %v7113_v52 = vpop.f32.mrb[114].mxu0 }
 0x5a5   :  { %v7141_v55 = vadd.f32 %v7113_v52, %v6845_v58  ;;  %v10941_v0 = vpop.f32.mrb[115].mxu0 }
 0x5a8   :  { %v7118_v61 = vpop.f32.mrb[116].mxu0 }
 0x5a9   :  { %v7142_v13 = vadd.f32 %v7118_v61, %v6846_v10  ;;  %v10944_v44 = vpop.f32.mrb[117].mxu0 }
 0x5ac   :  { %v7123_v47 = vpop.f32.mrb[118].mxu0 }
 0x5ad   :  { %v7143_v21 = vadd.f32 %v7123_v47, %v6847_v53  ;;  %v10947_v20 = vpop.f32.mrb[119].mxu0 }
 0x5b0   :  { %v7128_v8 = vpop.f32.mrb[120].mxu0 }
 0x5b1   :  { %v7144_v32 = vadd.f32 %v7128_v8, %v6848_v17  ;;  %v10950_v49 = vpop.f32.mrb[121].mxu0 }
 0x5b4   :  { %v7133_v57 = vpop.f32.mrb[122].mxu0 }
 0x5b5   :  { %v7145_v7 = vadd.f32 %v7133_v57, %v6849_v3  ;;  %v10953_v6 = vpop.f32.mrb[123].mxu0 }
 0x5b8   :  { %v7409_v16 = vpop.f32.mrb[124].mxu0 }
 0x5b9   :  { %v7453_v4 = vadd.f32 %v7409_v16, %v7137_v24  ;;  %v10964_v33 = vpop.f32.mrb[125].mxu0 }
 0x5bc   :  { %v7414_v56 = vpop.f32.mrb[126].mxu0 }
 0x5bd   :  { %v7454_v39 = vadd.f32 %v7414_v56, %v7138_v2  ;;  %v10967_v9 = vpop.f32.mrb[127].mxu0 }
 0x5c0   :  { %v7419_v48 = vpop.f32.mrb[128].mxu0 }
 0x5c1   :  { %v7455_v38 = vadd.f32 %v7419_v48, %v7139_v18  ;;  %v10970_v5 = vpop.f32.mrb[129].mxu0 }
 0x5c4   :  { %v7424_v43 = vpop.f32.mrb[130].mxu0 }
 0x5c5   :  { %v7456_v58 = vadd.f32 %v7424_v43, %v7140_v37  ;;  %v10973_v62 = vpop.f32.mrb[131].mxu0 }
 0x5c8   :  { %v7429_v51 = vpop.f32.mrb[132].mxu0 }
 0x5c9   :  { %v7457_v28 = vadd.f32 %v7429_v51, %v7141_v55  ;;  %v10976_v42 = vpop.f32.mrb[133].mxu0 }
 0x5cc   :  { %v7434_v15 = vpop.f32.mrb[134].mxu0 }
 0x5cd   :  { %v7458_v10 = vadd.f32 %v7434_v15, %v7142_v13  ;;  %v10979_v40 = vpop.f32.mrb[135].mxu0 }
 0x5d0   :  { %v7439_v31 = vpop.f32.mrb[136].mxu0 }
 0x5d1   :  { %v7459_v53 = vadd.f32 %v7439_v31, %v7143_v21  ;;  %v10982_v59 = vpop.f32.mrb[137].mxu0 }
 0x5d4   :  { %v7444_v36 = vpop.f32.mrb[138].mxu0 }
 0x5d5   :  { %v7460_v50 = vadd.f32 %v7444_v36, %v7144_v32  ;;  %v10985_v35 = vpop.f32.mrb[139].mxu0 }
 0x5d8   :  { %v7449_v63 = vpop.f32.mrb[140].mxu0 }
 0x5d9   :  { %v7461_v17 = vadd.f32 %v7449_v63, %v7145_v7  ;;  %v10988_v41 = vpop.f32.mrb[141].mxu0 }
 0x5dc   :  { %v7655_v25 = vpop.f32.mrb[142].mxu0 }
 0x5dd   :  { %v7699_v19 = vadd.f32 %v7655_v25, %v7453_v4  ;;  %v10999_v14 = vpop.f32.mrb[143].mxu0 }
 0x5e0   :  { %v7660_v26 = vpop.f32.mrb[144].mxu0 }
 0x5e1   :  { %v7700_v3 = vadd.f32 %v7660_v26, %v7454_v39  ;;  %v11002_v60 = vpop.f32.mrb[145].mxu0 }
 0x5e4   :  { %v7665_v45 = vpop.f32.mrb[146].mxu0 }
 0x5e5   :  { %v7701_v11 = vadd.f32 %v7665_v45, %v7455_v38  ;;  %v11005_v30 = vpop.f32.mrb[147].mxu0 }
 0x5e8   :  { %v7670_v23 = vpop.f32.mrb[148].mxu0 }
 0x5e9   :  { %v7702_v1 = vadd.f32 %v7670_v23, %v7456_v58  ;;  %v11008_v24 = vpop.f32.mrb[149].mxu0 }
 0x5ec   :  { %v7675_v34 = vpop.f32.mrb[150].mxu0 }
 0x5ed   :  { %v7703_v22 = vadd.f32 %v7675_v34, %v7457_v28  ;;  %v11011_v2 = vpop.f32.mrb[151].mxu0 }
 0x5f0   :  { %v7680_v12 = vpop.f32.mrb[152].mxu0 }
 0x5f1   :  { %v7704_v27 = vadd.f32 %v7680_v12, %v7458_v10  ;;  %v11014_v18 = vpop.f32.mrb[153].mxu0 }
 0x5f4   :  { %v7685_v46 = vpop.f32.mrb[154].mxu0 }
 0x5f5   :  { %v7705_v54 = vadd.f32 %v7685_v46, %v7459_v53  ;;  %v11017_v37 = vpop.f32.mrb[155].mxu0  ;;  %v8994_v46 = vld [vmem:[%s16703_s6] ss:$0 sm:$0xff] }
 0x5f8   :  { %v7690_v29 = vpop.f32.mrb[156].mxu0 }
 0x5f9   :  { %v7706_v52 = vadd.f32 %v7690_v29, %v7460_v50  ;;  %v11020_v55 = vpop.f32.mrb[157].mxu0 }
 0x5fc   :  { %v7695_v0 = vpop.f32.mrb[158].mxu0 }
 0x5fd   :  { %v7707_v61 = vadd.f32 %v7695_v0, %v7461_v17  ;;  %v11023_v13 = vpop.f32.mrb[159].mxu0 }
 0x600   :  { %v7887_v44 = vpop.f32.mrb[160].mxu0 }
 0x601   :  { %v7931_v47 = vadd.f32 %v7887_v44, %v7699_v19  ;;  %v11034_v21 = vpop.f32.mrb[161].mxu0 }
 0x604   :  { %v7892_v20 = vpop.f32.mrb[162].mxu0 }
 0x605   :  { %v7932_v8 = vadd.f32 %v7892_v20, %v7700_v3  ;;  %v11037_v32 = vpop.f32.mrb[163].mxu0 }
 0x608   :  { %v7897_v49 = vpop.f32.mrb[164].mxu0 }
 0x609   :  { %v7933_v57 = vadd.f32 %v7897_v49, %v7701_v11  ;;  %v11040_v7 = vpop.f32.mrb[165].mxu0 }
 0x60c   :  { %v7902_v6 = vpop.f32.mrb[166].mxu0 }
 0x60d   :  { %v7934_v16 = vadd.f32 %v7902_v6, %v7702_v1  ;;  %v11043_v4 = vpop.f32.mrb[167].mxu0 }
 0x610   :  { %v7907_v33 = vpop.f32.mrb[168].mxu0 }
 0x611   :  { %v7935_v56 = vadd.f32 %v7907_v33, %v7703_v22  ;;  %v11046_v39 = vpop.f32.mrb[169].mxu0 }
 0x614   :  { %v7912_v9 = vpop.f32.mrb[170].mxu0 }
 0x615   :  { %v7936_v48 = vadd.f32 %v7912_v9, %v7704_v27  ;;  %v11049_v38 = vpop.f32.mrb[171].mxu0 }
 0x618   :  { %v7917_v5 = vpop.f32.mrb[172].mxu0 }
 0x619   :  { %v7937_v43 = vadd.f32 %v7917_v5, %v7705_v54  ;;  %v11052_v58 = vpop.f32.mrb[173].mxu0 }
 0x61c   :  { %v7922_v62 = vpop.f32.mrb[174].mxu0 }
 0x61d   :  { %v7938_v51 = vadd.f32 %v7922_v62, %v7706_v52  ;;  %v11055_v28 = vpop.f32.mrb[175].mxu0 }
 0x620   :  { %v7927_v42 = vpop.f32.mrb[176].mxu0 }
 0x621   :  { %v7939_v15 = vadd.f32 %v7927_v42, %v7707_v61  ;;  %v11058_v10 = vpop.f32.mrb[177].mxu0 }
 0x624   :  { %v8107_v40 = vpop.f32.mrb[178].mxu0 }
 0x625   :  { %v8151_v31 = vadd.f32 %v8107_v40, %v7931_v47  ;;  %v11069_v53 = vpop.f32.mrb[179].mxu0 }
 0x628   :  { %v8112_v59 = vpop.f32.mrb[180].mxu0 }
 0x629   :  { %v8152_v36 = vadd.f32 %v8112_v59, %v7932_v8  ;;  %v11072_v50 = vpop.f32.mrb[181].mxu0 }
 0x62c   :  { %v8117_v35 = vpop.f32.mrb[182].mxu0 }
 0x62d   :  { %v8153_v63 = vadd.f32 %v8117_v35, %v7933_v57  ;;  %v11075_v17 = vpop.f32.mrb[183].mxu0 }
 0x630   :  { %v8122_v41 = vpop.f32.mrb[184].mxu0 }
 0x631   :  { %v8154_v25 = vadd.f32 %v8122_v41, %v7934_v16  ;;  %v11078_v19 = vpop.f32.mrb[185].mxu0 }
 0x634   :  { %v8127_v14 = vpop.f32.mrb[186].mxu0 }
 0x635   :  { %v8155_v26 = vadd.f32 %v8127_v14, %v7935_v56  ;;  %v11081_v3 = vpop.f32.mrb[187].mxu0 }
 0x638   :  { %v8132_v60 = vpop.f32.mrb[188].mxu0 }
 0x639   :  { %v8156_v45 = vadd.f32 %v8132_v60, %v7936_v48  ;;  %v11084_v11 = vpop.f32.mrb[189].mxu0 }
 0x63c   :  { %v8137_v30 = vpop.f32.mrb[190].mxu0 }
 0x63d   :  { %v8157_v23 = vadd.f32 %v8137_v30, %v7937_v43  ;;  %v11087_v1 = vpop.f32.mrb[191].mxu0 }
 0x640   :  { %v8142_v24 = vpop.f32.mrb[192].mxu0 }
 0x641   :  { %v8158_v34 = vadd.f32 %v8142_v24, %v7938_v51  ;;  %v11090_v22 = vpop.f32.mrb[193].mxu0 }
 0x644   :  { %v8147_v2 = vpop.f32.mrb[194].mxu0 }
 0x645   :  { %v8159_v12 = vadd.f32 %v8147_v2, %v7939_v15  ;;  %v11093_v27 = vpop.f32.mrb[195].mxu0 }
 0x648   :  { %v8289_v18 = vpop.f32.mrb[196].mxu0 }
 0x649   :  { %v8333_v54 = vadd.f32 %v8289_v18, %v8151_v31  ;;  %v11104_v37 = vpop.f32.mrb[197].mxu0 }
 0x64b   :  { %v8349_v29 = vadd.f32 %v8994_v46, %v8333_v54 }
 0x64c   :  { %v8294_v52 = vpop.f32.mrb[198].mxu0 }
 0x64d   :  { %8359 = vst.msk [vmem:[%s16704_s7] sm:$0xff] %vm8358_vm4, %v8349_v29  ;;  %v8334_v55 = vadd.f32 %v8294_v52, %v8152_v36  ;;  %v11107_v0 = vpop.f32.mrb[199].mxu0 }
 0x64f   :  { %v8350_v61 = vadd.f32 %v8994_v46, %v8334_v55 }
 0x650   :  { %v8299_v13 = vpop.f32.mrb[200].mxu0 }
 0x651   :  { %8360 = vst.msk [vmem:[%s16704_s7 + $0x8] sm:$0xff] %vm8358_vm4, %v8350_v61  ;;  %v8335_v44 = vadd.f32 %v8299_v13, %v8153_v63  ;;  %v11110_v47 = vpop.f32.mrb[201].mxu0 }
 0x653   :  { %v8351_v21 = vadd.f32 %v8994_v46, %v8335_v44 }
 0x654   :  { %v8304_v20 = vpop.f32.mrb[202].mxu0 }
 0x655   :  { %8361 = vst.msk [vmem:[%s16704_s7 + $0x10] sm:$0xff] %vm8358_vm4, %v8351_v21  ;;  %v8336_v8 = vadd.f32 %v8304_v20, %v8154_v25  ;;  %v11113_v32 = vpop.f32.mrb[203].mxu0 }
 0x657   :  { %v8352_v49 = vadd.f32 %v8994_v46, %v8336_v8 }
 0x658   :  { %v8309_v57 = vpop.f32.mrb[204].mxu0 }
 0x659   :  { %8362 = vst.msk [vmem:[%s16704_s7 + $0x18] sm:$0xff] %vm8358_vm4, %v8352_v49  ;;  %v8337_v7 = vadd.f32 %v8309_v57, %v8155_v26  ;;  %v11116_v6 = vpop.f32.mrb[205].mxu0 }
 0x65b   :  { %v8353_v16 = vadd.f32 %v8994_v46, %v8337_v7 }
 0x65c   :  { %v8314_v4 = vpop.f32.mrb[206].mxu0 }
 0x65d   :  { %8363 = vst.msk [vmem:[%s16704_s7 + $0x20] sm:$0xff] %vm8358_vm4, %v8353_v16  ;;  %v8338_v33 = vadd.f32 %v8314_v4, %v8156_v45  ;;  %v11119_v56 = vpop.f32.mrb[207].mxu0 }
 0x65f   :  { %v8354_v39 = vadd.f32 %v8994_v46, %v8338_v33 }
 0x660   :  { %v8319_v9 = vpop.f32.mrb[208].mxu0 }
 0x661   :  { %8364 = vst.msk [vmem:[%s16704_s7 + $0x28] sm:$0xff] %vm8358_vm4, %v8354_v39  ;;  %v8339_v48 = vadd.f32 %v8319_v9, %v8157_v23  ;;  %v11122_v38 = vpop.f32.mrb[209].mxu0 }
 0x663   :  { %v8355_v5 = vadd.f32 %v8994_v46, %v8339_v48 }
 0x664   :  { %v8324_v43 = vpop.f32.mrb[210].mxu0 }
 0x665   :  { %8365 = vst.msk [vmem:[%s16704_s7 + $0x30] sm:$0xff] %vm8358_vm4, %v8355_v5  ;;  %v8340_v58 = vadd.f32 %v8324_v43, %v8158_v34  ;;  %v11125_v62 = vpop.f32.mrb[211].mxu0 }
 0x667   :  { %v8356_v51 = vadd.f32 %v8994_v46, %v8340_v58 }
 0x668   :  { %v8329_v28 = vpop.f32.mrb[212].mxu0 }
 0x669   :  { %8366 = vst.msk [vmem:[%s16704_s7 + $0x38] sm:$0xff] %vm8358_vm4, %v8356_v51  ;;  %v8341_v42 = vadd.f32 %v8329_v28, %v8159_v12  ;;  %v11128_v15 = vpop.f32.mrb[213].mxu0 }
 0x66b   :  { %v8357_v10 = vadd.f32 %v8994_v46, %v8341_v42 }
 0x66d   :  { %8367 = vst.msk [vmem:[%s16704_s7 + $0x40] sm:$0xff] %vm8358_vm4, %v8357_v10 }

</bundles_post_ra>
